<compile_context>
chip_gen: v7x
topology: tpu7x:2x2x1
jax: 0.10.0
libtpu: 0.0.40
codegen_flags: <defaults>
</compile_context>

<pallas_src>
import functools

import jax
import jax.numpy as jnp
from jax.experimental import pallas as pl
from jax.experimental.pallas import tpu as pltpu

BN_EPS = 1e-5
LANE = 128
_MAX_TILE_M = 512


def _round_up(v, m):
    return (v + m - 1) // m * m


def _stack2(a, b):
    # Stack two [1, H] rows into a [2, H] tile without jnp.concatenate
    # (sublane concat of 1-row operands is not reliably lowered by Mosaic).
    shape = (2, a.shape[1])
    row = jax.lax.broadcasted_iota(jnp.int32, shape, 0)
    return jnp.where(row == 0, jnp.broadcast_to(a, shape), jnp.broadcast_to(b, shape))


def _bn_scale_shift(st, gb, n):
    # Fused training-mode BatchNorm1d from accumulated (sum, sumsq):
    #   mean = sum/n ; var = sumsq/n - mean^2 (biased)
    #   y = h*scale + shift, scale = gamma*rsqrt(var+eps), shift = beta - mean*scale
    inv_n = jnp.float32(1.0 / n)
    mean = st[0:1, :] * inv_n
    var = jnp.maximum(st[1:2, :] * inv_n - mean * mean, 0.0)
    scale = gb[0:1, :] * jax.lax.rsqrt(var + BN_EPS)
    shift = gb[1:2, :] - mean * scale
    return scale, shift


def _col_stats(h, i, n, tm, need_mask):
    # Per-column (sum, sumsq) of this row tile.  On the (possibly partial)
    # last tile, zero the out-of-range rows with jnp.where (not multiply) so
    # garbage/NaN in the unread padding cannot poison the sums.
    if need_mask:
        row = jax.lax.broadcasted_iota(jnp.int32, h.shape, 0)
        h = jnp.where(row < (n - i * tm), h, 0.0)
    return _stack2(jnp.sum(h, axis=0, keepdims=True),
                   jnp.sum(h * h, axis=0, keepdims=True))


# ---- phase 1: column stats of h1 = x @ w1 (h1 never written to HBM) ----
def _fc1_stats_kernel(x_ref, w1_ref, st_ref, *, n, tm, need_mask):
    i = pl.program_id(0)
    h = jnp.dot(x_ref[...].astype(jnp.bfloat16), w1_ref[...],
                preferred_element_type=jnp.float32)

    @pl.when(i == 0)
    def _init():
        st_ref[...] = jnp.zeros_like(st_ref)

    st_ref[...] += _col_stats(h, i, n, tm, need_mask)


# ---- phase 2: recompute h1, BN1+ReLU, h2 = a @ w2 (bf16 store), stats of h2 ----
def _fc1_bn_relu_fc2_stats_kernel(x_ref, w1_ref, st1_ref, gb1_ref, w2_ref,
                                  h2_ref, st2_ref, ss_ref, *, n, tm, need_mask):
    i = pl.program_id(0)

    @pl.when(i == 0)
    def _init():
        scale, shift = _bn_scale_shift(st1_ref[...], gb1_ref[...], n)
        ss_ref[...] = _stack2(scale, shift)          # grid-invariant: compute once
        st2_ref[...] = jnp.zeros_like(st2_ref)

    h1 = jnp.dot(x_ref[...].astype(jnp.bfloat16), w1_ref[...],
                 preferred_element_type=jnp.float32)
    a = jnp.maximum(h1 * ss_ref[0:1, :] + ss_ref[1:2, :], 0.0)   # fused BN1 + ReLU
    h2 = jnp.dot(a.astype(jnp.bfloat16), w2_ref[...],
                 preferred_element_type=jnp.float32)
    h2_ref[...] = h2.astype(h2_ref.dtype)                        # bf16 intermediate
    st2_ref[...] += _col_stats(h2, i, n, tm, need_mask)          # stats from f32 h2


# ---- phase 3: BN2+ReLU, out = a @ w3 + b3 (lane-dense padded output) ----
def _bn_relu_fc3_kernel(h_ref, st_ref, gb_ref, w3_ref, b3_ref, o_ref, *, n):
    # "parallel" grid axis (megacore): per-tile recompute of the tiny (1, Hp)
    # scale/shift (EUP rsqrt + two FMAs) instead of a per-core scratch init.
    scale, shift = _bn_scale_shift(st_ref[...], gb_ref[...], n)
    a = jnp.maximum(h_ref[...].astype(jnp.float32) * scale + shift, 0.0)
    out = jnp.dot(a.astype(jnp.bfloat16), w3_ref[...],
                  preferred_element_type=jnp.float32) + b3_ref[...]
    o_ref[...] = out.astype(o_ref.dtype)


def pc_embedding(x, params):
    """PCEmbedding forward. x: [N, in_features] f32. params: see init_params().

    fc1/fc2 biases in `params` are ignored on purpose: BatchNorm's mean
    subtraction cancels them exactly.
    """
    N, F0 = x.shape
    H = params["w1"].shape[1]
    O = params["w3"].shape[1]
    Hp = _round_up(H, LANE)
    Op = _round_up(O, LANE)

    def pad_to(a, rows, cols):
        return jnp.pad(a, ((0, rows - a.shape[0]), (0, cols - a.shape[1])))

    # bf16 MXU operands (halves weight DMA bytes); zero-pad hidden/out dims to
    # multiples of 128 lanes.  Padded gamma/beta are zero => padded columns
    # stay exactly zero through BN+ReLU and contribute nothing downstream.
    w1 = pad_to(params["w1"], F0, Hp).astype(jnp.bfloat16)
    w2 = pad_to(params["w2"], Hp, Hp).astype(jnp.bfloat16)
    w3 = pad_to(params["w3"], Hp, Op).astype(jnp.bfloat16)
    b3 = pad_to(params["b3"], 1, Op)
    gb1 = pad_to(jnp.concatenate([params["g1"], params["be1"]], axis=0), 2, Hp)
    gb2 = pad_to(jnp.concatenate([params["g2"], params["be2"]], axis=0), 2, Hp)

    tm = min(N, _MAX_TILE_M)
    nt = pl.cdiv(N, tm)
    need_mask = (N % tm) != 0

    row_x = pl.BlockSpec((tm, F0), lambda i: (i, 0))
    row_h = pl.BlockSpec((tm, Hp), lambda i: (i, 0))
    row_o = pl.BlockSpec((tm, Op), lambda i: (i, 0))
    full = lambda shape: pl.BlockSpec(shape, lambda i: (0, 0))

    st_shape = jax.ShapeDtypeStruct((2, Hp), jnp.float32)

    def cparams(tile_bytes, small_bytes, scratch_bytes, semantics):
        # Double-buffered row tiles + (conservatively double-counted) weights
        # and stats + headroom; clamped to v7x's 64 MiB physical VMEM and
        # raised above v5e's 16 MiB scoped default.
        limit = 2 * tile_bytes + 2 * small_bytes + scratch_bytes + (8 << 20)
        return pltpu.CompilerParams(
            dimension_semantics=semantics,
            vmem_limit_bytes=int(max(min(limit, 64 << 20), 32 << 20)))

    # ---- phase 1: stats-only pass over x (h1 not materialized) ----
    st1 = pl.pallas_call(
        functools.partial(_fc1_stats_kernel, n=N, tm=tm, need_mask=need_mask),
        out_shape=st_shape,
        grid=(nt,),
        in_specs=[row_x, full((F0, Hp))],
        out_specs=full((2, Hp)),
        compiler_params=cparams(tm * F0 * 4,
                                F0 * Hp * 2 + 2 * Hp * 4,
                                0, ("arbitrary",)),
    )(x, w1)

    # ---- phase 2: recompute h1, BN1+ReLU, fc2; h2 stored bf16; stats of h2 ----
    h2, st2 = pl.pallas_call(
        functools.partial(_fc1_bn_relu_fc2_stats_kernel, n=N, tm=tm,
                          need_mask=need_mask),
        out_shape=(jax.ShapeDtypeStruct((N, Hp), jnp.bfloat16), st_shape),
        grid=(nt,),
        in_specs=[row_x, full((F0, Hp)), full((2, Hp)), full((2, Hp)),
                  full((Hp, Hp))],
        out_specs=(row_h, full((2, Hp))),
        scratch_shapes=[pltpu.VMEM((2, Hp), jnp.float32)],
        compiler_params=cparams(tm * F0 * 4 + tm * Hp * 2,
                                F0 * Hp * 2 + Hp * Hp * 2 + 4 * 2 * Hp * 4,
                                2 * Hp * 4, ("arbitrary",)),
    )(x, w1, st1, gb1, w2)

    # ---- phase 3: BN2+ReLU, fc3 + bias; lane-dense Op-padded store ----
    out = pl.pallas_call(
        functools.partial(_bn_relu_fc3_kernel, n=N),
        out_shape=jax.ShapeDtypeStruct((N, Op), jnp.float32),
        grid=(nt,),
        in_specs=[row_h, full((2, Hp)), full((2, Hp)), full((Hp, Op)),
                  full((1, Op))],
        out_specs=row_o,
        compiler_params=cparams(tm * Hp * 2 + tm * Op * 4,
                                Hp * Op * 2 + 2 * 2 * Hp * 4 + Op * 4,
                                0, ("parallel",)),
    )(h2, st2, gb2, w3, b3)

    # Padded output columns are exactly zero (padded w3/b3 are zero).  The
    # trim below costs one extra XLA copy over the whole output; callers that
    # can consume the Op-padded array should take `out` directly.
    return out if O == Op else out[:, :O]


def init_params(key, in_features, hidden_features, out_features):
    """PyTorch-style uniform(+/- 1/sqrt(fan_in)) init; weights stored as [in, out]."""
    ks = jax.random.split(key, 6)

    def linear(kw, kb, fan_in, fan_out):
        bound = 1.0 / jnp.sqrt(float(fan_in))
        w = jax.random.uniform(kw, (fan_in, fan_out), jnp.float32, -bound, bound)
        b = jax.random.uniform(kb, (1, fan_out), jnp.float32, -bound, bound)
        return w, b

    w1, b1 = linear(ks[0], ks[1], in_features, hidden_features)
    w2, b2 = linear(ks[2], ks[3], hidden_features, hidden_features)
    w3, b3 = linear(ks[4], ks[5], hidden_features, out_features)
    ones = jnp.ones((1, hidden_features), jnp.float32)
    zeros = jnp.zeros((1, hidden_features), jnp.float32)
    return {
        "w1": w1, "b1": b1, "g1": ones, "be1": zeros,
        "w2": w2, "b2": b2, "g2": ones, "be2": zeros,
        "w3": w3, "b3": b3,
    }


def _reference_f32(x, p):
    """Plain f32 PyTorch train-mode forward (fc1/fc2 biases included)."""
    def bn(h, g, b):
        m = jnp.mean(h, axis=0, keepdims=True)
        v = jnp.mean((h - m) ** 2, axis=0, keepdims=True)
        return (h - m) / jnp.sqrt(v + BN_EPS) * g + b

    h = jnp.maximum(bn(x @ p["w1"] + p["b1"], p["g1"], p["be1"]), 0.0)
    h = jnp.maximum(bn(h @ p["w2"] + p["b2"], p["g2"], p["be2"]), 0.0)
    return h @ p["w3"] + p["b3"]


def _reference_kernel_math(x, p):
    """Reference mirroring the kernel math: bf16 matmul operands (f32 acc),
    biasless fc1/fc2, one-pass fused BN (var = E[h^2]-mean^2), and h2 stored
    in bf16 (stats taken from the f32 result before the cast)."""
    n = x.shape[0]

    def mm(a, w):
        return jnp.dot(a.astype(jnp.bfloat16), w.astype(jnp.bfloat16),
                       preferred_element_type=jnp.float32)

    def scale_shift(h, g, b):
        mean = jnp.sum(h, axis=0, keepdims=True) / n
        var = jnp.maximum(jnp.sum(h * h, axis=0, keepdims=True) / n - mean * mean, 0.0)
        scale = g * jax.lax.rsqrt(var + BN_EPS)
        return scale, b - mean * scale

    h1 = mm(x, p["w1"])
    s1, t1 = scale_shift(h1, p["g1"], p["be1"])
    a1 = jnp.maximum(h1 * s1 + t1, 0.0)

    h2 = mm(a1, p["w2"])
    s2, t2 = scale_shift(h2, p["g2"], p["be2"])           # stats from f32 h2
    h2b = h2.astype(jnp.bfloat16).astype(jnp.float32)      # bf16 round-trip store
    a2 = jnp.maximum(h2b * s2 + t2, 0.0)

    return mm(a2, p["w3"]) + p["b3"]


if __name__ == "__main__":
    key = jax.random.PRNGKey(0)
    k_x, k_p = jax.random.split(key)

    # Multi-tile with a ragged last tile: N=1280 with tm=512 -> 3 grid steps,
    # the last one masked; exercises the cross-tile BN-stat accumulator and
    # the partial-tile path while staying small.
    N, in_features, hidden_features, out_features = 1280, 16, 32, 64
    x = jax.random.normal(k_x, (N, in_features), jnp.float32)
    params = init_params(k_p, in_features, hidden_features, out_features)

    out = jax.block_until_ready(jax.jit(pc_embedding)(x, params))
    assert out.shape == (N, out_features)

    # Check against a reference that mirrors the kernel's exact math
    # (small slack covers reduction-order effects across tiles).
    ref_exact = _reference_kernel_math(x, params)
    assert jnp.allclose(out, ref_exact, atol=1e-2, rtol=1e-2), (
        "kernel-math mismatch, max abs diff = %e"
        % float(jnp.max(jnp.abs(out - ref_exact))))

    # Loose semantic check vs plain f32 PyTorch train-mode forward (with the
    # fc1/fc2 biases) -- differences come only from bf16 operands/intermediate.
    ref_f32 = _reference_f32(x, params)
    assert jnp.allclose(out, ref_f32, atol=1e-1, rtol=1e-1), (
        "f32 semantics mismatch, max abs diff = %e"
        % float(jnp.max(jnp.abs(out - ref_f32))))

    print("KERNEL_OK")
</pallas_src>

<mosaic_0001>
module attributes {stable_mosaic.version = 11 : i64} {
  func.func @_fc1_stats_kernel(%arg0: i32, %arg1: memref<512x16xf32, #tpu.memory_space<vmem>>, %arg2: memref<16x128xbf16, #tpu.memory_space<vmem>>, %arg3: memref<2x128xf32, #tpu.memory_space<vmem>>) attributes {dimension_semantics = [#tpu.dimension_semantics<arbitrary>], iteration_bounds = array<i64: 3>, scalar_prefetch = 0 : i64, scratch_operands = 0 : i64, tpu.core_type = #tpu.core_type<tc>, window_params = [{transform_indices = @transform_0, window_bounds = array<i64: 512, 16>}, {pipeline_mode = #tpu.pipeline_mode<synchronous>, transform_indices = @transform_1, window_bounds = array<i64: 16, 128>}, {pipeline_mode = #tpu.pipeline_mode<synchronous>, transform_indices = @transform_2, window_bounds = array<i64: 2, 128>}]} {
    %c0 = arith.constant 0 : index
    %c0_0 = arith.constant 0 : index
    %0 = vector.load %arg1[%c0, %c0_0] : memref<512x16xf32, #tpu.memory_space<vmem>>, vector<512x16xf32>
    %1 = arith.truncf %0 : vector<512x16xf32> to vector<512x16xbf16>
    %c0_1 = arith.constant 0 : index
    %c0_2 = arith.constant 0 : index
    %2 = vector.load %arg2[%c0_1, %c0_2] : memref<16x128xbf16, #tpu.memory_space<vmem>>, vector<16x128xbf16>
    %cst = arith.constant dense<0.000000e+00> : vector<512x128xf32>
    %3 = tpu.matmul %1, %2, %cst {dimension_numbers = #tpu.dot_dimension_numbers<[1], [0], [0], [1], [0, 0, 1, 1], [], []>} : vector<512x16xbf16>, vector<16x128xbf16>, vector<512x128xf32> -> vector<512x128xf32>
    %c0_i32 = arith.constant 0 : i32
    %4 = arith.cmpi eq, %arg0, %c0_i32 : i32
    %5 = arith.extui %4 : i1 to i32
    %c0_i32_3 = arith.constant 0 : i32
    %6 = arith.cmpi ne, %5, %c0_i32_3 : i32
    scf.if %6 {
      %cst_12 = arith.constant 0.000000e+00 : f32
      %30 = vector.broadcast %cst_12 : f32 to vector<2x128xf32>
      %c0_13 = arith.constant 0 : index
      %c0_14 = arith.constant 0 : index
      %31 = vector.load %arg3[%c0_13, %c0_14] : memref<2x128xf32, #tpu.memory_space<vmem>>, vector<2x128xf32>
      tpu.vector_store %arg3[%c0_13, %c0_14], %30 {strides = array<i32>} : memref<2x128xf32, #tpu.memory_space<vmem>>, vector<2x128xf32>,
    } else {
    }
    %c0_4 = arith.constant 0 : index
    %c0_5 = arith.constant 0 : index
    %7 = vector.load %arg3[%c0_4, %c0_5] : memref<2x128xf32, #tpu.memory_space<vmem>>, vector<2x128xf32>
    %8 = tpu.iota {dimensions = array<i32: 0>} : vector<512x128xi32>
    %c512_i32 = arith.constant 512 : i32
    %9 = arith.muli %arg0, %c512_i32 : i32
    %c1280_i32 = arith.constant 1280 : i32
    %10 = arith.subi %c1280_i32, %9 : i32
    %11 = vector.broadcast %10 : i32 to vector<512x128xi32>
    %12 = arith.cmpi slt, %8, %11 : vector<512x128xi32>
    %cst_6 = arith.constant 0.000000e+00 : f32
    %13 = vector.broadcast %cst_6 : f32 to vector<512x128xf32>
    %14 = arith.select %12, %3, %13 : vector<512x128xi1>, vector<512x128xf32>
    %cst_7 = arith.constant dense<0.000000e+00> : vector<128xf32>
    %15 = vector.multi_reduction <add>, %14, %cst_7 [0] : vector<512x128xf32> to vector<128xf32>
    %16 = vector.shape_cast %15 : vector<128xf32> to vector<1x128xf32>
    %17 = arith.mulf %14, %14 : vector<512x128xf32>
    %cst_8 = arith.constant dense<0.000000e+00> : vector<128xf32>
    %18 = vector.multi_reduction <add>, %17, %cst_8 [0] : vector<512x128xf32> to vector<128xf32>
    %19 = vector.shape_cast %18 : vector<128xf32> to vector<1x128xf32>
    %20 = tpu.iota {dimensions = array<i32: 0>} : vector<2x128xi32>
    %c0_i32_9 = arith.constant 0 : i32
    %21 = vector.broadcast %c0_i32_9 : i32 to vector<2x128xi32>
    %22 = arith.cmpi eq, %20, %21 : vector<2x128xi32>
    %23 = vector.shape_cast %16 : vector<1x128xf32> to vector<1x128xf32>
    %24 = vector.broadcast %23 : vector<1x128xf32> to vector<2x128xf32>
    %25 = vector.shape_cast %19 : vector<1x128xf32> to vector<1x128xf32>
    %26 = vector.broadcast %25 : vector<1x128xf32> to vector<2x128xf32>
    %27 = arith.select %22, %24, %26 : vector<2x128xi1>, vector<2x128xf32>
    %28 = arith.addf %7, %27 : vector<2x128xf32>
    %c0_10 = arith.constant 0 : index
    %c0_11 = arith.constant 0 : index
    %29 = vector.load %arg3[%c0_10, %c0_11] : memref<2x128xf32, #tpu.memory_space<vmem>>, vector<2x128xf32>
    tpu.vector_store %arg3[%c0_10, %c0_11], %28 {strides = array<i32>} : memref<2x128xf32, #tpu.memory_space<vmem>>, vector<2x128xf32>,
    return
  }
  func.func @transform_0(%arg0: i32) -> (i32, i32) {
    %c0_i32 = arith.constant 0 : i32
    %c0_i32_0 = arith.constant 0 : i32
    return %arg0, %c0_i32 : i32, i32
  }
  func.func @transform_1(%arg0: i32) -> (i32, i32) {
    %c0_i32 = arith.constant 0 : i32
    %c0_i32_0 = arith.constant 0 : i32
    %c0_i32_1 = arith.constant 0 : i32
    return %c0_i32, %c0_i32_0 : i32, i32
  }
  func.func @transform_2(%arg0: i32) -> (i32, i32) {
    %c0_i32 = arith.constant 0 : i32
    %c0_i32_0 = arith.constant 0 : i32
    %c0_i32_1 = arith.constant 0 : i32
    return %c0_i32, %c0_i32_0 : i32, i32
  }
}

module attributes {stable_mosaic.version = 11 : i64} {
  func.func @_fc1_bn_relu_fc2_stats_kernel(%arg0: i32, %arg1: memref<512x16xf32, #tpu.memory_space<vmem>>, %arg2: memref<16x128xbf16, #tpu.memory_space<vmem>>, %arg3: memref<2x128xf32, #tpu.memory_space<vmem>>, %arg4: memref<2x128xf32, #tpu.memory_space<vmem>>, %arg5: memref<128x128xbf16, #tpu.memory_space<vmem>>, %arg6: memref<512x128xbf16, #tpu.memory_space<vmem>>, %arg7: memref<2x128xf32, #tpu.memory_space<vmem>>, %arg8: memref<2x128xf32, #tpu.memory_space<vmem>>) attributes {dimension_semantics = [#tpu.dimension_semantics<arbitrary>], iteration_bounds = array<i64: 3>, scalar_prefetch = 0 : i64, scratch_operands = 1 : i64, tpu.core_type = #tpu.core_type<tc>, window_params = [{transform_indices = @transform_0, window_bounds = array<i64: 512, 16>}, {pipeline_mode = #tpu.pipeline_mode<synchronous>, transform_indices = @transform_1, window_bounds = array<i64: 16, 128>}, {pipeline_mode = #tpu.pipeline_mode<synchronous>, transform_indices = @transform_2, window_bounds = array<i64: 2, 128>}, {pipeline_mode = #tpu.pipeline_mode<synchronous>, transform_indices = @transform_3, window_bounds = array<i64: 2, 128>}, {pipeline_mode = #tpu.pipeline_mode<synchronous>, transform_indices = @transform_4, window_bounds = array<i64: 128, 128>}, {transform_indices = @transform_5, window_bounds = array<i64: 512, 128>}, {pipeline_mode = #tpu.pipeline_mode<synchronous>, transform_indices = @transform_6, window_bounds = array<i64: 2, 128>}]} {
    %c0_i32 = arith.constant 0 : i32
    %0 = arith.cmpi eq, %arg0, %c0_i32 : i32
    %1 = arith.extui %0 : i1 to i32
    %c0_i32_0 = arith.constant 0 : i32
    %2 = arith.cmpi ne, %1, %c0_i32_0 : i32
    scf.if %2 {
      %c0_21 = arith.constant 0 : index
      %c0_22 = arith.constant 0 : index
      %43 = vector.load %arg3[%c0_21, %c0_22] : memref<2x128xf32, #tpu.memory_space<vmem>>, vector<2x128xf32>
      %c0_23 = arith.constant 0 : index
      %c0_24 = arith.constant 0 : index
      %44 = vector.load %arg4[%c0_23, %c0_24] : memref<2x128xf32, #tpu.memory_space<vmem>>, vector<2x128xf32>
      %45 = vector.extract_strided_slice %43 {offsets = [0, 0], sizes = [1, 128], strides = [1, 1]} : vector<2x128xf32> to vector<1x128xf32>
      %cst_25 = arith.constant 7.812500e-04 : f32
      %46 = vector.broadcast %cst_25 : f32 to vector<1x128xf32>
      %47 = arith.mulf %45, %46 : vector<1x128xf32>
      %48 = vector.extract_strided_slice %43 {offsets = [1, 0], sizes = [1, 128], strides = [1, 1]} : vector<2x128xf32> to vector<1x128xf32>
      %cst_26 = arith.constant 7.812500e-04 : f32
      %49 = vector.broadcast %cst_26 : f32 to vector<1x128xf32>
      %50 = arith.mulf %48, %49 : vector<1x128xf32>
      %51 = arith.mulf %47, %47 : vector<1x128xf32>
      %52 = arith.subf %50, %51 : vector<1x128xf32>
      %cst_27 = arith.constant 0.000000e+00 : f32
      %53 = vector.broadcast %cst_27 : f32 to vector<1x128xf32>
      %54 = arith.maximumf %52, %53 : vector<1x128xf32>
      %55 = vector.extract_strided_slice %44 {offsets = [0, 0], sizes = [1, 128], strides = [1, 1]} : vector<2x128xf32> to vector<1x128xf32>
      %cst_28 = arith.constant 9.99999974E-6 : f32
      %56 = vector.broadcast %cst_28 : f32 to vector<1x128xf32>
      %57 = arith.addf %54, %56 : vector<1x128xf32>
      %58 = math.rsqrt %57 : vector<1x128xf32>
      %59 = arith.mulf %55, %58 : vector<1x128xf32>
      %60 = vector.extract_strided_slice %44 {offsets = [1, 0], sizes = [1, 128], strides = [1, 1]} : vector<2x128xf32> to vector<1x128xf32>
      %61 = arith.mulf %47, %59 : vector<1x128xf32>
      %62 = arith.subf %60, %61 : vector<1x128xf32>
      %63 = tpu.iota {dimensions = array<i32: 0>} : vector<2x128xi32>
      %c0_i32_29 = arith.constant 0 : i32
      %64 = vector.broadcast %c0_i32_29 : i32 to vector<2x128xi32>
      %65 = arith.cmpi eq, %63, %64 : vector<2x128xi32>
      %66 = vector.shape_cast %59 : vector<1x128xf32> to vector<1x128xf32>
      %67 = vector.broadcast %66 : vector<1x128xf32> to vector<2x128xf32>
      %68 = vector.shape_cast %62 : vector<1x128xf32> to vector<1x128xf32>
      %69 = vector.broadcast %68 : vector<1x128xf32> to vector<2x128xf32>
      %70 = arith.select %65, %67, %69 : vector<2x128xi1>, vector<2x128xf32>
      %c0_30 = arith.constant 0 : index
      %c0_31 = arith.constant 0 : index
      %71 = vector.load %arg8[%c0_30, %c0_31] : memref<2x128xf32, #tpu.memory_space<vmem>>, vector<2x128xf32>
      tpu.vector_store %arg8[%c0_30, %c0_31], %70 {strides = array<i32>} : memref<2x128xf32, #tpu.memory_space<vmem>>, vector<2x128xf32>,
      %cst_32 = arith.constant 0.000000e+00 : f32
      %72 = vector.broadcast %cst_32 : f32 to vector<2x128xf32>
      %c0_33 = arith.constant 0 : index
      %c0_34 = arith.constant 0 : index
      %73 = vector.load %arg7[%c0_33, %c0_34] : memref<2x128xf32, #tpu.memory_space<vmem>>, vector<2x128xf32>
      tpu.vector_store %arg7[%c0_33, %c0_34], %72 {strides = array<i32>} : memref<2x128xf32, #tpu.memory_space<vmem>>, vector<2x128xf32>,
    } else {
    }
    %c0 = arith.constant 0 : index
    %c0_1 = arith.constant 0 : index
    %3 = vector.load %arg1[%c0, %c0_1] : memref<512x16xf32, #tpu.memory_space<vmem>>, vector<512x16xf32>
    %4 = arith.truncf %3 : vector<512x16xf32> to vector<512x16xbf16>
    %c0_2 = arith.constant 0 : index
    %c0_3 = arith.constant 0 : index
    %5 = vector.load %arg2[%c0_2, %c0_3] : memref<16x128xbf16, #tpu.memory_space<vmem>>, vector<16x128xbf16>
    %cst = arith.constant dense<0.000000e+00> : vector<512x128xf32>
    %6 = tpu.matmul %4, %5, %cst {dimension_numbers = #tpu.dot_dimension_numbers<[1], [0], [0], [1], [0, 0, 1, 1], [], []>} : vector<512x16xbf16>, vector<16x128xbf16>, vector<512x128xf32> -> vector<512x128xf32>
    %c0_4 = arith.constant 0 : index
    %c0_5 = arith.constant 0 : index
    %7 = vector.load %arg8[%c0_4, %c0_5] : memref<2x128xf32, #tpu.memory_space<vmem>>, vector<1x128xf32>
    %8 = vector.broadcast %7 : vector<1x128xf32> to vector<512x128xf32>
    %9 = arith.mulf %6, %8 : vector<512x128xf32>
    %c1 = arith.constant 1 : index
    %c0_6 = arith.constant 0 : index
    %10 = vector.load %arg8[%c1, %c0_6] : memref<2x128xf32, #tpu.memory_space<vmem>>, vector<1x128xf32>
    %11 = vector.broadcast %10 : vector<1x128xf32> to vector<512x128xf32>
    %12 = arith.addf %9, %11 : vector<512x128xf32>
    %cst_7 = arith.constant 0.000000e+00 : f32
    %13 = vector.broadcast %cst_7 : f32 to vector<512x128xf32>
    %14 = arith.maximumf %12, %13 : vector<512x128xf32>
    %15 = arith.truncf %14 : vector<512x128xf32> to vector<512x128xbf16>
    %c0_8 = arith.constant 0 : index
    %c0_9 = arith.constant 0 : index
    %16 = vector.load %arg5[%c0_8, %c0_9] : memref<128x128xbf16, #tpu.memory_space<vmem>>, vector<128x128xbf16>
    %cst_10 = arith.constant dense<0.000000e+00> : vector<512x128xf32>
    %17 = tpu.matmul %15, %16, %cst_10 {dimension_numbers = #tpu.dot_dimension_numbers<[1], [0], [0], [1], [0, 0, 1, 1], [], []>} : vector<512x128xbf16>, vector<128x128xbf16>, vector<512x128xf32> -> vector<512x128xf32>
    %18 = arith.truncf %17 : vector<512x128xf32> to vector<512x128xbf16>
    %c0_11 = arith.constant 0 : index
    %c0_12 = arith.constant 0 : index
    %19 = vector.load %arg6[%c0_11, %c0_12] : memref<512x128xbf16, #tpu.memory_space<vmem>>, vector<512x128xbf16>
    tpu.vector_store %arg6[%c0_11, %c0_12], %18 {strides = array<i32>} : memref<512x128xbf16, #tpu.memory_space<vmem>>, vector<512x128xbf16>,
    %c0_13 = arith.constant 0 : index
    %c0_14 = arith.constant 0 : index
    %20 = vector.load %arg7[%c0_13, %c0_14] : memref<2x128xf32, #tpu.memory_space<vmem>>, vector<2x128xf32>
    %21 = tpu.iota {dimensions = array<i32: 0>} : vector<512x128xi32>
    %c512_i32 = arith.constant 512 : i32
    %22 = arith.muli %arg0, %c512_i32 : i32
    %c1280_i32 = arith.constant 1280 : i32
    %23 = arith.subi %c1280_i32, %22 : i32
    %24 = vector.broadcast %23 : i32 to vector<512x128xi32>
    %25 = arith.cmpi slt, %21, %24 : vector<512x128xi32>
    %cst_15 = arith.constant 0.000000e+00 : f32
    %26 = vector.broadcast %cst_15 : f32 to vector<512x128xf32>
    %27 = arith.select %25, %17, %26 : vector<512x128xi1>, vector<512x128xf32>
    %cst_16 = arith.constant dense<0.000000e+00> : vector<128xf32>
    %28 = vector.multi_reduction <add>, %27, %cst_16 [0] : vector<512x128xf32> to vector<128xf32>
    %29 = vector.shape_cast %28 : vector<128xf32> to vector<1x128xf32>
    %30 = arith.mulf %27, %27 : vector<512x128xf32>
    %cst_17 = arith.constant dense<0.000000e+00> : vector<128xf32>
    %31 = vector.multi_reduction <add>, %30, %cst_17 [0] : vector<512x128xf32> to vector<128xf32>
    %32 = vector.shape_cast %31 : vector<128xf32> to vector<1x128xf32>
    %33 = tpu.iota {dimensions = array<i32: 0>} : vector<2x128xi32>
    %c0_i32_18 = arith.constant 0 : i32
    %34 = vector.broadcast %c0_i32_18 : i32 to vector<2x128xi32>
    %35 = arith.cmpi eq, %33, %34 : vector<2x128xi32>
    %36 = vector.shape_cast %29 : vector<1x128xf32> to vector<1x128xf32>
    %37 = vector.broadcast %36 : vector<1x128xf32> to vector<2x128xf32>
    %38 = vector.shape_cast %32 : vector<1x128xf32> to vector<1x128xf32>
    %39 = vector.broadcast %38 : vector<1x128xf32> to vector<2x128xf32>
    %40 = arith.select %35, %37, %39 : vector<2x128xi1>, vector<2x128xf32>
    %41 = arith.addf %20, %40 : vector<2x128xf32>
    %c0_19 = arith.constant 0 : index
    %c0_20 = arith.constant 0 : index
    %42 = vector.load %arg7[%c0_19, %c0_20] : memref<2x128xf32, #tpu.memory_space<vmem>>, vector<2x128xf32>
    tpu.vector_store %arg7[%c0_19, %c0_20], %41 {strides = array<i32>} : memref<2x128xf32, #tpu.memory_space<vmem>>, vector<2x128xf32>,
    return
  }
  func.func @transform_0(%arg0: i32) -> (i32, i32) {
    %c0_i32 = arith.constant 0 : i32
    %c0_i32_0 = arith.constant 0 : i32
    return %arg0, %c0_i32 : i32, i32
  }
  func.func @transform_1(%arg0: i32) -> (i32, i32) {
    %c0_i32 = arith.constant 0 : i32
    %c0_i32_0 = arith.constant 0 : i32
    %c0_i32_1 = arith.constant 0 : i32
    return %c0_i32, %c0_i32_0 : i32, i32
  }
  func.func @transform_2(%arg0: i32) -> (i32, i32) {
    %c0_i32 = arith.constant 0 : i32
    %c0_i32_0 = arith.constant 0 : i32
    %c0_i32_1 = arith.constant 0 : i32
    return %c0_i32, %c0_i32_0 : i32, i32
  }
  func.func @transform_3(%arg0: i32) -> (i32, i32) {
    %c0_i32 = arith.constant 0 : i32
    %c0_i32_0 = arith.constant 0 : i32
    %c0_i32_1 = arith.constant 0 : i32
    return %c0_i32, %c0_i32_0 : i32, i32
  }
  func.func @transform_4(%arg0: i32) -> (i32, i32) {
    %c0_i32 = arith.constant 0 : i32
    %c0_i32_0 = arith.constant 0 : i32
    %c0_i32_1 = arith.constant 0 : i32
    return %c0_i32, %c0_i32_0 : i32, i32
  }
  func.func @transform_5(%arg0: i32) -> (i32, i32) {
    %c0_i32 = arith.constant 0 : i32
    %c0_i32_0 = arith.constant 0 : i32
    return %arg0, %c0_i32 : i32, i32
  }
  func.func @transform_6(%arg0: i32) -> (i32, i32) {
    %c0_i32 = arith.constant 0 : i32
    %c0_i32_0 = arith.constant 0 : i32
    %c0_i32_1 = arith.constant 0 : i32
    return %c0_i32, %c0_i32_0 : i32, i32
  }
}

module attributes {stable_mosaic.version = 11 : i64} {
  func.func @_bn_relu_fc3_kernel(%arg0: i32, %arg1: memref<512x128xbf16, #tpu.memory_space<vmem>>, %arg2: memref<2x128xf32, #tpu.memory_space<vmem>>, %arg3: memref<2x128xf32, #tpu.memory_space<vmem>>, %arg4: memref<128x128xbf16, #tpu.memory_space<vmem>>, %arg5: memref<1x128xf32, #tpu.memory_space<vmem>>, %arg6: memref<512x128xf32, #tpu.memory_space<vmem>>) attributes {dimension_semantics = [#tpu.dimension_semantics<parallel>], iteration_bounds = array<i64: 3>, scalar_prefetch = 0 : i64, scratch_operands = 0 : i64, tpu.core_type = #tpu.core_type<tc>, window_params = [{transform_indices = @transform_0, window_bounds = array<i64: 512, 128>}, {pipeline_mode = #tpu.pipeline_mode<synchronous>, transform_indices = @transform_1, window_bounds = array<i64: 2, 128>}, {pipeline_mode = #tpu.pipeline_mode<synchronous>, transform_indices = @transform_2, window_bounds = array<i64: 2, 128>}, {pipeline_mode = #tpu.pipeline_mode<synchronous>, transform_indices = @transform_3, window_bounds = array<i64: 128, 128>}, {pipeline_mode = #tpu.pipeline_mode<synchronous>, transform_indices = @transform_4, window_bounds = array<i64: 1, 128>}, {transform_indices = @transform_5, window_bounds = array<i64: 512, 128>}]} {
    %c0 = arith.constant 0 : index
    %c0_0 = arith.constant 0 : index
    %0 = vector.load %arg2[%c0, %c0_0] : memref<2x128xf32, #tpu.memory_space<vmem>>, vector<2x128xf32>
    %c0_1 = arith.constant 0 : index
    %c0_2 = arith.constant 0 : index
    %1 = vector.load %arg3[%c0_1, %c0_2] : memref<2x128xf32, #tpu.memory_space<vmem>>, vector<2x128xf32>
    %2 = vector.extract_strided_slice %0 {offsets = [0, 0], sizes = [1, 128], strides = [1, 1]} : vector<2x128xf32> to vector<1x128xf32>
    %cst = arith.constant 7.812500e-04 : f32
    %3 = vector.broadcast %cst : f32 to vector<1x128xf32>
    %4 = arith.mulf %2, %3 : vector<1x128xf32>
    %5 = vector.extract_strided_slice %0 {offsets = [1, 0], sizes = [1, 128], strides = [1, 1]} : vector<2x128xf32> to vector<1x128xf32>
    %cst_3 = arith.constant 7.812500e-04 : f32
    %6 = vector.broadcast %cst_3 : f32 to vector<1x128xf32>
    %7 = arith.mulf %5, %6 : vector<1x128xf32>
    %8 = arith.mulf %4, %4 : vector<1x128xf32>
    %9 = arith.subf %7, %8 : vector<1x128xf32>
    %cst_4 = arith.constant 0.000000e+00 : f32
    %10 = vector.broadcast %cst_4 : f32 to vector<1x128xf32>
    %11 = arith.maximumf %9, %10 : vector<1x128xf32>
    %12 = vector.extract_strided_slice %1 {offsets = [0, 0], sizes = [1, 128], strides = [1, 1]} : vector<2x128xf32> to vector<1x128xf32>
    %cst_5 = arith.constant 9.99999974E-6 : f32
    %13 = vector.broadcast %cst_5 : f32 to vector<1x128xf32>
    %14 = arith.addf %11, %13 : vector<1x128xf32>
    %15 = math.rsqrt %14 : vector<1x128xf32>
    %16 = arith.mulf %12, %15 : vector<1x128xf32>
    %17 = vector.extract_strided_slice %1 {offsets = [1, 0], sizes = [1, 128], strides = [1, 1]} : vector<2x128xf32> to vector<1x128xf32>
    %18 = arith.mulf %4, %16 : vector<1x128xf32>
    %19 = arith.subf %17, %18 : vector<1x128xf32>
    %c0_6 = arith.constant 0 : index
    %c0_7 = arith.constant 0 : index
    %20 = vector.load %arg1[%c0_6, %c0_7] : memref<512x128xbf16, #tpu.memory_space<vmem>>, vector<512x128xbf16>
    %21 = arith.extf %20 : vector<512x128xbf16> to vector<512x128xf32>
    %22 = vector.broadcast %16 : vector<1x128xf32> to vector<512x128xf32>
    %23 = arith.mulf %21, %22 : vector<512x128xf32>
    %24 = vector.broadcast %19 : vector<1x128xf32> to vector<512x128xf32>
    %25 = arith.addf %23, %24 : vector<512x128xf32>
    %cst_8 = arith.constant 0.000000e+00 : f32
    %26 = vector.broadcast %cst_8 : f32 to vector<512x128xf32>
    %27 = arith.maximumf %25, %26 : vector<512x128xf32>
    %28 = arith.truncf %27 : vector<512x128xf32> to vector<512x128xbf16>
    %c0_9 = arith.constant 0 : index
    %c0_10 = arith.constant 0 : index
    %29 = vector.load %arg4[%c0_9, %c0_10] : memref<128x128xbf16, #tpu.memory_space<vmem>>, vector<128x128xbf16>
    %cst_11 = arith.constant dense<0.000000e+00> : vector<512x128xf32>
    %30 = tpu.matmul %28, %29, %cst_11 {dimension_numbers = #tpu.dot_dimension_numbers<[1], [0], [0], [1], [0, 0, 1, 1], [], []>} : vector<512x128xbf16>, vector<128x128xbf16>, vector<512x128xf32> -> vector<512x128xf32>
    %c0_12 = arith.constant 0 : index
    %c0_13 = arith.constant 0 : index
    %31 = vector.load %arg5[%c0_12, %c0_13] : memref<1x128xf32, #tpu.memory_space<vmem>>, vector<1x128xf32>
    %32 = vector.broadcast %31 : vector<1x128xf32> to vector<512x128xf32>
    %33 = arith.addf %30, %32 : vector<512x128xf32>
    %c0_14 = arith.constant 0 : index
    %c0_15 = arith.constant 0 : index
    %34 = vector.load %arg6[%c0_14, %c0_15] : memref<512x128xf32, #tpu.memory_space<vmem>>, vector<512x128xf32>
    tpu.vector_store %arg6[%c0_14, %c0_15], %33 {strides = array<i32>} : memref<512x128xf32, #tpu.memory_space<vmem>>, vector<512x128xf32>,
    return
  }
  func.func @transform_0(%arg0: i32) -> (i32, i32) {
    %c0_i32 = arith.constant 0 : i32
    %c0_i32_0 = arith.constant 0 : i32
    return %arg0, %c0_i32 : i32, i32
  }
  func.func @transform_1(%arg0: i32) -> (i32, i32) {
    %c0_i32 = arith.constant 0 : i32
    %c0_i32_0 = arith.constant 0 : i32
    %c0_i32_1 = arith.constant 0 : i32
    return %c0_i32, %c0_i32_0 : i32, i32
  }
  func.func @transform_2(%arg0: i32) -> (i32, i32) {
    %c0_i32 = arith.constant 0 : i32
    %c0_i32_0 = arith.constant 0 : i32
    %c0_i32_1 = arith.constant 0 : i32
    return %c0_i32, %c0_i32_0 : i32, i32
  }
  func.func @transform_3(%arg0: i32) -> (i32, i32) {
    %c0_i32 = arith.constant 0 : i32
    %c0_i32_0 = arith.constant 0 : i32
    %c0_i32_1 = arith.constant 0 : i32
    return %c0_i32, %c0_i32_0 : i32, i32
  }
  func.func @transform_4(%arg0: i32) -> (i32, i32) {
    %c0_i32 = arith.constant 0 : i32
    %c0_i32_0 = arith.constant 0 : i32
    %c0_i32_1 = arith.constant 0 : i32
    return %c0_i32, %c0_i32_0 : i32, i32
  }
  func.func @transform_5(%arg0: i32) -> (i32, i32) {
    %c0_i32 = arith.constant 0 : i32
    %c0_i32_0 = arith.constant 0 : i32
    return %arg0, %c0_i32 : i32, i32
  }
}

</mosaic_0001>

<bundles_post_ra>
// kernel: pc_embedding.3
= control target key start
LH: loop header
LB: loop body
LE: loop exit
PB: predicated region body
PF: predicated region fallthrough
CT: control target
= control target key end

     0   :  { %s1256_s9 = smov 0   ;;  %s1710_s0 = inlined_call_operand.vmem [shape: f32[1280,16], index: 0, kind: input, shape index: {}]   ;;  %s1711_s1 = inlined_call_operand.vmem [shape: bf16[16,128], index: 1, kind: input, shape index: {}]   ;;  %s1712_s2 = inlined_call_operand.vmem [shape: f32[2,128], index: 2, kind: output, shape index: {}]  }
   0x1 LB: > { %s1262_s10 = sadd.s32 4294967295, %s1238_s9   ;;  %p1081_p0 = scmp.ge.s32.totalorder %s1238_s9, 1  ;;  %s1238_s9 = sphi %s1256_s9, %s12_s9  }
   0x2   : > { %p116_p1 = scmp.lt.s32.totalorder %s1238_s9, 4 }
   0x4   : > { %p117_p2 = pnand %p1081_p0, %p116_p1 }
   0x6   : > { %120 = sbr.rel (%p117_p2) target bundleno = 460 (0x1cc), region = 28 }
   0xd   : > { %v1231_v0 = vld [vmem:[%s1711_s1] sm:$0xff]   ;;  %s1082_s13 = sshll.u32 %s1262_s10, 6  ;;  %vm256_vm0 = vcmask 130048   ;;  %p1117_p4 = scmp.ne.s32.totalorder %s1262_s10, 0 }
   0xe   : > { %p142_p3 = scmp.lt.s32.totalorder %s1082_s13, 159  ;;  %1154 = vmatprep.subr.bf16.mxu0 %v1231_v0  ;;  %1220 = vmatprep.subr.bf16.mxu1 %v1231_v0 }
   0xf   : > { %1155 = vmatpush3.bf16.msra.mxu0 %v1231_v0  ;;  %1221 = vmatpush3.bf16.msra.mxu1 %v1231_v0 }
  0x10   : > { %s1748_s13 = smov (!%p142_p3, %s1082_s13), 159 }
  0x11   : > { %s1083_s14 = sshll.u32 %s1748_s13, 3 }
  0x12   : > { %s1273_s17 = scalar_lea.vmem %s1710_s0, %s1083_s14 }
  0x13   : > { %v152_v1 = vld [vmem:[%s1273_s17] sm:$0xff]  ;;  %v153_v2 = vld [vmem:[%s1273_s17 + $0x8] sm:$0xff]  ;;  %v154_v6 = vld [vmem:[%s1273_s17 + $0x10] sm:$0xff] }
  0x14   : > { %v184_v3 = vld [vmem:[%s1273_s17 + $0x100] sm:$0xff]  ;;  %v216_v4 = vpack.c.bf16 %v153_v2, %v152_v1  ;;  %v185_v5 = vld [vmem:[%s1273_s17 + $0x108] sm:$0xff]  ;;  %v155_v7 = vld [vmem:[%s1273_s17 + $0x18] sm:$0xff] }
  0x15   : > { %v232_v8 = vpack.c.bf16 %v185_v5, %v184_v3  ;;  %v217_v9 = vpack.c.bf16 %v155_v7, %v154_v6  ;;  %v186_v10 = vld [vmem:[%s1273_s17 + $0x110] sm:$0xff]  ;;  %v187_v11 = vld [vmem:[%s1273_s17 + $0x118] sm:$0xff]  ;;  %v156_v12 = vld [vmem:[%s1273_s17 + $0x20] sm:$0xff] }
  0x16   : > { %1156 = vmatprep.mubr.msk.bf16.mxu0 %vm256_vm0, %v216_v4  ;;  %v233_v13 = vpack.c.bf16 %v187_v11, %v186_v10  ;;  %v157_v14 = vld [vmem:[%s1273_s17 + $0x28] sm:$0xff]  ;;  %v188_v15 = vld [vmem:[%s1273_s17 + $0x120] sm:$0xff]  ;;  %v158_v19 = vld [vmem:[%s1273_s17 + $0x30] sm:$0xff] }
  0x17   : > { %v189_v16 = vld [vmem:[%s1273_s17 + $0x128] sm:$0xff]  ;;  %1188 = vmatprep.mubr.msk.bf16.mxu1 %vm256_vm0, %v232_v8  ;;  %1157 = vmatmul.mubr.msk.bf16.vlgmr.msra.gmra.mrb[0].mxu0 %vm256_vm0, %v217_v9  ;;  %v218_v17 = vpack.c.bf16 %v157_v14, %v156_v12  ;;  %v159_v20 = vld [vmem:[%s1273_s17 + $0x38] sm:$0xff]  ;;  %v190_v21 = vld [vmem:[%s1273_s17 + $0x130] sm:$0xff] }
  0x18   : > { %v234_v18 = vpack.c.bf16 %v189_v16, %v188_v15  ;;  %1189 = vmatmul.mubr.msk.bf16.vlgmr.msra.gmra.mrb[0].mxu1 %vm256_vm0, %v233_v13  ;;  %v191_v22 = vld [vmem:[%s1273_s17 + $0x138] sm:$0xff]  ;;  %v160_v23 = vld [vmem:[%s1273_s17 + $0x40] sm:$0xff]  ;;  %v161_v24 = vld [vmem:[%s1273_s17 + $0x48] sm:$0xff]  ;;  %v219_v27 = vpack.c.bf16 %v159_v20, %v158_v19 }
  0x19   : > { %1160 = vmatprep.mubr.msk.bf16.mxu0 %vm256_vm0, %v218_v17  ;;  %v192_v25 = vld [vmem:[%s1273_s17 + $0x140] sm:$0xff]  ;;  %v193_v26 = vld [vmem:[%s1273_s17 + $0x148] sm:$0xff]  ;;  %v235_v28 = vpack.c.bf16 %v191_v22, %v190_v21  ;;  %v220_v29 = vpack.c.bf16 %v161_v24, %v160_v23  ;;  %v162_v31 = vld [vmem:[%s1273_s17 + $0x50] sm:$0xff] }
  0x1a   : > { %1192 = vmatprep.mubr.msk.bf16.mxu1 %vm256_vm0, %v234_v18  ;;  %v236_v30 = vpack.c.bf16 %v193_v26, %v192_v25  ;;  %v163_v32 = vld [vmem:[%s1273_s17 + $0x58] sm:$0xff]  ;;  %v194_v33 = vld [vmem:[%s1273_s17 + $0x150] sm:$0xff]  ;;  %v164_v35 = vld [vmem:[%s1273_s17 + $0x60] sm:$0xff] }
  0x1b   : > { %v195_v34 = vld [vmem:[%s1273_s17 + $0x158] sm:$0xff]  ;;  %v165_v36 = vld [vmem:[%s1273_s17 + $0x68] sm:$0xff]  ;;  %v196_v37 = vld [vmem:[%s1273_s17 + $0x160] sm:$0xff]  ;;  %v221_v39 = vpack.c.bf16 %v163_v32, %v162_v31 }
  0x1c   : > { %v197_v38 = vld [vmem:[%s1273_s17 + $0x168] sm:$0xff]  ;;  %v237_v40 = vpack.c.bf16 %v195_v34, %v194_v33  ;;  %v222_v41 = vpack.c.bf16 %v165_v36, %v164_v35  ;;  %v166_v43 = vld [vmem:[%s1273_s17 + $0x70] sm:$0xff]  ;;  %v167_v44 = vld [vmem:[%s1273_s17 + $0x78] sm:$0xff] }
  0x1d   : > { %v238_v42 = vpack.c.bf16 %v197_v38, %v196_v37  ;;  %v198_v45 = vld [vmem:[%s1273_s17 + $0x170] sm:$0xff]  ;;  %v199_v46 = vld [vmem:[%s1273_s17 + $0x178] sm:$0xff]  ;;  %v168_v47 = vld [vmem:[%s1273_s17 + $0x80] sm:$0xff]  ;;  %v223_v51 = vpack.c.bf16 %v167_v44, %v166_v43 }
  0x1e   : > { %v169_v48 = vld [vmem:[%s1273_s17 + $0x88] sm:$0xff]  ;;  %v200_v49 = vld [vmem:[%s1273_s17 + $0x180] sm:$0xff]  ;;  %v239_v52 = vpack.c.bf16 %v199_v46, %v198_v45  ;;  %v170_v55 = vld [vmem:[%s1273_s17 + $0x90] sm:$0xff] }
  0x1f   : > { %1161 = vmatmul.mubr.msk.bf16.gmra.mrb[4].mxu0 %vm256_vm0, %v219_v27  ;;  %v201_v50 = vld [vmem:[%s1273_s17 + $0x188] sm:$0xff]  ;;  %v224_v53 = vpack.c.bf16 %v169_v48, %v168_v47  ;;  %v171_v56 = vld [vmem:[%s1273_s17 + $0x98] sm:$0xff]  ;;  %v202_v57 = vld [vmem:[%s1273_s17 + $0x190] sm:$0xff] }
  0x20   : > { %1193 = vmatmul.mubr.msk.bf16.gmra.mrb[4].mxu1 %vm256_vm0, %v235_v28  ;;  %1164 = vmatprep.mubr.msk.bf16.mxu0 %vm256_vm0, %v220_v29  ;;  %v240_v54 = vpack.c.bf16 %v201_v50, %v200_v49  ;;  %v203_v58 = vld [vmem:[%s1273_s17 + $0x198] sm:$0xff]  ;;  %v172_v59 = vld [vmem:[%s1273_s17 + $0xa0] sm:$0xff]  ;;  %v173_v60 = vld [vmem:[%s1273_s17 + $0xa8] sm:$0xff]  ;;  %v225_v63 = vpack.c.bf16 %v171_v56, %v170_v55 }
  0x21   : > { %1196 = vmatprep.mubr.msk.bf16.mxu1 %vm256_vm0, %v236_v30  ;;  %v204_v61 = vld [vmem:[%s1273_s17 + $0x1a0] sm:$0xff]  ;;  %v205_v62 = vld [vmem:[%s1273_s17 + $0x1a8] sm:$0xff]  ;;  %v241_v0 = vpack.c.bf16 %v203_v58, %v202_v57  ;;  %v226_v1 = vpack.c.bf16 %v173_v60, %v172_v59  ;;  %v174_v3 = vld [vmem:[%s1273_s17 + $0xb0] sm:$0xff] }
  0x22   : > { %v242_v2 = vpack.c.bf16 %v205_v62, %v204_v61  ;;  %v175_v4 = vld [vmem:[%s1273_s17 + $0xb8] sm:$0xff]  ;;  %v206_v5 = vld [vmem:[%s1273_s17 + $0x1b0] sm:$0xff]  ;;  %v176_v7 = vld [vmem:[%s1273_s17 + $0xc0] sm:$0xff] }
  0x23   : > { %v207_v6 = vld [vmem:[%s1273_s17 + $0x1b8] sm:$0xff]  ;;  %v177_v8 = vld [vmem:[%s1273_s17 + $0xc8] sm:$0xff]  ;;  %v208_v9 = vld [vmem:[%s1273_s17 + $0x1c0] sm:$0xff]  ;;  %v227_v11 = vpack.c.bf16 %v175_v4, %v174_v3 }
  0x24   : > { %v209_v10 = vld [vmem:[%s1273_s17 + $0x1c8] sm:$0xff]  ;;  %v243_v12 = vpack.c.bf16 %v207_v6, %v206_v5  ;;  %v228_v13 = vpack.c.bf16 %v177_v8, %v176_v7  ;;  %v178_v15 = vld [vmem:[%s1273_s17 + $0xd0] sm:$0xff]  ;;  %v179_v16 = vld [vmem:[%s1273_s17 + $0xd8] sm:$0xff] }
  0x25   : > { %v244_v14 = vpack.c.bf16 %v209_v10, %v208_v9  ;;  %v210_v17 = vld [vmem:[%s1273_s17 + $0x1d0] sm:$0xff]  ;;  %v211_v18 = vld [vmem:[%s1273_s17 + $0x1d8] sm:$0xff]  ;;  %v180_v19 = vld [vmem:[%s1273_s17 + $0xe0] sm:$0xff]  ;;  %v229_v23 = vpack.c.bf16 %v179_v16, %v178_v15 }
  0x26   : > { %v181_v20 = vld [vmem:[%s1273_s17 + $0xe8] sm:$0xff]  ;;  %v212_v21 = vld [vmem:[%s1273_s17 + $0x1e0] sm:$0xff]  ;;  %v245_v24 = vpack.c.bf16 %v211_v18, %v210_v17  ;;  %v182_v27 = vld [vmem:[%s1273_s17 + $0xf0] sm:$0xff] }
  0x27   : > { %1165 = vmatmul.mubr.msk.bf16.gmra.mrb[8].mxu0 %vm256_vm0, %v221_v39  ;;  %v213_v22 = vld [vmem:[%s1273_s17 + $0x1e8] sm:$0xff]  ;;  %v230_v25 = vpack.c.bf16 %v181_v20, %v180_v19  ;;  %v183_v28 = vld [vmem:[%s1273_s17 + $0xf8] sm:$0xff]  ;;  %v214_v29 = vld [vmem:[%s1273_s17 + $0x1f0] sm:$0xff] }
  0x28   : > { %1197 = vmatmul.mubr.msk.bf16.gmra.mrb[8].mxu1 %vm256_vm0, %v237_v40  ;;  %1168 = vmatprep.mubr.msk.bf16.mxu0 %vm256_vm0, %v222_v41  ;;  %v246_v26 = vpack.c.bf16 %v213_v22, %v212_v21  ;;  %v215_v30 = vld [vmem:[%s1273_s17 + $0x1f8] sm:$0xff]  ;;  %v231_v31 = vpack.c.bf16 %v183_v28, %v182_v27 }
  0x29   : > { %1200 = vmatprep.mubr.msk.bf16.mxu1 %vm256_vm0, %v238_v42  ;;  %v247_v32 = vpack.c.bf16 %v215_v30, %v214_v29 }
  0x2f   : > { %1169 = vmatmul.mubr.msk.bf16.gmra.mrb[12].mxu0 %vm256_vm0, %v223_v51 }
  0x30   : > { %1201 = vmatmul.mubr.msk.bf16.gmra.mrb[12].mxu1 %vm256_vm0, %v239_v52  ;;  %1172 = vmatprep.mubr.msk.bf16.mxu0 %vm256_vm0, %v224_v53 }
  0x31   : > { %1204 = vmatprep.mubr.msk.bf16.mxu1 %vm256_vm0, %v240_v54 }
  0x37   : > { %1173 = vmatmul.mubr.msk.bf16.gmra.mrb[16].mxu0 %vm256_vm0, %v225_v63 }
  0x38   : > { %1205 = vmatmul.mubr.msk.bf16.gmra.mrb[16].mxu1 %vm256_vm0, %v241_v0  ;;  %1176 = vmatprep.mubr.msk.bf16.mxu0 %vm256_vm0, %v226_v1 }
  0x39   : > { %1208 = vmatprep.mubr.msk.bf16.mxu1 %vm256_vm0, %v242_v2 }
  0x3f   : > { %1177 = vmatmul.mubr.msk.bf16.gmra.mrb[20].mxu0 %vm256_vm0, %v227_v11 }
  0x40   : > { %1209 = vmatmul.mubr.msk.bf16.gmra.mrb[20].mxu1 %vm256_vm0, %v243_v12  ;;  %1180 = vmatprep.mubr.msk.bf16.mxu0 %vm256_vm0, %v228_v13 }
  0x41   : > { %1212 = vmatprep.mubr.msk.bf16.mxu1 %vm256_vm0, %v244_v14 }
  0x47   : > { %1181 = vmatmul.mubr.msk.bf16.gmra.mrb[24].mxu0 %vm256_vm0, %v229_v23 }
  0x48   : > { %1213 = vmatmul.mubr.msk.bf16.gmra.mrb[24].mxu1 %vm256_vm0, %v245_v24  ;;  %1184 = vmatprep.mubr.msk.bf16.mxu0 %vm256_vm0, %v230_v25 }
  0x49   : > { %1216 = vmatprep.mubr.msk.bf16.mxu1 %vm256_vm0, %v246_v26 }
  0x4f   : > { %1185 = vmatmul.mubr.msk.bf16.gmra.mrb[28].mxu0 %vm256_vm0, %v231_v31 }
  0x50   : > { %1217 = vmatmul.mubr.msk.bf16.gmra.mrb[28].mxu1 %vm256_vm0, %v247_v32 }
  0xea   : > { %v1371_v33 = vpop.f32.mrb[0].mxu0 }
  0xeb   : > { %v1373_v34 = vpop.f32.mrb[0].mxu1  ;;  %v1375_v35 = vpop.f32.mrb[1].mxu0 }
  0xec   : > { %v1377_v36 = vpop.f32.mrb[1].mxu1  ;;  %v1379_v37 = vpop.f32.mrb[2].mxu0 }
  0xed   : > { %v1381_v38 = vpop.f32.mrb[2].mxu1  ;;  %v1383_v39 = vpop.f32.mrb[3].mxu0 }
  0xee   : > { %v1385_v40 = vpop.f32.mrb[3].mxu1 }
  0xf2   : > { %v1387_v41 = vpop.f32.mrb[4].mxu0 }
  0xf3   : > { %v1389_v42 = vpop.f32.mrb[4].mxu1  ;;  %v1391_v43 = vpop.f32.mrb[5].mxu0 }
  0xf4   : > { %v1393_v44 = vpop.f32.mrb[5].mxu1  ;;  %v1395_v45 = vpop.f32.mrb[6].mxu0 }
  0xf5   : > { %v1397_v46 = vpop.f32.mrb[6].mxu1  ;;  %v1399_v47 = vpop.f32.mrb[7].mxu0 }
  0xf6   : > { %v1401_v48 = vpop.f32.mrb[7].mxu1 }
  0xfa   : > { %v1403_v49 = vpop.f32.mrb[8].mxu0 }
  0xfb   : > { %v1405_v50 = vpop.f32.mrb[8].mxu1  ;;  %v1407_v51 = vpop.f32.mrb[9].mxu0 }
  0xfc   : > { %v1409_v52 = vpop.f32.mrb[9].mxu1  ;;  %v1411_v53 = vpop.f32.mrb[10].mxu0 }
  0xfd   : > { %v1413_v54 = vpop.f32.mrb[10].mxu1  ;;  %v1415_v55 = vpop.f32.mrb[11].mxu0 }
  0xfe   : > { %v1417_v56 = vpop.f32.mrb[11].mxu1 }
 0x102   : > { %v1419_v57 = vpop.f32.mrb[12].mxu0 }
 0x103   : > { %v1421_v58 = vpop.f32.mrb[12].mxu1  ;;  %v1423_v59 = vpop.f32.mrb[13].mxu0 }
 0x104   : > { %v1425_v60 = vpop.f32.mrb[13].mxu1  ;;  %v1427_v61 = vpop.f32.mrb[14].mxu0 }
 0x105   : > { %v1429_v62 = vpop.f32.mrb[14].mxu1  ;;  %v1431_v63 = vpop.f32.mrb[15].mxu0 }
 0x106   : > { %1713 = vst [vmem:[#allocation2_spill] sm:$0xff] %v1429_v62  ;;  %v1433_v0 = vpop.f32.mrb[15].mxu1 }
 0x10a   : > { %v1435_v1 = vpop.f32.mrb[16].mxu0 }
 0x10b   : > { %v1437_v2 = vpop.f32.mrb[16].mxu1  ;;  %v1439_v3 = vpop.f32.mrb[17].mxu0 }
 0x10c   : > { %1714 = vst [vmem:[#allocation3_spill] sm:$0xff] %v1437_v2  ;;  %v1441_v4 = vpop.f32.mrb[17].mxu1  ;;  %v1443_v5 = vpop.f32.mrb[18].mxu0 }
 0x10d   : > { %1715 = vst [vmem:[#allocation4_spill] sm:$0xff] %v1441_v4  ;;  %v1445_v6 = vpop.f32.mrb[18].mxu1  ;;  %v1447_v7 = vpop.f32.mrb[19].mxu0 }
 0x10e   : > { %1716 = vst [vmem:[#allocation5_spill] sm:$0xff] %v1445_v6  ;;  %v1449_v8 = vpop.f32.mrb[19].mxu1 }
 0x10f   : > { %1717 = vst [vmem:[#allocation6_spill] sm:$0xff] %v1449_v8 }
 0x112   : > { %v1451_v9 = vpop.f32.mrb[20].mxu0 }
 0x113   : > { %v1453_v10 = vpop.f32.mrb[20].mxu1  ;;  %v1455_v11 = vpop.f32.mrb[21].mxu0 }
 0x114   : > { %1718 = vst [vmem:[#allocation7_spill] sm:$0xff] %v1453_v10  ;;  %v1457_v12 = vpop.f32.mrb[21].mxu1  ;;  %v1459_v13 = vpop.f32.mrb[22].mxu0 }
 0x115   : > { %1719 = vst [vmem:[#allocation8_spill] sm:$0xff] %v1457_v12  ;;  %v1461_v14 = vpop.f32.mrb[22].mxu1  ;;  %v1463_v15 = vpop.f32.mrb[23].mxu0 }
 0x116   : > { %1720 = vst [vmem:[#allocation9_spill] sm:$0xff] %v1461_v14  ;;  %v1465_v16 = vpop.f32.mrb[23].mxu1 }
 0x117   : > { %1721 = vst [vmem:[#allocation10_spill] sm:$0xff] %v1465_v16 }
 0x11a   : > { %v1467_v17 = vpop.f32.mrb[24].mxu0 }
 0x11b   : > { %v1469_v18 = vpop.f32.mrb[24].mxu1  ;;  %v1471_v19 = vpop.f32.mrb[25].mxu0 }
 0x11c   : > { %1722 = vst [vmem:[#allocation11_spill] sm:$0xff] %v1469_v18  ;;  %v1473_v20 = vpop.f32.mrb[25].mxu1  ;;  %v1475_v21 = vpop.f32.mrb[26].mxu0 }
 0x11d   : > { %1723 = vst [vmem:[#allocation12_spill] sm:$0xff] %v1473_v20  ;;  %v1477_v22 = vpop.f32.mrb[26].mxu1  ;;  %v1479_v23 = vpop.f32.mrb[27].mxu0 }
 0x11e   : > { %1724 = vst [vmem:[#allocation13_spill] sm:$0xff] %v1477_v22  ;;  %v1481_v24 = vpop.f32.mrb[27].mxu1  ;;  %v1240_v22 = vmov (!%p1117_p4), 0.0  }
 0x11f   : > { %1725 = vst [vmem:[#allocation14_spill] sm:$0xff] %v1481_v24  ;;  %646 = vst [vmem:[%s1712_s2] sm:$0x3] (!%p1117_p4), %v1240_v22 }
 0x121   : > { %645 = sbr.rel (%p1117_p4) target bundleno = 296 (0x128), region = 32 }
 0x122   : > { %v1483_v25 = vpop.f32.mrb[28].mxu0 }
 0x123   : > { %v1485_v26 = vpop.f32.mrb[28].mxu1  ;;  %v1487_v27 = vpop.f32.mrb[29].mxu0 }
 0x124   : > { %1726 = vst [vmem:[#allocation15_spill] sm:$0xff] %v1485_v26  ;;  %v1489_v28 = vpop.f32.mrb[29].mxu1  ;;  %v1491_v29 = vpop.f32.mrb[30].mxu0 }
 0x125   : > { %1727 = vst [vmem:[#allocation16_spill] sm:$0xff] %v1489_v28  ;;  %v1493_v30 = vpop.f32.mrb[30].mxu1  ;;  %v1495_v31 = vpop.f32.mrb[31].mxu0 }
 0x126   : > { %1728 = vst [vmem:[#allocation17_spill] sm:$0xff] %v1493_v30  ;;  %v1497_v32 = vpop.f32.mrb[31].mxu1 }
 0x127   : > { %1729 = vst [vmem:[#allocation18_spill] sm:$0xff] %v1497_v32 }
 0x128 PF: > { %v648_v26 = vlaneseq  ;;  %s1118_s20 = sshll.u32 %s1262_s10, 9 }
 0x129   : > { %s714_s21 = ssub.s32 1280, %s1118_s20 }
 0x12a   : > { %v1504_v28 = vshrl.u32 %v648_v26, 7  ;;  %v1507_v18 = vstv %s714_s21 }
 0x12c   : > { %v650_v30 = vadd.s32 8, %v1504_v28  ;;  %v651_v32 = vadd.s32 16, %v1504_v28  ;;  %v652_v24 = vadd.s32 24, %v1504_v28  ;;  %vm716_vm1 = vcmp.lt.s32.totalorder %v1504_v28, %v1507_v18 }
 0x12d   : > { %v653_v22 = vadd.s32 32, %v1504_v28  ;;  %v780_v26 = vsel %vm716_vm1, %v1375_v35, 0.0  ;;  %v654_v14 = vadd.s32 40, %v1504_v28  ;;  %v655_v12 = vadd.s32 48, %v1504_v28 }
 0x12e   : > { %vm717_vm2 = vcmp.lt.s32.totalorder %v650_v30, %v1507_v18  ;;  %vm718_vm3 = vcmp.lt.s32.totalorder %v651_v32, %v1507_v18  ;;  %vm719_vm4 = vcmp.lt.s32.totalorder %v652_v24, %v1507_v18  ;;  %v656_v32 = vadd.s32 56, %v1504_v28 }
 0x12f   : > { %v781_v20 = vsel %vm717_vm2, %v1383_v39, 0.0  ;;  %v782_v16 = vsel %vm718_vm3, %v1371_v33, 0.0  ;;  %vm720_vm5 = vcmp.lt.s32.totalorder %v653_v22, %v1507_v18  ;;  %v783_v6 = vsel %vm719_vm4, %v1379_v37, 0.0 }
 0x130   : > { %v844_v10 = vadd.f32 %v781_v20, %v780_v26  ;;  %vm721_vm6 = vcmp.lt.s32.totalorder %v654_v14, %v1507_v18  ;;  %v784_v39 = vsel %vm720_vm5, %v1391_v43, 0.0  ;;  %v657_v2 = vadd.s32 64, %v1504_v28 }
 0x131   : > { %vm722_vm7 = vcmp.lt.s32.totalorder %v655_v12, %v1507_v18  ;;  %v785_v33 = vsel %vm721_vm6, %v1399_v47, 0.0  ;;  %v658_v8 = vadd.s32 72, %v1504_v28  ;;  %vm723_vm8 = vcmp.lt.s32.totalorder %v656_v32, %v1507_v18 }
 0x132   : > { %v845_v30 = vadd.f32 %v844_v10, %v782_v16  ;;  %v786_v37 = vsel %vm722_vm7, %v1387_v41, 0.0  ;;  %v659_v22 = vadd.s32 80, %v1504_v28  ;;  %vm724_vm9 = vcmp.lt.s32.totalorder %v657_v2, %v1507_v18 }
 0x133   : > { %v787_v43 = vsel %vm723_vm8, %v1395_v45, 0.0  ;;  %vm725_vm10 = vcmp.lt.s32.totalorder %v658_v8, %v1507_v18  ;;  %v788_v47 = vsel %vm724_vm9, %v1407_v51, 0.0  ;;  %v914_v4 = vmul.f32 %v781_v20, %v781_v20 }
 0x134   : > { %v846_v35 = vadd.f32 %v845_v30, %v783_v6  ;;  %v660_v30 = vadd.s32 88, %v1504_v28  ;;  %vm726_vm11 = vcmp.lt.s32.totalorder %v659_v22, %v1507_v18  ;;  %v789_v41 = vsel %vm725_vm10, %v1415_v55, 0.0 }
 0x135   : > { %v662_v2 = vadd.s32 104, %v1504_v28  ;;  %v915_v8 = vmul.f32 %v782_v16, %v782_v16  ;;  %v664_v55 = vadd.s32 120, %v1504_v28 }
 0x136   : > { %v847_v24 = vadd.f32 %v846_v35, %v784_v39  ;;  %v661_v35 = vadd.s32 96, %v1504_v28  ;;  %vm727_vm12 = vcmp.lt.s32.totalorder %v660_v30, %v1507_v18  ;;  %v917_v30 = vmul.f32 %v784_v39, %v784_v39 }
 0x137   : > { %v791_v22 = vsel %vm727_vm12, %v1411_v53, 0.0  ;;  %vm729_vm14 = vcmp.lt.s32.totalorder %v662_v2, %v1507_v18  ;;  %vm731_vm0 = vcmp.lt.s32.totalorder %v664_v55, %v1507_v18  ;;  %v919_v2 = vmul.f32 %v786_v37, %v786_v37 }
 0x138   : > { %v848_v10 = vadd.f32 %v847_v24, %v785_v33  ;;  %v913_v24 = vmul.f32 %v780_v26, %v780_v26  ;;  %vm728_vm13 = vcmp.lt.s32.totalorder %v661_v35, %v1507_v18  ;;  %v793_v35 = vsel %vm729_vm14, %v1431_v63, 0.0 }
 0x139   : > { %v792_v26 = vsel %vm728_vm13, %v1423_v59, 0.0  ;;  %v921_v55 = vmul.f32 %v788_v47, %v788_v47 }
 0x13a   : > { %v849_v14 = vadd.f32 %v848_v10, %v786_v37  ;;  %v790_v10 = vsel %vm726_vm11, %v1403_v49, 0.0  ;;  %v977_v62 = vadd.f32 %v914_v4, %v913_v24  ;;  %v665_v49 = vadd.s32 128, %v1504_v28 }
 0x13b   : > { %v666_v4 = vadd.s32 136, %v1504_v28  ;;  %v669_v37 = vadd.s32 160, %v1504_v28 }
 0x13c   : > { %v850_v12 = vadd.f32 %v849_v14, %v787_v43  ;;  %v663_v14 = vadd.s32 112, %v1504_v28  ;;  %vm732_vm1 = vcmp.lt.s32.totalorder %v665_v49, %v1507_v18 }
 0x13d   : > { %vm733_vm2 = vcmp.lt.s32.totalorder %v666_v4, %v1507_v18  ;;  %vm736_vm5 = vcmp.lt.s32.totalorder %v669_v37, %v1507_v18 }
 0x13e   : > { %v851_v32 = vadd.f32 %v850_v12, %v788_v47  ;;  %v916_v12 = vmul.f32 %v783_v6, %v783_v6  ;;  %vm730_vm15 = vcmp.lt.s32.totalorder %v663_v14, %v1507_v18  ;;  %v920_v14 = vmul.f32 %v787_v43, %v787_v43 }
 0x13f   : > { %v794_v24 = vsel %vm730_vm15, %v1419_v57, 0.0  ;;  %v670_v43 = vadd.s32 168, %v1504_v28  ;;  %v671_v47 = vadd.s32 176, %v1504_v28 }
 0x140   : > { %v852_v45 = vadd.f32 %v851_v32, %v789_v41  ;;  %v978_v32 = vadd.f32 %v977_v62, %v915_v8  ;;  %v667_v62 = vadd.s32 144, %v1504_v28  ;;  %v795_v8 = vsel %vm731_vm0, %v1427_v61, 0.0 }
 0x141   : > { %vm737_vm6 = vcmp.lt.s32.totalorder %v670_v43, %v1507_v18  ;;  %vm738_vm7 = vcmp.lt.s32.totalorder %v671_v47, %v1507_v18 }
 0x142   : > { %v853_v51 = vadd.f32 %v852_v45, %v790_v10  ;;  %v918_v45 = vmul.f32 %v785_v33, %v785_v33  ;;  %v979_v53 = vadd.f32 %v978_v32, %v916_v12  ;;  %v668_v33 = vadd.s32 152, %v1504_v28 }
 0x143   : > { %v796_v12 = vsel %vm732_vm1, %v1439_v3, 0.0  ;;  %vm734_vm3 = vcmp.lt.s32.totalorder %v667_v62, %v1507_v18  ;;  %v922_v32 = vmul.f32 %v789_v41, %v789_v41  ;;  %v672_v41 = vadd.s32 184, %v1504_v28 }
 0x144   : > { %v854_v20 = vadd.f32 %v853_v51, %v791_v22  ;;  %v980_v59 = vadd.f32 %v979_v53, %v917_v30  ;;  %v797_v30 = vsel %vm733_vm2, %v1447_v7, 0.0  ;;  %vm735_vm4 = vcmp.lt.s32.totalorder %v668_v33, %v1507_v18 }
 0x145   : > { %v799_v4 = vsel %vm735_vm4, %v1443_v5, 0.0  ;;  %v925_v62 = vmul.f32 %v792_v26, %v792_v26  ;;  %vm739_vm8 = vcmp.lt.s32.totalorder %v672_v41, %v1507_v18  ;;  %v929_v43 = vmul.f32 %v796_v12, %v796_v12 }
 0x146   : > { %v855_v16 = vadd.f32 %v854_v20, %v792_v26  ;;  %v981_v63 = vadd.f32 %v980_v59, %v918_v45  ;;  %v923_v45 = vmul.f32 %v790_v10, %v790_v10  ;;  %v800_v59 = vsel %vm736_vm5, %v1455_v11, 0.0 }
 0x147   : > { %v673_v10 = vadd.s32 192, %v1504_v28  ;;  %v675_v26 = vadd.s32 208, %v1504_v28  ;;  %v803_v37 = vsel %vm739_vm8, %v1459_v13, 0.0 }
 0x148   : > { %v856_v6 = vadd.f32 %v855_v16, %v793_v35  ;;  %v982_v57 = vadd.f32 %v981_v63, %v919_v2  ;;  %v798_v16 = vsel %vm734_vm3, %v1435_v1, 0.0  ;;  %v926_v63 = vmul.f32 %v793_v35, %v793_v35 }
 0x149   : > { %vm740_vm9 = vcmp.lt.s32.totalorder %v673_v10, %v1507_v18  ;;  %v676_v35 = vadd.s32 216, %v1504_v28  ;;  %vm742_vm11 = vcmp.lt.s32.totalorder %v675_v26, %v1507_v18  ;;  %v933_v10 = vmul.f32 %v800_v59, %v800_v59 }
 0x14a   : > { %v857_v39 = vadd.f32 %v856_v6, %v794_v24  ;;  %v983_v61 = vadd.f32 %v982_v57, %v920_v14  ;;  %v924_v6 = vmul.f32 %v791_v22, %v791_v22  ;;  %v801_v14 = vsel %vm737_vm6, %v1463_v15, 0.0 }
 0x14b   : > { %v674_v22 = vadd.s32 200, %v1504_v28  ;;  %vm743_vm12 = vcmp.lt.s32.totalorder %v676_v35, %v1507_v18 }
 0x14c   : > { %v858_v51 = vadd.f32 %v857_v39, %v795_v8  ;;  %v984_v3 = vadd.f32 %v983_v61, %v921_v55  ;;  %v927_v55 = vmul.f32 %v794_v24, %v794_v24  ;;  %v804_v61 = vsel %vm740_vm9, %v1471_v19, 0.0 }
 0x14d   : > { %vm741_vm10 = vcmp.lt.s32.totalorder %v674_v22, %v1507_v18  ;;  %v677_v24 = vadd.s32 224, %v1504_v28  ;;  %v807_v41 = vsel %vm743_vm12, %v1475_v21, 0.0  ;;  %v937_v35 = vmul.f32 %v804_v61, %v804_v61 }
 0x14e   : > { %v859_v20 = vadd.f32 %v858_v51, %v796_v12  ;;  %v985_v7 = vadd.f32 %v984_v3, %v922_v32  ;;  %v802_v51 = vsel %vm738_vm7, %v1451_v9, 0.0  ;;  %v930_v3 = vmul.f32 %v797_v30, %v797_v30 }
 0x14f   : > { %v679_v12 = vadd.s32 240, %v1504_v28  ;;  %vm744_vm13 = vcmp.lt.s32.totalorder %v677_v24, %v1507_v18 }
 0x150   : > { %v860_v49 = vadd.f32 %v859_v20, %v797_v30  ;;  %v986_v1 = vadd.f32 %v985_v7, %v923_v45  ;;  %v928_v20 = vmul.f32 %v795_v8, %v795_v8  ;;  %v805_v45 = vsel %vm741_vm10, %v1479_v23, 0.0 }
 0x151   : > { %v678_v8 = vadd.s32 232, %v1504_v28  ;;  %v680_v30 = vadd.s32 248, %v1504_v28  ;;  %vm746_vm15 = vcmp.lt.s32.totalorder %v679_v12, %v1507_v18 }
 0x152   : > { %v861_v53 = vadd.f32 %v860_v49, %v798_v16  ;;  %v987_v5 = vadd.f32 %v986_v1, %v924_v6  ;;  %v931_v6 = vmul.f32 %v798_v16, %v798_v16  ;;  %v808_v1 = vsel %vm744_vm13, %v1487_v27, 0.0 }
 0x153   : > { %vm745_vm14 = vcmp.lt.s32.totalorder %v678_v8, %v1507_v18  ;;  %v681_v16 = vadd.s32 256, %v1504_v28  ;;  %vm747_vm0 = vcmp.lt.s32.totalorder %v680_v30, %v1507_v18  ;;  %v941_v12 = vmul.f32 %v808_v1, %v808_v1 }
 0x154   : > { %v862_v2 = vadd.f32 %v861_v53, %v799_v4  ;;  %v988_v11 = vadd.f32 %v987_v5, %v925_v62  ;;  %v806_v53 = vsel %vm742_vm11, %v1467_v17, 0.0  ;;  %v934_v5 = vmul.f32 %v801_v14, %v801_v14 }
 0x155   : > { %vm748_vm1 = vcmp.lt.s32.totalorder %v681_v16, %v1507_v18  ;;  %v811_v26 = vsel %vm747_vm0, %v1491_v29, 0.0 }
 0x156   : > { %v863_v39 = vadd.f32 %v862_v2, %v800_v59  ;;  %v989_v15 = vadd.f32 %v988_v11, %v926_v63  ;;  %v932_v2 = vmul.f32 %v799_v4, %v799_v4  ;;  %v809_v63 = vsel %vm745_vm14, %v1495_v31, 0.0 }
 0x157   : > { %v682_v4 = vadd.s32 264, %v1504_v28  ;;  %v683_v59 = vadd.s32 272, %v1504_v28 }
 0x158   : > { %v864_v33 = vadd.f32 %v863_v39, %v801_v14  ;;  %v990_v9 = vadd.f32 %v989_v15, %v927_v55  ;;  %v935_v55 = vmul.f32 %v802_v51, %v802_v51  ;;  %v684_v14 = vadd.s32 280, %v1504_v28 }
 0x159   : > { %vm749_vm2 = vcmp.lt.s32.totalorder %v682_v4, %v1507_v18  ;;  %v812_v15 = vsel %vm748_vm1, %v1377_v36, 0.0  ;;  %vm750_vm3 = vcmp.lt.s32.totalorder %v683_v59, %v1507_v18  ;;  %v694_v59 = vadd.s32 360, %v1504_v28 }
 0x15a   : > { %v865_v57 = vadd.f32 %v864_v33, %v802_v51  ;;  %v991_v13 = vadd.f32 %v990_v9, %v928_v20  ;;  %v810_v33 = vsel %vm746_vm15, %v1483_v25, 0.0  ;;  %v685_v51 = vadd.s32 288, %v1504_v28 }
 0x15b   : > { %v938_v9 = vmul.f32 %v805_v45, %v805_v45  ;;  %vm751_vm4 = vcmp.lt.s32.totalorder %v684_v14, %v1507_v18  ;;  %v945_v4 = vmul.f32 %v812_v15, %v812_v15  ;;  %vm761_vm14 = vcmp.lt.s32.totalorder %v694_v59, %v1507_v18 }
 0x15c   : > { %v866_v32 = vadd.f32 %v865_v57, %v803_v37  ;;  %v992_v19 = vadd.f32 %v991_v13, %v929_v43  ;;  %v936_v57 = vmul.f32 %v803_v37, %v803_v37  ;;  %v813_v43 = vsel %vm749_vm2, %v1385_v40, 0.0 }
 0x15d   : > { %v686_v37 = vadd.s32 296, %v1504_v28  ;;  %vm752_vm5 = vcmp.lt.s32.totalorder %v685_v51, %v1507_v18  ;;  %v815_v8 = vsel %vm751_vm4, %v1381_v38, 0.0 }
 0x15e   : > { %v867_v49 = vadd.f32 %v866_v32, %v804_v61  ;;  %v993_v23 = vadd.f32 %v992_v19, %v930_v3  ;;  %v939_v3 = vmul.f32 %v806_v53, %v806_v53  ;;  %v687_v61 = vadd.s32 304, %v1504_v28 }
 0x15f   : > { %vm753_vm6 = vcmp.lt.s32.totalorder %v686_v37, %v1507_v18  ;;  %v816_v19 = vsel %vm752_vm5, %v1393_v44, 0.0 }
 0x160   : > { %v868_v47 = vadd.f32 %v867_v49, %v805_v45  ;;  %v994_v17 = vadd.f32 %v993_v23, %v931_v6  ;;  %v814_v49 = vsel %vm750_vm3, %v1373_v34, 0.0  ;;  %v688_v45 = vadd.s32 312, %v1504_v28 }
 0x161   : > { %vm754_vm7 = vcmp.lt.s32.totalorder %v687_v61, %v1507_v18  ;;  %v942_v23 = vmul.f32 %v809_v63, %v809_v63  ;;  %v699_v61 = vadd.s32 400, %v1504_v28 }
 0x162   : > { %v869_v7 = vadd.f32 %v868_v47, %v806_v53  ;;  %v995_v21 = vadd.f32 %v994_v17, %v932_v2  ;;  %v940_v47 = vmul.f32 %v807_v41, %v807_v41  ;;  %v689_v53 = vadd.s32 320, %v1504_v28 }
 0x163   : > { %v817_v2 = vsel %vm753_vm6, %v1401_v48, 0.0  ;;  %vm755_vm8 = vcmp.lt.s32.totalorder %v688_v45, %v1507_v18  ;;  %v700_v45 = vadd.s32 408, %v1504_v28  ;;  %vm766_vm3 = vcmp.lt.s32.totalorder %v699_v61, %v1507_v18  ;;  %v1740_v61 = vld [vmem:[#allocation14_spill] sm:$0xff] }
 0x164   : > { %v870_v62 = vadd.f32 %v869_v7, %v807_v41  ;;  %v996_v27 = vadd.f32 %v995_v21, %v933_v10  ;;  %v690_v41 = vadd.s32 328, %v1504_v28  ;;  %v943_v10 = vmul.f32 %v810_v33, %v810_v33 }
 0x165   : > { %vm756_vm9 = vcmp.lt.s32.totalorder %v689_v53, %v1507_v18  ;;  %v819_v16 = vsel %vm755_vm8, %v1397_v46, 0.0  ;;  %v950_v37 = vmul.f32 %v817_v2, %v817_v2  ;;  %v701_v53 = vadd.s32 416, %v1504_v28 }
 0x166   : > { %v871_v39 = vadd.f32 %v870_v62, %v808_v1  ;;  %v997_v31 = vadd.f32 %v996_v27, %v934_v5  ;;  %v818_v62 = vsel %vm754_vm7, %v1389_v42, 0.0  ;;  %v691_v1 = vadd.s32 336, %v1504_v28 }
 0x167   : > { %vm757_vm10 = vcmp.lt.s32.totalorder %v690_v41, %v1507_v18  ;;  %v820_v21 = vsel %vm756_vm9, %v1409_v52, 0.0  ;;  %v946_v27 = vmul.f32 %v813_v43, %v813_v43  ;;  %vm767_vm4 = vcmp.lt.s32.totalorder %v700_v45, %v1507_v18  ;;  %v1741_v45 = vld [vmem:[#allocation11_spill] sm:$0xff] }
 0x168   : > { %v872_v22 = vadd.f32 %v871_v39, %v809_v63  ;;  %v998_v25 = vadd.f32 %v997_v31, %v935_v55  ;;  %v944_v39 = vmul.f32 %v811_v26, %v811_v26  ;;  %v692_v63 = vadd.s32 344, %v1504_v28 }
 0x169   : > { %vm758_vm11 = vcmp.lt.s32.totalorder %v691_v1, %v1507_v18  ;;  %v821_v55 = vsel %vm757_vm10, %v1417_v56, 0.0  ;;  %v695_v31 = vadd.s32 368, %v1504_v28  ;;  %vm768_vm5 = vcmp.lt.s32.totalorder %v701_v53, %v1507_v18 }
 0x16a   : > { %v873_v11 = vadd.f32 %v872_v22, %v810_v33  ;;  %v999_v29 = vadd.f32 %v998_v25, %v936_v57  ;;  %v693_v22 = vadd.s32 352, %v1504_v28  ;;  %vm759_vm12 = vcmp.lt.s32.totalorder %v692_v63, %v1507_v18 }
 0x16b   : > { %v947_v57 = vmul.f32 %v814_v49, %v814_v49  ;;  %vm762_vm15 = vcmp.lt.s32.totalorder %v695_v31, %v1507_v18  ;;  %v706_v31 = vadd.s32 456, %v1504_v28 }
 0x16c   : > { %v874_v20 = vadd.f32 %v873_v11, %v811_v26  ;;  %v1000_v36 = vadd.f32 %v999_v29, %v937_v35  ;;  %v822_v26 = vsel %vm758_vm11, %v1405_v50, 0.0  ;;  %vm760_vm13 = vcmp.lt.s32.totalorder %v693_v22, %v1507_v18  ;;  %v1735_v22 = vld [vmem:[#allocation8_spill] sm:$0xff] }
 0x16d   : > { %v696_v35 = vadd.s32 376, %v1504_v28  ;;  %v824_v51 = vsel %vm760_vm13, %v1425_v60, 0.0  ;;  %v825_v29 = vsel %vm761_vm14, %v1433_v0, 0.0  ;;  %v955_v1 = vmul.f32 %v822_v26, %v822_v26 }
 0x16e   : > { %v875_v32 = vadd.f32 %v874_v20, %v812_v15  ;;  %v1001_v40 = vadd.f32 %v1000_v36, %v938_v9  ;;  %v823_v20 = vsel %vm759_vm12, %v1413_v54, 0.0  ;;  %v948_v15 = vmul.f32 %v815_v8, %v815_v8 }
 0x16f   : > { %vm763_vm0 = vcmp.lt.s32.totalorder %v696_v35, %v1507_v18  ;;  %v951_v36 = vmul.f32 %v818_v62, %v818_v62  ;;  %vm773_vm10 = vcmp.lt.s32.totalorder %v706_v31, %v1507_v18 }
 0x170   : > { %v876_v24 = vadd.f32 %v875_v32, %v813_v43  ;;  %v1002_v34 = vadd.f32 %v1001_v40, %v939_v3  ;;  %v949_v32 = vmul.f32 %v816_v19, %v816_v19  ;;  %v697_v43 = vadd.s32 384, %v1504_v28 }
 0x171   : > { %v826_v3 = vsel %vm762_vm15, %v1421_v58, 0.0  ;;  %v952_v40 = vmul.f32 %v819_v16, %v819_v16 }
 0x172   : > { %v877_v13 = vadd.f32 %v876_v24, %v814_v49  ;;  %v1003_v38 = vadd.f32 %v1002_v34, %v940_v47  ;;  %v698_v24 = vadd.s32 392, %v1504_v28  ;;  %vm764_vm1 = vcmp.lt.s32.totalorder %v697_v43, %v1507_v18 }
 0x173   : > { %v953_v34 = vmul.f32 %v820_v21, %v820_v21 }
 0x174   : > { %v878_v6 = vadd.f32 %v877_v13, %v815_v8  ;;  %v1004_v44 = vadd.f32 %v1003_v38, %v941_v12  ;;  %v1730_v8 = vld [vmem:[#allocation2_spill] sm:$0xff]  ;;  %vm765_vm2 = vcmp.lt.s32.totalorder %v698_v24, %v1507_v18  ;;  %v954_v38 = vmul.f32 %v821_v55, %v821_v55 }
 0x175   : > { %v827_v47 = vsel %vm763_vm0, %v1730_v8, 0.0 }
 0x176   : > { %v879_v7 = vadd.f32 %v878_v6, %v816_v19  ;;  %v1005_v48 = vadd.f32 %v1004_v44, %v942_v23  ;;  %v1731_v19 = vld [vmem:[#allocation4_spill] sm:$0xff]  ;;  %v960_v43 = vmul.f32 %v827_v47, %v827_v47 }
 0x177   : > { %v828_v12 = vsel %vm764_vm1, %v1731_v19, 0.0  ;;  %vm1046_vm1 = vcmp.eq.s32.totalorder %v1504_v28, 0 }
 0x178   : > { %v880_v30 = vadd.f32 %v879_v7, %v817_v2  ;;  %v1006_v42 = vadd.f32 %v1005_v48, %v943_v10  ;;  %v1732_v2 = vld [vmem:[#allocation6_spill] sm:$0xff]  ;;  %v1733_v10 = vld [vmem:[#allocation3_spill] sm:$0xff]  ;;  %v1734_v48 = vld [vmem:[#allocation5_spill] sm:$0xff] }
 0x179   : > { %v829_v23 = vsel %vm765_vm2, %v1732_v2, 0.0  ;;  %v830_v44 = vsel %vm766_vm3, %v1733_v10, 0.0  ;;  %v831_v63 = vsel %vm767_vm4, %v1734_v48, 0.0 }
 0x17a   : > { %v881_v17 = vadd.f32 %v880_v30, %v818_v62  ;;  %v1007_v46 = vadd.f32 %v1006_v42, %v944_v39  ;;  %v702_v30 = vadd.s32 424, %v1504_v28  ;;  %v962_v8 = vmul.f32 %v829_v23, %v829_v23 }
 0x17b   : > { %v963_v19 = vmul.f32 %v830_v44, %v830_v44 }
 0x17c   : > { %v882_v5 = vadd.f32 %v881_v17, %v819_v16  ;;  %v1008_v52 = vadd.f32 %v1007_v46, %v945_v4  ;;  %v703_v16 = vadd.s32 432, %v1504_v28  ;;  %v704_v4 = vadd.s32 440, %v1504_v28 }
 0x17d   : > { %vm769_vm6 = vcmp.lt.s32.totalorder %v702_v30, %v1507_v18  ;;  %v705_v46 = vadd.s32 448, %v1504_v28 }
 0x17e   : > { %v883_v33 = vadd.f32 %v882_v5, %v820_v21  ;;  %v1009_v56 = vadd.f32 %v1008_v52, %v946_v27  ;;  %v956_v5 = vmul.f32 %v823_v20, %v823_v20  ;;  %vm770_vm7 = vcmp.lt.s32.totalorder %v703_v16, %v1507_v18 }
 0x17f   : > { %vm771_vm8 = vcmp.lt.s32.totalorder %v704_v4, %v1507_v18  ;;  %vm772_vm9 = vcmp.lt.s32.totalorder %v705_v46, %v1507_v18  ;;  %v712_v16 = vadd.s32 504, %v1504_v28 }
 0x180   : > { %v884_v11 = vadd.f32 %v883_v33, %v821_v55  ;;  %v1010_v50 = vadd.f32 %v1009_v56, %v947_v57  ;;  %v832_v33 = vsel %vm768_vm5, %v1735_v22, 0.0  ;;  %v957_v55 = vmul.f32 %v824_v51, %v824_v51  ;;  %v1745_v22 = vld [vmem:[#allocation15_spill] sm:$0xff] }
 0x181   : > { %v958_v57 = vmul.f32 %v825_v29, %v825_v29  ;;  %v959_v56 = vmul.f32 %v826_v3, %v826_v3  ;;  %vm779_vm0 = vcmp.lt.s32.totalorder %v712_v16, %v1507_v18 }
 0x182   : > { %v885_v14 = vadd.f32 %v884_v11, %v822_v26  ;;  %v1011_v54 = vadd.f32 %v1010_v50, %v948_v15  ;;  %v1736_v11 = vld [vmem:[#allocation10_spill] sm:$0xff] }
 0x183   : > { %v833_v26 = vsel %vm769_vm6, %v1736_v11, 0.0 }
 0x184   : > { %v886_v25 = vadd.f32 %v885_v14, %v823_v20  ;;  %v1012_v60 = vadd.f32 %v1011_v54, %v949_v32  ;;  %v1737_v20 = vld [vmem:[#allocation7_spill] sm:$0xff]  ;;  %v1738_v32 = vld [vmem:[#allocation9_spill] sm:$0xff]  ;;  %v1739_v54 = vld [vmem:[#allocation12_spill] sm:$0xff] }
 0x185   : > { %v834_v15 = vsel %vm770_vm7, %v1737_v20, 0.0  ;;  %v835_v50 = vsel %vm771_vm8, %v1738_v32, 0.0  ;;  %v836_v24 = vsel %vm772_vm9, %v1739_v54, 0.0 }
 0x186   : > { %v887_v9 = vadd.f32 %v886_v25, %v824_v51  ;;  %v1013_v0 = vadd.f32 %v1012_v60, %v950_v37  ;;  %v707_v25 = vadd.s32 464, %v1504_v28  ;;  %v968_v4 = vmul.f32 %v835_v50, %v835_v50 }
 0x188   : > { %v888_v49 = vadd.f32 %v887_v9, %v825_v29  ;;  %v1014_v58 = vadd.f32 %v1013_v0, %v951_v36  ;;  %v708_v29 = vadd.s32 472, %v1504_v28  ;;  %vm774_vm11 = vcmp.lt.s32.totalorder %v707_v25, %v1507_v18 }
 0x189   : > { %v710_v0 = vadd.s32 488, %v1504_v28 }
 0x18a   : > { %v889_v13 = vadd.f32 %v888_v49, %v826_v3  ;;  %v1015_v41 = vadd.f32 %v1014_v58, %v952_v40  ;;  %v961_v49 = vmul.f32 %v828_v12, %v828_v12  ;;  %v709_v3 = vadd.s32 480, %v1504_v28  ;;  %v1742_v58 = vld [vmem:[#allocation13_spill] sm:$0xff] }
 0x18b   : > { %vm775_vm12 = vcmp.lt.s32.totalorder %v708_v29, %v1507_v18  ;;  %vm777_vm14 = vcmp.lt.s32.totalorder %v710_v0, %v1507_v18 }
 0x18c   : > { %v890_v6 = vadd.f32 %v889_v13, %v827_v47  ;;  %v1016_v17 = vadd.f32 %v1015_v41, %v953_v34  ;;  %v837_v13 = vsel %vm773_vm10, %v1740_v61, 0.0  ;;  %vm776_vm13 = vcmp.lt.s32.totalorder %v709_v3, %v1507_v18  ;;  %v1743_v41 = vld [vmem:[#allocation16_spill] sm:$0xff] }
 0x18d   : > { %v839_v53 = vsel %vm775_vm12, %v1742_v58, 0.0  ;;  %v840_v30 = vsel %vm776_vm13, %v1743_v41, 0.0 }
 0x18e   : > { %v891_v7 = vadd.f32 %v890_v6, %v828_v12  ;;  %v1017_v21 = vadd.f32 %v1016_v17, %v954_v38  ;;  %v838_v6 = vsel %vm774_vm11, %v1741_v45, 0.0  ;;  %v711_v38 = vadd.s32 496, %v1504_v28 }
 0x18f   : > { %v966_v17 = vmul.f32 %v833_v26, %v833_v26  ;;  %v971_v31 = vmul.f32 %v838_v6, %v838_v6  ;;  %v972_v20 = vmul.f32 %v839_v53, %v839_v53 }
 0x190   : > { %v892_v62 = vadd.f32 %v891_v7, %v829_v23  ;;  %v1018_v27 = vadd.f32 %v1017_v21, %v955_v1  ;;  %v964_v7 = vmul.f32 %v831_v63, %v831_v63  ;;  %vm778_vm15 = vcmp.lt.s32.totalorder %v711_v38, %v1507_v18 }
 0x192   : > { %v893_v39 = vadd.f32 %v892_v62, %v830_v44  ;;  %v1019_v52 = vadd.f32 %v1018_v27, %v956_v5  ;;  %v965_v62 = vmul.f32 %v832_v33, %v832_v33  ;;  %v967_v5 = vmul.f32 %v834_v15, %v834_v15 }
 0x193   : > { %v969_v27 = vmul.f32 %v836_v24, %v836_v24 }
 0x194   : > { %v894_v42 = vadd.f32 %v893_v39, %v831_v63  ;;  %v1020_v35 = vadd.f32 %v1019_v52, %v957_v55  ;;  %v1744_v39 = vld [vmem:[#allocation18_spill] sm:$0xff]  ;;  %v842_v55 = vsel %vm778_vm15, %v1745_v22, 0.0 }
 0x195   : > { %v841_v48 = vsel %vm777_vm14, %v1744_v39, 0.0 }
 0x196   : > { %v895_v59 = vadd.f32 %v894_v42, %v832_v33  ;;  %v1021_v9 = vadd.f32 %v1020_v35, %v958_v57  ;;  %v973_v35 = vmul.f32 %v840_v30, %v840_v30 }
 0x198   : > { %v896_v14 = vadd.f32 %v895_v59, %v833_v26  ;;  %v1022_v36 = vadd.f32 %v1021_v9, %v959_v56  ;;  %v970_v59 = vmul.f32 %v837_v13, %v837_v13  ;;  %v1746_v26 = vld [vmem:[#allocation17_spill] sm:$0xff] }
 0x199   : > { %v843_v57 = vsel %vm779_vm0, %v1746_v26, 0.0 }
 0x19a   : > { %v897_v51 = vadd.f32 %v896_v14, %v834_v15  ;;  %v1023_v40 = vadd.f32 %v1022_v36, %v960_v43  ;;  %v975_v43 = vmul.f32 %v842_v55, %v842_v55  ;;  %v976_v9 = vmul.f32 %v843_v57, %v843_v57 }
 0x19c   : > { %v898_v37 = vadd.f32 %v897_v51, %v835_v50  ;;  %v1024_v34 = vadd.f32 %v1023_v40, %v961_v49  ;;  %v974_v51 = vmul.f32 %v841_v48, %v841_v48 }
 0x19e   : > { %v899_v60 = vadd.f32 %v898_v37, %v836_v24  ;;  %v1025_v2 = vadd.f32 %v1024_v34, %v962_v8 }
 0x1a0   : > { %v900_v47 = vadd.f32 %v899_v60, %v837_v13  ;;  %v1026_v10 = vadd.f32 %v1025_v2, %v963_v19 }
 0x1a2   : > { %v901_v12 = vadd.f32 %v900_v47, %v838_v6  ;;  %v1027_v44 = vadd.f32 %v1026_v10, %v964_v7  ;;  %v647_v47 = vld [vmem:[%s1712_s2] sm:$0x3] }
 0x1a4   : > { %v902_v23 = vadd.f32 %v901_v12, %v839_v53  ;;  %v1028_v21 = vadd.f32 %v1027_v44, %v965_v62 }
 0x1a6   : > { %v903_v1 = vadd.f32 %v902_v23, %v840_v30  ;;  %v1029_v42 = vadd.f32 %v1028_v21, %v966_v17 }
 0x1a8   : > { %v904_v63 = vadd.f32 %v903_v1, %v841_v48  ;;  %v1030_v46 = vadd.f32 %v1029_v42, %v967_v5 }
 0x1aa   : > { %v905_v33 = vadd.f32 %v904_v63, %v842_v55  ;;  %v1031_v11 = vadd.f32 %v1030_v46, %v968_v4 }
 0x1ac   : > { %v906_v52 = vadd.f32 %v905_v33, %v843_v57  ;;  %v1032_v14 = vadd.f32 %v1031_v11, %v969_v27 }
 0x1ae   : > { %v1033_v56 = vadd.f32 %v1032_v14, %v970_v59  ;;  %v907_v15 = vrot.slane %v906_v52, 4 }
 0x1b0   : > { %v1034_v25 = vadd.f32 %v1033_v56, %v971_v31  ;;  %v908_v50 = vadd.f32 %v907_v15, %v906_v52 }
 0x1b2   : > { %v1035_v32 = vadd.f32 %v1034_v25, %v972_v20  ;;  %v909_v37 = vrot.slane %v908_v50, 2 }
 0x1b4   : > { %v1036_v18 = vadd.f32 %v1035_v32, %v973_v35  ;;  %v910_v49 = vadd.f32 %v909_v37, %v908_v50 }
 0x1b6   : > { %v1037_v29 = vadd.f32 %v1036_v18, %v974_v51  ;;  %v911_v60 = vrot.slane %v910_v49, 1 }
 0x1b8   : > { %v1038_v54 = vadd.f32 %v1037_v29, %v975_v43  ;;  %v912_v8 = vadd.f32 %v911_v60, %v910_v49 }
 0x1ba   : > { %v1039_v24 = vadd.f32 %v1038_v54, %v976_v9 }
 0x1bc   : > { %v1040_v36 = vrot.slane %v1039_v24, 4 }
 0x1be   : > { %v1041_v3 = vadd.f32 %v1040_v36, %v1039_v24 }
 0x1c0   : > { %v1042_v61 = vrot.slane %v1041_v3, 2 }
 0x1c2   : > { %v1043_v13 = vadd.f32 %v1042_v61, %v1041_v3 }
 0x1c4   : > { %v1044_v40 = vrot.slane %v1043_v13, 1 }
 0x1c6   : > { %v1045_v0 = vadd.f32 %v1044_v40, %v1043_v13 }
 0x1c8   : > { %v1047_v45 = vsel %vm1046_vm1, %v912_v8, %v1045_v0 }
 0x1c9   : > { %v1048_v6 = vadd.f32 %v1047_v45, %v647_v47 }
 0x1cb   : > { %1049 = vst [vmem:[%s1712_s2] sm:$0x3] %v1048_v6 }
 0x1cc PF: > { %s12_s9 = sadd.s32 1, %s1238_s9  }
 0x1cd   : > { %p9_p5 = scmp.ge.s32.totalorder %s12_s9, 5  }
 0x1cf   :  { %11 = sbr.rel (!%p9_p5) target bundleno = 1 (0x1), region = 58 }

// kernel: pc_embedding.5
= control target key start
LH: loop header
LB: loop body
LE: loop exit
PB: predicated region body
PF: predicated region fallthrough
CT: control target
= control target key end

     0   :  { %s2065_s18 = smov 0   ;;  %s2067_s19 = smov 0   ;;  %s2896_s0 = inlined_call_operand.vmem [shape: bf16[1280,128], index: 0, kind: input, shape index: {}]   ;;  %s2897_s1 = inlined_call_operand.vmem [shape: f32[2,128], index: 1, kind: input, shape index: {}]   ;;  %s2898_s2 = inlined_call_operand.vmem [shape: f32[2,128], index: 2, kind: input, shape index: {}]   ;;  %s2899_s3 = inlined_call_operand.vmem [shape: bf16[128,128], index: 3, kind: input, shape index: {}]   ;;  %s2900_s4 = inlined_call_operand.vmem [shape: f32[1,128], index: 4, kind: input, shape index: {}]   ;;  %s2901_s5 = inlined_call_operand.vmem [shape: f32[1280,128], index: 5, kind: output, shape index: {}]  }
   0x1   :  { %s2069_s20 = smov 0  }
   0x2 LB: > { %s2078_s21 = sadd.s32 4294967295, %s2001_s20   ;;  %s2080_s22 = sadd.s32 1, %s2001_s20   ;;  %s2001_s20 = sphi %s2069_s20, %s2946_s20   ;;  %s1997_s19 = sphi %s2067_s19, %s2945_s19   ;;  %s1993_s18 = sphi %s2065_s18, %s2944_s18  }
   0x3   : > { %s129_s23 = ssub.s32 %s2001_s20, %s2080_s22  ;;  %s132_s24 = sadd.s32 1, %s1997_s19 }
   0x4   : > { %p130_p0 = scmp.eq.s32.totalorder %s129_s23, 0  ;;  %p142_p1 = scmp.ne.s32.totalorder %s1997_s19, %s1993_s18 }
   0x5   : > { %p143_p2 = scmp.eq.s32.totalorder %s2078_s21, 2  ;;  %p1521_p3 = scmp.ge.s32.totalorder %s2001_s20, 1 }
   0x6   : > { %s2088_s25 = scalar_select %p130_p0, %s1997_s19, %s132_s24  }
   0x7   : > { %p2090_p4 = por %p143_p2, %p142_p1  ;;  %p196_p5 = scmp.lt.s32.totalorder %s2001_s20, 4 }
   0x9   : > { %p197_p6 = pnand %p1521_p3, %p196_p5 }
   0xa   : > { %v1937_v0 = vld [vmem:[%s2899_s3] sm:$0xff] (!%p197_p6)   ;;  %v1938_v1 = vld [vmem:[%s2899_s3 + $0x8] sm:$0xff] (!%p197_p6)   ;;  %s2101_s6 = sshll.u32 (!%p197_p6), %s2078_s21, 6  ;;  %v1939_v2 = vld [vmem:[%s2899_s3 + $0x10] sm:$0xff] (!%p197_p6)   ;;  %v395_v9 = vlaneseq (!%p197_p6)  ;;  %s224_s10 = sand.u32 (!%p197_p6), 1, %s1993_s18  }
   0xb   : > { %200 = sbr.rel (%p197_p6) target bundleno = 408 (0x198), region = 40  ;;  %1753 = vmatprep.subr.bf16.mxu0 (!%p197_p6), %v1937_v0  ;;  %1833 = vmatprep.subr.bf16.mxu1 (!%p197_p6), %v1937_v0  ;;  %p232_p7 = scmp.lt.s32.totalorder (!%p197_p6), %s2101_s6, 159  ;;  %v1940_v3 = vld [vmem:[%s2899_s3 + $0x18] sm:$0xff] (!%p197_p6)   ;;  %v247_v4 = vld [vmem:[%s2897_s1] sm:$0x3] (!%p197_p6)  ;;  %v1942_v11 = vld [vmem:[%s2899_s3 + $0x28] sm:$0xff] (!%p197_p6)  }
   0xc   : > { %1754 = vmatpush3.bf16.msra.mxu0 (!%p197_p6), %v1937_v0  ;;  %1841 = vmatpush3.bf16.msra.mxu1 (!%p197_p6), %v1937_v0  ;;  %v2114_v5 = vmul.f32 (!%p197_p6), 0.00078125, %v247_v4  ;;  %v1941_v7 = vld [vmem:[%s2899_s3 + $0x20] sm:$0xff] (!%p197_p6)   ;;  %v2130_v13 = vshrl.u32 (!%p197_p6), %v395_v9, 7  ;;  %v1943_v17 = vld [vmem:[%s2899_s3 + $0x30] sm:$0xff] (!%p197_p6)   ;;  %v1944_v35 = vld [vmem:[%s2899_s3 + $0x38] sm:$0xff] (!%p197_p6)  }
   0xd   : > { %1755 = vmatprep.subr.bf16.mxu0 (!%p197_p6), %v1938_v1  ;;  %1834 = vmatprep.subr.bf16.mxu1 (!%p197_p6), %v1938_v1  ;;  %s1522_s11 = sshll.u32 (!%p197_p6), %s224_s10, 9 }
   0xe   : > { %v250_v6 = vmul.f32 (!%p197_p6), %v2114_v5, %v2114_v5  ;;  %v397_v20 = vsub.s32 (!%p197_p6), 0, %v2130_v13  ;;  %v465_v25 = vsub.s32 (!%p197_p6), 1, %v2130_v13  ;;  %s2564_s18 = scalar_lea.vmem (!%p197_p6), [#allocation2], %s1522_s11  }
  0x10   : > { %1756 = vmatpush3.bf16.msra.mxu0 (!%p197_p6), %v1938_v1  ;;  %1842 = vmatpush3.bf16.msra.mxu1 (!%p197_p6), %v1938_v1  ;;  %v252_v8 = vrot.slane (!%p197_p6), %v250_v6, 7  ;;  %v248_v6 = vld [vmem:[%s2898_s2] sm:$0x3] (!%p197_p6) }
  0x11   : > { %1757 = vmatprep.subr.bf16.mxu0 (!%p197_p6), %v1939_v2  ;;  %1835 = vmatprep.subr.bf16.mxu1 (!%p197_p6), %v1939_v2 }
  0x12   : > { %s233_s13 = scalar_select %p232_p7, %s2101_s6, 159  ;;  %v254_v10 = vsub.f32 %v2114_v5, %v252_v8 }
  0x13   : > { %s1059_s14 = ssub.s32 (%p2090_p4), 160, %s2101_s6  ;;  %s1551_s15 = sshll.u32 (%p2090_p4), %s2078_s21, 9 }
  0x14   : > { %1758 = vmatpush3.bf16.msra.mxu0 %v1939_v2  ;;  %1843 = vmatpush3.bf16.msra.mxu1 %v1939_v2  ;;  %s1524_s16 = sshll.u32 %s233_s13, 2  ;;  %v255_v12 = vmax.f32 %v254_v10, 0.0  ;;  %p1060_p8 = scmp.lt.s32.totalorder (%p2090_p4), %s1059_s14, 64 }
  0x15   : > { %1759 = vmatprep.subr.bf16.mxu0 %v1940_v3  ;;  %1836 = vmatprep.subr.bf16.mxu1 %v1940_v3  ;;  %s2128_s27 = scalar_lea.vmem %s2896_s0, %s1524_s16  ;;  %s2697_s20 = scalar_lea.vmem (%p2090_p4), %s2901_s5, %s1551_s15  }
  0x16   : > { %v256_v14 = vadd.f32 1e-05, %v255_v12  ;;  %v2133_v15 = vld [vmem:[%s2128_s27] sm:$0xff]   ;;  %v2142_v18 = vld [vmem:[%s2128_s27 + $0x8] sm:$0xff]   ;;  %v2149_v21 = vld [vmem:[%s2128_s27 + $0x10] sm:$0xff]  }
  0x17   : > { %v2136_v16 = vld [vmem:[%s2128_s27 + $0x80] sm:$0xff]   ;;  %v2145_v19 = vld [vmem:[%s2128_s27 + $0x88] sm:$0xff]   ;;  %v2152_v22 = vld [vmem:[%s2128_s27 + $0x90] sm:$0xff]   ;;  %v1556_v23 = vunpack.c.l.bf16 %v2133_v15  ;;  %v1557_v24 = vunpack.c.h.bf16 %v2133_v15  ;;  %v1560_v30 = vunpack.c.l.bf16 %v2142_v18  ;;  %v1561_v31 = vunpack.c.h.bf16 %v2142_v18 }
  0x18   : > { %1760 = vmatpush3.bf16.msra.mxu0 %v1940_v3  ;;  %1844 = vmatpush3.bf16.msra.mxu1 %v1940_v3  ;;  %1945 = vrsqrt.f32 %v256_v14  ;;  %v1620_v26 = vunpack.c.l.bf16 %v2136_v16  ;;  %v2159_v27 = vld [vmem:[%s2128_s27 + $0x18] sm:$0xff]   ;;  %v1621_v29 = vunpack.c.h.bf16 %v2136_v16  ;;  %v1624_v32 = vunpack.c.l.bf16 %v2145_v19  ;;  %v2169_v33 = vld [vmem:[%s2128_s27 + $0x20] sm:$0xff]   ;;  %v2182_v40 = vld [vmem:[%s2128_s27 + $0x28] sm:$0xff]  }
  0x19   : > { %1761 = vmatprep.subr.bf16.mxu0 %v1941_v7  ;;  %1837 = vmatprep.subr.bf16.mxu1 %v1941_v7  ;;  %v2162_v28 = vld [vmem:[%s2128_s27 + $0x98] sm:$0xff]   ;;  %v2172_v34 = vld [vmem:[%s2128_s27 + $0xa0] sm:$0xff]   ;;  %v1625_v36 = vunpack.c.h.bf16 %v2145_v19  ;;  %v1564_v37 = vunpack.c.l.bf16 %v2149_v21  ;;  %v1565_v38 = vunpack.c.h.bf16 %v2149_v21  ;;  %v1628_v39 = vunpack.c.l.bf16 %v2152_v22  ;;  %v2185_v41 = vld [vmem:[%s2128_s27 + $0xa8] sm:$0xff]  }
  0x1a   : > { %v1629_v42 = vunpack.c.h.bf16 %v2152_v22  ;;  %v1568_v43 = vunpack.c.l.bf16 %v2159_v27  ;;  %v1569_v44 = vunpack.c.h.bf16 %v2159_v27  ;;  %v1632_v45 = vunpack.c.l.bf16 %v2162_v28  ;;  %v2192_v46 = vld [vmem:[%s2128_s27 + $0x30] sm:$0xff]   ;;  %v2202_v52 = vld [vmem:[%s2128_s27 + $0x38] sm:$0xff]   ;;  %v2212_v58 = vld [vmem:[%s2128_s27 + $0x40] sm:$0xff]  }
  0x1b   : > { %v2195_v47 = vld [vmem:[%s2128_s27 + $0xb0] sm:$0xff]   ;;  %v1633_v48 = vunpack.c.h.bf16 %v2162_v28  ;;  %v1572_v49 = vunpack.c.l.bf16 %v2169_v33  ;;  %v1573_v50 = vunpack.c.h.bf16 %v2169_v33  ;;  %v2205_v53 = vld [vmem:[%s2128_s27 + $0xb8] sm:$0xff]   ;;  %v2215_v59 = vld [vmem:[%s2128_s27 + $0xc0] sm:$0xff]   ;;  %v2903_v13 = vunpack.c.l.bf16 %v2172_v34 }
  0x1c   : > { %1762 = vmatpush3.bf16.msra.mxu0 %v1941_v7  ;;  %1845 = vmatpush3.bf16.msra.mxu1 %v1941_v7  ;;  %v2222_v0 = vld [vmem:[%s2128_s27 + $0x48] sm:$0xff]   ;;  %v2232_v7 = vld [vmem:[%s2128_s27 + $0x50] sm:$0xff]   ;;  %v2242_v14 = vld [vmem:[%s2128_s27 + $0x58] sm:$0xff]   ;;  %v2905_v28 = vunpack.c.l.bf16 %v2182_v40 }
  0x1d   : > { %1763 = vmatprep.subr.bf16.mxu0 %v1942_v11  ;;  %1838 = vmatprep.subr.bf16.mxu1 %v1942_v11  ;;  %v2225_v1 = vld [vmem:[%s2128_s27 + $0xc8] sm:$0xff]   ;;  %v2239_v12 = vld [vmem:[%s2128_s27 + $0xd0] sm:$0xff]   ;;  %v2252_v4 = vld [vmem:[%s2128_s27 + $0xd8] sm:$0xff]  }
  0x1e   : > { %v2255_v3 = vld [vmem:[%s2128_s27 + $0x60] sm:$0xff]   ;;  %v2264_v10 = vld [vmem:[%s2128_s27 + $0x68] sm:$0xff]   ;;  %v2277_v56 = vld [vmem:[%s2128_s27 + $0x70] sm:$0xff]  }
  0x1f   : > { %v2261_v62 = vld [vmem:[%s2128_s27 + $0xe0] sm:$0xff]   ;;  %v2280_v55 = vld [vmem:[%s2128_s27 + $0xf0] sm:$0xff]   ;;  %v1608_v60 = vunpack.c.l.bf16 %v2264_v10  ;;  %v1609_v8 = vunpack.c.h.bf16 %v2264_v10  ;;  %v1613_v9 = vunpack.c.h.bf16 %v2277_v56 }
  0x20   : > { %1764 = vmatpush3.bf16.msra.mxu0 %v1942_v11  ;;  %1846 = vmatpush3.bf16.msra.mxu1 %v1942_v11 }
  0x21   : > { %1765 = vmatprep.subr.bf16.mxu0 %v1943_v17  ;;  %1839 = vmatprep.subr.bf16.mxu1 %v1943_v17 }
  0x24   : > { %1766 = vmatpush3.bf16.msra.mxu0 %v1943_v17  ;;  %1847 = vmatpush3.bf16.msra.mxu1 %v1943_v17  ;;  %v1946_v17 = vpop.eup %1945 }
  0x25   : > { %1767 = vmatprep.subr.bf16.mxu0 %v1944_v35  ;;  %1840 = vmatprep.subr.bf16.mxu1 %v1944_v35  ;;  %v259_v2 = vrot.slane %v1946_v17, 1  ;;  %v2271_v17 = vld [vmem:[%s2128_s27 + $0xe8] sm:$0xff]  }
  0x26   : > { %v1672_v63 = vunpack.c.l.bf16 %v2271_v17  ;;  %v1673_v54 = vunpack.c.h.bf16 %v2271_v17 }
  0x27   : > { %v261_v57 = vmul.f32 %v259_v2, %v248_v6 }
  0x28   : > { %1768 = vmatpush3.bf16.msra.mxu0 %v1944_v35  ;;  %1848 = vmatpush3.bf16.msra.mxu1 %v1944_v35 }
  0x29   : > { %v262_v2 = vmul.f32 %v261_v57, %v2114_v5  ;;  %v2289_v35 = vrot.slane %v261_v57, %v397_v20 }
  0x2b   : > { %v264_v51 = vrot.slane %v262_v2, 7  ;;  %v399_v5 = vmul.f32 %v1556_v23, %v2289_v35  ;;  %v400_v20 = vmul.f32 %v1557_v24, %v2289_v35  ;;  %v431_v57 = vmul.f32 %v1620_v26, %v2289_v35 }
  0x2c   : > { %v432_v11 = vmul.f32 %v1621_v29, %v2289_v35  ;;  %v401_v2 = vmul.f32 %v1560_v30, %v2289_v35  ;;  %v402_v23 = vmul.f32 %v1561_v31, %v2289_v35  ;;  %v433_v15 = vmul.f32 %v1624_v32, %v2289_v35 }
  0x2d   : > { %v266_v24 = vsub.f32 %v248_v6, %v264_v51  ;;  %v434_v26 = vmul.f32 %v1625_v36, %v2289_v35  ;;  %v403_v16 = vmul.f32 %v1564_v37, %v2289_v35  ;;  %v404_v29 = vmul.f32 %v1565_v38, %v2289_v35 }
  0x2e   : > { %v435_v18 = vmul.f32 %v1628_v39, %v2289_v35  ;;  %v436_v30 = vmul.f32 %v1629_v42, %v2289_v35  ;;  %v405_v19 = vmul.f32 %v1568_v43, %v2289_v35  ;;  %v406_v31 = vmul.f32 %v1569_v44, %v2289_v35 }
  0x2f   : > { %v2341_v21 = vrot.slane %v266_v24, %v465_v25  ;;  %v437_v32 = vmul.f32 %v1632_v45, %v2289_v35  ;;  %v438_v22 = vmul.f32 %v1633_v48, %v2289_v35  ;;  %v407_v36 = vmul.f32 %v1572_v49, %v2289_v35 }
  0x30   : > { %v408_v27 = vmul.f32 %v1573_v50, %v2289_v35  ;;  %v439_v25 = vmul.f32 %v2903_v13, %v2289_v35  ;;  %v2904_v37 = vunpack.c.h.bf16 %v2172_v34  ;;  %v409_v39 = vmul.f32 %v2905_v28, %v2289_v35 }
  0x31   : > { %v467_v42 = vadd.f32 %v2341_v21, %v399_v5  ;;  %v468_v43 = vadd.f32 %v2341_v21, %v400_v20  ;;  %v499_v44 = vadd.f32 %v2341_v21, %v431_v57  ;;  %v500_v33 = vadd.f32 %v2341_v21, %v432_v11 }
  0x32   : > { %v440_v38 = vmul.f32 %v2904_v37, %v2289_v35  ;;  %v469_v45 = vadd.f32 %v2341_v21, %v401_v2  ;;  %v470_v48 = vadd.f32 %v2341_v21, %v402_v23  ;;  %v501_v49 = vadd.f32 %v2341_v21, %v433_v15 }
  0x33   : > { %v502_v34 = vadd.f32 %v2341_v21, %v434_v26  ;;  %v531_v50 = vmax.f32 %v467_v42, 0.0  ;;  %v532_v51 = vmax.f32 %v468_v43, 0.0  ;;  %v563_v6 = vmax.f32 %v499_v44, 0.0 }
  0x34   : > { %v564_v24 = vmax.f32 %v500_v33, 0.0  ;;  %v533_v13 = vmax.f32 %v469_v45, 0.0  ;;  %v534_v5 = vmax.f32 %v470_v48, 0.0  ;;  %v565_v37 = vmax.f32 %v501_v49, 0.0 }
  0x35   : > { %v566_v20 = vmax.f32 %v502_v34, 0.0  ;;  %v595_v28 = vpack.c.bf16 %v532_v51, %v531_v50  ;;  %v471_v11 = vadd.f32 %v2341_v21, %v403_v16  ;;  %v472_v2 = vadd.f32 %v2341_v21, %v404_v29 }
  0x36   : > { %v611_v57 = vpack.c.bf16 %v564_v24, %v563_v6  ;;  %v596_v61 = vpack.c.bf16 %v534_v5, %v533_v13  ;;  %v503_v15 = vadd.f32 %v2341_v21, %v435_v18  ;;  %v504_v26 = vadd.f32 %v2341_v21, %v436_v30 }
  0x37   : > { %v612_v23 = vpack.c.bf16 %v566_v20, %v565_v37  ;;  %1769 = vmatprep.mubr.bf16.mxu0 %v595_v28  ;;  %v535_v42 = vmax.f32 %v471_v11, 0.0  ;;  %v536_v43 = vmax.f32 %v472_v2, 0.0  ;;  %v473_v44 = vadd.f32 %v2341_v21, %v405_v19 }
  0x38   : > { %1801 = vmatprep.mubr.bf16.mxu1 %v611_v57  ;;  %v474_v33 = vadd.f32 %v2341_v21, %v406_v31  ;;  %1770 = vmatmul.mubr.bf16.vlgmr.msra.gmra.mrb[0].mxu0 %v596_v61  ;;  %v567_v45 = vmax.f32 %v503_v15, 0.0  ;;  %v568_v16 = vmax.f32 %v504_v26, 0.0  ;;  %v505_v29 = vadd.f32 %v2341_v21, %v437_v32 }
  0x39   : > { %1802 = vmatmul.mubr.bf16.vlgmr.msra.gmra.mrb[0].mxu1 %v612_v23  ;;  %v506_v48 = vadd.f32 %v2341_v21, %v438_v22  ;;  %v597_v49 = vpack.c.bf16 %v536_v43, %v535_v42  ;;  %v537_v18 = vmax.f32 %v473_v44, 0.0  ;;  %v475_v30 = vadd.f32 %v2341_v21, %v407_v36 }
  0x3a   : > { %v538_v34 = vmax.f32 %v474_v33, 0.0  ;;  %v613_v50 = vpack.c.bf16 %v568_v16, %v567_v45  ;;  %v569_v51 = vmax.f32 %v505_v29, 0.0  ;;  %v476_v19 = vadd.f32 %v2341_v21, %v408_v27 }
  0x3b   : > { %v570_v6 = vmax.f32 %v506_v48, 0.0  ;;  %1773 = vmatprep.mubr.bf16.mxu0 %v597_v49  ;;  %v539_v61 = vmax.f32 %v475_v30, 0.0  ;;  %v507_v24 = vadd.f32 %v2341_v21, %v439_v25  ;;  %v508_v13 = vadd.f32 %v2341_v21, %v440_v38 }
  0x3c   : > { %v598_v31 = vpack.c.bf16 %v538_v34, %v537_v18  ;;  %1805 = vmatprep.mubr.bf16.mxu1 %v613_v50  ;;  %v540_v22 = vmax.f32 %v476_v19, 0.0  ;;  %v2906_v5 = vunpack.c.h.bf16 %v2182_v40  ;;  %v477_v36 = vadd.f32 %v2341_v21, %v409_v39 }
  0x3d   : > { %v614_v32 = vpack.c.bf16 %v570_v6, %v569_v51  ;;  %v571_v20 = vmax.f32 %v507_v24, 0.0  ;;  %v572_v28 = vmax.f32 %v508_v13, 0.0  ;;  %v2907_v27 = vunpack.c.l.bf16 %v2185_v41 }
  0x3e   : > { %v410_v37 = vmul.f32 %v2906_v5, %v2289_v35  ;;  %v2908_v25 = vunpack.c.h.bf16 %v2185_v41  ;;  %v599_v38 = vpack.c.bf16 %v540_v22, %v539_v61  ;;  %v541_v23 = vmax.f32 %v477_v36, 0.0 }
  0x3f   : > { %v441_v57 = vmul.f32 %v2907_v27, %v2289_v35  ;;  %v2909_v40 = vunpack.c.l.bf16 %v2192_v46  ;;  %v615_v26 = vpack.c.bf16 %v572_v28, %v571_v20  ;;  %v2910_v43 = vunpack.c.h.bf16 %v2192_v46 }
  0x40   : > { %v442_v11 = vmul.f32 %v2908_v25, %v2289_v35  ;;  %v478_v2 = vadd.f32 %v2341_v21, %v410_v37  ;;  %1774 = vmatmul.mubr.bf16.gmra.mrb[4].mxu0 %v598_v31  ;;  %v2911_v45 = vunpack.c.l.bf16 %v2195_v47  ;;  %v2912_v29 = vunpack.c.h.bf16 %v2195_v47 }
  0x41   : > { %v411_v15 = vmul.f32 %v2909_v40, %v2289_v35  ;;  %v509_v39 = vadd.f32 %v2341_v21, %v441_v57  ;;  %v412_v44 = vmul.f32 %v2910_v43, %v2289_v35  ;;  %1806 = vmatmul.mubr.bf16.gmra.mrb[4].mxu1 %v614_v32  ;;  %1777 = vmatprep.mubr.bf16.mxu0 %v599_v38  ;;  %v2913_v34 = vunpack.c.l.bf16 %v2202_v52 }
  0x42   : > { %v510_v42 = vadd.f32 %v2341_v21, %v442_v11  ;;  %v542_v41 = vmax.f32 %v478_v2, 0.0  ;;  %v443_v16 = vmul.f32 %v2911_v45, %v2289_v35  ;;  %v444_v48 = vmul.f32 %v2912_v29, %v2289_v35  ;;  %1809 = vmatprep.mubr.bf16.mxu1 %v615_v26 }
  0x43   : > { %v479_v33 = vadd.f32 %v2341_v21, %v411_v15  ;;  %v573_v49 = vmax.f32 %v509_v39, 0.0  ;;  %v480_v46 = vadd.f32 %v2341_v21, %v412_v44  ;;  %v413_v30 = vmul.f32 %v2913_v34, %v2289_v35 }
  0x44   : > { %v574_v18 = vmax.f32 %v510_v42, 0.0  ;;  %v600_v50 = vpack.c.bf16 %v542_v41, %v541_v23  ;;  %v511_v6 = vadd.f32 %v2341_v21, %v443_v16  ;;  %v512_v19 = vadd.f32 %v2341_v21, %v444_v48 }
  0x45   : > { %v543_v51 = vmax.f32 %v479_v33, 0.0  ;;  %v544_v61 = vmax.f32 %v480_v46, 0.0  ;;  %v2914_v47 = vunpack.c.h.bf16 %v2202_v52  ;;  %v481_v13 = vadd.f32 %v2341_v21, %v413_v30 }
  0x46   : > { %v616_v31 = vpack.c.bf16 %v574_v18, %v573_v49  ;;  %v575_v32 = vmax.f32 %v511_v6, 0.0  ;;  %v576_v22 = vmax.f32 %v512_v19, 0.0  ;;  %v2915_v5 = vunpack.c.l.bf16 %v2205_v53 }
  0x47   : > { %v414_v24 = vmul.f32 %v2914_v47, %v2289_v35  ;;  %v2916_v36 = vunpack.c.h.bf16 %v2205_v53  ;;  %v601_v28 = vpack.c.bf16 %v544_v61, %v543_v51  ;;  %v545_v57 = vmax.f32 %v481_v13, 0.0 }
  0x48   : > { %v445_v37 = vmul.f32 %v2915_v5, %v2289_v35  ;;  %v2917_v52 = vunpack.c.l.bf16 %v2212_v58  ;;  %v617_v11 = vpack.c.bf16 %v576_v22, %v575_v32  ;;  %v2918_v23 = vunpack.c.h.bf16 %v2212_v58  ;;  %1778 = vmatmul.mubr.bf16.gmra.mrb[8].mxu0 %v600_v50 }
  0x49   : > { %v446_v20 = vmul.f32 %v2916_v36, %v2289_v35  ;;  %v482_v27 = vadd.f32 %v2341_v21, %v414_v24  ;;  %v2919_v26 = vunpack.c.l.bf16 %v2215_v59  ;;  %v2920_v42 = vunpack.c.h.bf16 %v2215_v59  ;;  %1810 = vmatmul.mubr.bf16.gmra.mrb[8].mxu1 %v616_v31  ;;  %1781 = vmatprep.mubr.bf16.mxu0 %v601_v28 }
  0x4a   : > { %v415_v25 = vmul.f32 %v2917_v52, %v2289_v35  ;;  %v513_v38 = vadd.f32 %v2341_v21, %v445_v37  ;;  %v416_v40 = vmul.f32 %v2918_v23, %v2289_v35  ;;  %v2921_v58 = vunpack.c.l.bf16 %v2222_v0  ;;  %1813 = vmatprep.mubr.bf16.mxu1 %v617_v11  ;;  %v2475_v11 = vld [vmem:[%s2128_s27 + $0x78] sm:$0xff]  }
  0x4b   : > { %v514_v2 = vadd.f32 %v2341_v21, %v446_v20  ;;  %v546_v15 = vmax.f32 %v482_v27, 0.0  ;;  %v447_v39 = vmul.f32 %v2919_v26, %v2289_v35  ;;  %v448_v43 = vmul.f32 %v2920_v42, %v2289_v35 }
  0x4c   : > { %v483_v53 = vadd.f32 %v2341_v21, %v415_v25  ;;  %v577_v44 = vmax.f32 %v513_v38, 0.0  ;;  %v484_v33 = vadd.f32 %v2341_v21, %v416_v40  ;;  %v417_v45 = vmul.f32 %v2921_v58, %v2289_v35 }
  0x4d   : > { %v578_v41 = vmax.f32 %v514_v2, 0.0  ;;  %v602_v16 = vpack.c.bf16 %v546_v15, %v545_v57  ;;  %v515_v48 = vadd.f32 %v2341_v21, %v447_v39  ;;  %v516_v49 = vadd.f32 %v2341_v21, %v448_v43 }
  0x4e   : > { %v547_v29 = vmax.f32 %v483_v53, 0.0  ;;  %v548_v18 = vmax.f32 %v484_v33, 0.0  ;;  %v2922_v46 = vunpack.c.h.bf16 %v2222_v0  ;;  %v485_v30 = vadd.f32 %v2341_v21, %v417_v45 }
  0x4f   : > { %v618_v59 = vpack.c.bf16 %v578_v41, %v577_v44  ;;  %v579_v50 = vmax.f32 %v515_v48, 0.0  ;;  %v580_v51 = vmax.f32 %v516_v49, 0.0  ;;  %v2923_v6 = vunpack.c.l.bf16 %v2225_v1 }
  0x50   : > { %v418_v34 = vmul.f32 %v2922_v46, %v2289_v35  ;;  %v2924_v31 = vunpack.c.h.bf16 %v2225_v1  ;;  %v603_v47 = vpack.c.bf16 %v548_v18, %v547_v29  ;;  %v549_v13 = vmax.f32 %v485_v30, 0.0  ;;  %1782 = vmatmul.mubr.bf16.gmra.mrb[12].mxu0 %v602_v16 }
  0x51   : > { %v449_v19 = vmul.f32 %v2923_v6, %v2289_v35  ;;  %v2925_v0 = vunpack.c.l.bf16 %v2232_v7  ;;  %v619_v22 = vpack.c.bf16 %v580_v51, %v579_v50  ;;  %v2926_v36 = vunpack.c.h.bf16 %v2232_v7  ;;  %1814 = vmatmul.mubr.bf16.gmra.mrb[12].mxu1 %v618_v59 }
  0x52   : > { %v450_v61 = vmul.f32 %v2924_v31, %v2289_v35  ;;  %v486_v24 = vadd.f32 %v2341_v21, %v418_v34  ;;  %v2927_v27 = vunpack.c.l.bf16 %v2239_v12  ;;  %v2928_v52 = vunpack.c.h.bf16 %v2239_v12  ;;  %1785 = vmatprep.mubr.bf16.mxu0 %v603_v47 }
  0x53   : > { %v419_v32 = vmul.f32 %v2925_v0, %v2289_v35  ;;  %v517_v5 = vadd.f32 %v2341_v21, %v449_v19  ;;  %v420_v20 = vmul.f32 %v2926_v36, %v2289_v35  ;;  %v2929_v7 = vunpack.c.l.bf16 %v2242_v14  ;;  %1817 = vmatprep.mubr.bf16.mxu1 %v619_v22 }
  0x54   : > { %v518_v37 = vadd.f32 %v2341_v21, %v450_v61  ;;  %v550_v28 = vmax.f32 %v486_v24, 0.0  ;;  %v451_v57 = vmul.f32 %v2927_v27, %v2289_v35  ;;  %v452_v25 = vmul.f32 %v2928_v52, %v2289_v35 }
  0x55   : > { %v487_v1 = vadd.f32 %v2341_v21, %v419_v32  ;;  %v581_v38 = vmax.f32 %v517_v5, 0.0  ;;  %v488_v23 = vadd.f32 %v2341_v21, %v420_v20  ;;  %v421_v40 = vmul.f32 %v2929_v7, %v2289_v35  ;;  %v1712_v20 = vld [vmem:[%s2128_s27 + $0xf8] sm:$0xff]  }
  0x56   : > { %v582_v2 = vmax.f32 %v518_v37, 0.0  ;;  %v519_v53 = vadd.f32 %v2341_v21, %v451_v57  ;;  %v520_v26 = vadd.f32 %v2341_v21, %v452_v25  ;;  %v1677_v12 = vunpack.c.h.bf16 %v2280_v55 }
  0x57   : > { %v551_v15 = vmax.f32 %v487_v1, 0.0  ;;  %v552_v39 = vmax.f32 %v488_v23, 0.0  ;;  %v2930_v42 = vunpack.c.h.bf16 %v2242_v14  ;;  %v489_v44 = vadd.f32 %v2341_v21, %v421_v40 }
  0x58   : > { %v1616_v41 = vunpack.c.l.bf16 %v2475_v11  ;;  %v583_v33 = vmax.f32 %v519_v53, 0.0  ;;  %v584_v58 = vmax.f32 %v520_v26, 0.0  ;;  %v2931_v45 = vunpack.c.l.bf16 %v2252_v4 }
  0x59   : > { %v422_v43 = vmul.f32 %v2930_v42, %v2289_v35  ;;  %v2932_v29 = vunpack.c.h.bf16 %v2252_v4  ;;  %v604_v49 = vpack.c.bf16 %v550_v28, %v549_v13  ;;  %v620_v59 = vpack.c.bf16 %v582_v2, %v581_v38 }
  0x5a   : > { %v453_v16 = vmul.f32 %v2931_v45, %v2289_v35  ;;  %v2933_v14 = vunpack.c.l.bf16 %v2255_v3  ;;  %v605_v34 = vpack.c.bf16 %v552_v39, %v551_v15  ;;  %v2934_v51 = vunpack.c.h.bf16 %v2255_v3 }
  0x5b   : > { %v454_v48 = vmul.f32 %v2932_v29, %v2289_v35  ;;  %v490_v18 = vadd.f32 %v2341_v21, %v422_v43  ;;  %v621_v4 = vpack.c.bf16 %v584_v58, %v583_v33  ;;  %v2935_v31 = vunpack.c.l.bf16 %v2261_v62  ;;  %1786 = vmatmul.mubr.bf16.gmra.mrb[16].mxu0 %v604_v49  ;;  %1818 = vmatmul.mubr.bf16.gmra.mrb[16].mxu1 %v620_v59 }
  0x5c   : > { %v423_v46 = vmul.f32 %v2933_v14, %v2289_v35  ;;  %v521_v30 = vadd.f32 %v2341_v21, %v453_v16  ;;  %v424_v6 = vmul.f32 %v2934_v51, %v2289_v35  ;;  %v2936_v47 = vunpack.c.h.bf16 %v2261_v62  ;;  %1789 = vmatprep.mubr.bf16.mxu0 %v605_v34 }
  0x5d   : > { %v522_v50 = vadd.f32 %v2341_v21, %v454_v48  ;;  %v455_v61 = vmul.f32 %v2935_v31, %v2289_v35  ;;  %v553_v13 = vmax.f32 %v489_v44, 0.0  ;;  %v425_v32 = vmul.f32 %v1608_v60, %v2289_v35  ;;  %1821 = vmatprep.mubr.bf16.mxu1 %v621_v4 }
  0x5e   : > { %v491_v19 = vadd.f32 %v2341_v21, %v423_v46  ;;  %v456_v24 = vmul.f32 %v2936_v47, %v2289_v35  ;;  %v492_v0 = vadd.f32 %v2341_v21, %v424_v6  ;;  %v1617_v3 = vunpack.c.h.bf16 %v2475_v11 }
  0x5f   : > { %v554_v22 = vmax.f32 %v490_v18, 0.0  ;;  %v585_v5 = vmax.f32 %v521_v30, 0.0  ;;  %v523_v37 = vadd.f32 %v2341_v21, %v455_v61  ;;  %v586_v62 = vmax.f32 %v522_v50, 0.0 }
  0x60   : > { %v524_v36 = vadd.f32 %v2341_v21, %v456_v24  ;;  %v555_v28 = vmax.f32 %v491_v19, 0.0  ;;  %v556_v1 = vmax.f32 %v492_v0, 0.0  ;;  %v426_v27 = vmul.f32 %v1609_v8, %v2289_v35 }
  0x61   : > { %v587_v60 = vmax.f32 %v523_v37, 0.0  ;;  %v457_v52 = vmul.f32 %v1672_v63, %v2289_v35  ;;  %v458_v25 = vmul.f32 %v1673_v54, %v2289_v35  ;;  %v493_v11 = vadd.f32 %v2341_v21, %v425_v32 }
  0x62   : > { %v588_v57 = vmax.f32 %v524_v36, 0.0  ;;  %v2937_v38 = vunpack.c.l.bf16 %v2277_v56  ;;  %v1680_v10 = vunpack.c.l.bf16 %v1712_v20  ;;  %v1681_v8 = vunpack.c.h.bf16 %v1712_v20 }
  0x63   : > { %v494_v23 = vadd.f32 %v2341_v21, %v426_v27  ;;  %v525_v7 = vadd.f32 %v2341_v21, %v457_v52  ;;  %v526_v40 = vadd.f32 %v2341_v21, %v458_v25  ;;  %v428_v63 = vmul.f32 %v1613_v9, %v2289_v35 }
  0x64   : > { %v427_v2 = vmul.f32 %v2937_v38, %v2289_v35  ;;  %v606_v17 = vpack.c.bf16 %v554_v22, %v553_v13  ;;  %v622_v54 = vpack.c.bf16 %v586_v62, %v585_v5  ;;  %v2938_v15 = vunpack.c.l.bf16 %v2280_v55 }
  0x65   : > { %v460_v26 = vmul.f32 %v1677_v12, %v2289_v35  ;;  %v607_v39 = vpack.c.bf16 %v556_v1, %v555_v28  ;;  %v623_v42 = vpack.c.bf16 %v588_v57, %v587_v60  ;;  %v496_v44 = vadd.f32 %v2341_v21, %v428_v63 }
  0x66   : > { %v459_v53 = vmul.f32 %v2938_v15, %v2289_v35  ;;  %v495_v43 = vadd.f32 %v2341_v21, %v427_v2  ;;  %v557_v33 = vmax.f32 %v493_v11, 0.0  ;;  %v558_v9 = vmax.f32 %v494_v23, 0.0  ;;  %1790 = vmatmul.mubr.bf16.gmra.mrb[20].mxu0 %v606_v17  ;;  %1822 = vmatmul.mubr.bf16.gmra.mrb[20].mxu1 %v622_v54 }
  0x67   : > { %v528_v56 = vadd.f32 %v2341_v21, %v460_v26  ;;  %v589_v45 = vmax.f32 %v525_v7, 0.0  ;;  %v590_v16 = vmax.f32 %v526_v40, 0.0  ;;  %v429_v29 = vmul.f32 %v1616_v41, %v2289_v35  ;;  %1793 = vmatprep.mubr.bf16.mxu0 %v607_v39  ;;  %1825 = vmatprep.mubr.bf16.mxu1 %v623_v42 }
  0x68   : > { %v527_v58 = vadd.f32 %v2341_v21, %v459_v53  ;;  %v430_v55 = vmul.f32 %v1617_v3, %v2289_v35  ;;  %v461_v12 = vmul.f32 %v1680_v10, %v2289_v35  ;;  %v462_v48 = vmul.f32 %v1681_v8, %v2289_v35 }
  0x69   : > { %v559_v49 = vmax.f32 %v495_v43, 0.0  ;;  %v560_v59 = vmax.f32 %v496_v44, 0.0  ;;  %v592_v14 = vmax.f32 %v528_v56, 0.0  ;;  %v608_v46 = vpack.c.bf16 %v558_v9, %v557_v33 }
  0x6a   : > { %v591_v18 = vmax.f32 %v527_v58, 0.0  ;;  %v624_v34 = vpack.c.bf16 %v590_v16, %v589_v45  ;;  %v497_v30 = vadd.f32 %v2341_v21, %v429_v29  ;;  %v498_v41 = vadd.f32 %v2341_v21, %v430_v55 }
  0x6b   : > { %v529_v50 = vadd.f32 %v2341_v21, %v461_v12  ;;  %v530_v51 = vadd.f32 %v2341_v21, %v462_v48  ;;  %v609_v6 = vpack.c.bf16 %v560_v59, %v559_v49  ;;  %v2558_v21 = vld [vmem:[%s2900_s4] ss:$0 sm:$0xff] }
  0x6c   : > { %v625_v4 = vpack.c.bf16 %v592_v14, %v591_v18  ;;  %v561_v35 = vmax.f32 %v497_v30, 0.0  ;;  %v562_v19 = vmax.f32 %v498_v41, 0.0 }
  0x6d   : > { %v593_v31 = vmax.f32 %v529_v50, 0.0  ;;  %v594_v61 = vmax.f32 %v530_v51, 0.0 }
  0x6e   : > { %1794 = vmatmul.mubr.bf16.gmra.mrb[24].mxu0 %v608_v46  ;;  %1826 = vmatmul.mubr.bf16.gmra.mrb[24].mxu1 %v624_v34  ;;  %v610_v47 = vpack.c.bf16 %v562_v19, %v561_v35 }
  0x6f   : > { %1797 = vmatprep.mubr.bf16.mxu0 %v609_v6  ;;  %1829 = vmatprep.mubr.bf16.mxu1 %v625_v4  ;;  %v626_v24 = vpack.c.bf16 %v594_v61, %v593_v31 }
  0x76   : > { %1798 = vmatmul.mubr.bf16.gmra.mrb[28].mxu0 %v610_v47  ;;  %1830 = vmatmul.mubr.bf16.gmra.mrb[28].mxu1 %v626_v24 }
 0x10b   : > { %v1771_v13 = vpop.f32.mrb[0].mxu0 }
 0x10c   : > { %v1803_v0 = vpop.f32.mrb[0].mxu1  ;;  %v741_v32 = vadd.f32 %v1771_v13, %v2558_v21  ;;  %v732_v22 = vpop.f32.mrb[1].mxu0 }
 0x10d   : > { %v869_v3 = vadd.f32 %v1803_v0, %v2558_v21  ;;  %v860_v5 = vpop.f32.mrb[1].mxu1  ;;  %v733_v37 = vadd.f32 %v2558_v21, %v732_v22  ;;  %v1772_v20 = vpop.f32.mrb[2].mxu0 }
 0x10e   : > { %v861_v36 = vadd.f32 %v2558_v21, %v860_v5  ;;  %v1804_v62 = vpop.f32.mrb[2].mxu1  ;;  %989 = vst [vmem:[%s2564_s18 + $0x10] sm:$0xff] %v741_v32  ;;  %v744_v28 = vadd.f32 %v1772_v20, %v2558_v21  ;;  %v735_v27 = vpop.f32.mrb[3].mxu0 }
 0x10f   : > { %1021 = vst [vmem:[%s2564_s18 + $0x110] sm:$0xff] %v869_v3  ;;  %v872_v1 = vadd.f32 %v1804_v62, %v2558_v21  ;;  %v863_v60 = vpop.f32.mrb[3].mxu1  ;;  %987 = vst [vmem:[%s2564_s18] sm:$0xff] %v733_v37  ;;  %v736_v57 = vadd.f32 %v2558_v21, %v735_v27 }
 0x110   : > { %1019 = vst [vmem:[%s2564_s18 + $0x100] sm:$0xff] %v861_v36  ;;  %v864_v52 = vadd.f32 %v2558_v21, %v863_v60  ;;  %990 = vst [vmem:[%s2564_s18 + $0x18] sm:$0xff] %v744_v28 }
 0x111   : > { %1022 = vst [vmem:[%s2564_s18 + $0x118] sm:$0xff] %v872_v1  ;;  %988 = vst [vmem:[%s2564_s18 + $0x8] sm:$0xff] %v736_v57 }
 0x112   : > { %1020 = vst [vmem:[%s2564_s18 + $0x108] sm:$0xff] %v864_v52 }
 0x113   : > { %v1775_v25 = vpop.f32.mrb[4].mxu0 }
 0x114   : > { %v1807_v11 = vpop.f32.mrb[4].mxu1  ;;  %v757_v38 = vadd.f32 %v1775_v25, %v2558_v21  ;;  %v748_v10 = vpop.f32.mrb[5].mxu0 }
 0x115   : > { %v885_v2 = vadd.f32 %v1807_v11, %v2558_v21  ;;  %v876_v8 = vpop.f32.mrb[5].mxu1  ;;  %v749_v23 = vadd.f32 %v2558_v21, %v748_v10  ;;  %v1776_v40 = vpop.f32.mrb[6].mxu0 }
 0x116   : > { %v877_v7 = vadd.f32 %v2558_v21, %v876_v8  ;;  %v1808_v63 = vpop.f32.mrb[6].mxu1  ;;  %993 = vst [vmem:[%s2564_s18 + $0x30] sm:$0xff] %v757_v38  ;;  %v760_v17 = vadd.f32 %v1776_v40, %v2558_v21  ;;  %v751_v15 = vpop.f32.mrb[7].mxu0 }
 0x117   : > { %1025 = vst [vmem:[%s2564_s18 + $0x130] sm:$0xff] %v885_v2  ;;  %v888_v54 = vadd.f32 %v1808_v63, %v2558_v21  ;;  %v879_v53 = vpop.f32.mrb[7].mxu1  ;;  %991 = vst [vmem:[%s2564_s18 + $0x20] sm:$0xff] %v749_v23  ;;  %v752_v26 = vadd.f32 %v2558_v21, %v751_v15 }
 0x118   : > { %1023 = vst [vmem:[%s2564_s18 + $0x120] sm:$0xff] %v877_v7  ;;  %v880_v39 = vadd.f32 %v2558_v21, %v879_v53  ;;  %994 = vst [vmem:[%s2564_s18 + $0x38] sm:$0xff] %v760_v17 }
 0x119   : > { %1026 = vst [vmem:[%s2564_s18 + $0x138] sm:$0xff] %v888_v54  ;;  %992 = vst [vmem:[%s2564_s18 + $0x28] sm:$0xff] %v752_v26 }
 0x11a   : > { %1024 = vst [vmem:[%s2564_s18 + $0x128] sm:$0xff] %v880_v39 }
 0x11b   : > { %v1779_v42 = vpop.f32.mrb[8].mxu0 }
 0x11c   : > { %v1811_v43 = vpop.f32.mrb[8].mxu1  ;;  %v773_v44 = vadd.f32 %v1779_v42, %v2558_v21  ;;  %v764_v58 = vpop.f32.mrb[9].mxu0 }
 0x11d   : > { %v901_v33 = vadd.f32 %v1811_v43, %v2558_v21  ;;  %v892_v56 = vpop.f32.mrb[9].mxu1  ;;  %v765_v9 = vadd.f32 %v2558_v21, %v764_v58  ;;  %v1780_v16 = vpop.f32.mrb[10].mxu0 }
 0x11e   : > { %v893_v45 = vadd.f32 %v2558_v21, %v892_v56  ;;  %v1812_v29 = vpop.f32.mrb[10].mxu1  ;;  %997 = vst [vmem:[%s2564_s18 + $0x50] sm:$0xff] %v773_v44  ;;  %v776_v55 = vadd.f32 %v1780_v16, %v2558_v21  ;;  %v767_v48 = vpop.f32.mrb[11].mxu0 }
 0x11f   : > { %1029 = vst [vmem:[%s2564_s18 + $0x150] sm:$0xff] %v901_v33  ;;  %v904_v12 = vadd.f32 %v1812_v29, %v2558_v21  ;;  %v895_v49 = vpop.f32.mrb[11].mxu1  ;;  %995 = vst [vmem:[%s2564_s18 + $0x40] sm:$0xff] %v765_v9  ;;  %v768_v59 = vadd.f32 %v2558_v21, %v767_v48 }
 0x120   : > { %1027 = vst [vmem:[%s2564_s18 + $0x140] sm:$0xff] %v893_v45  ;;  %v896_v18 = vadd.f32 %v2558_v21, %v895_v49  ;;  %998 = vst [vmem:[%s2564_s18 + $0x58] sm:$0xff] %v776_v55 }
 0x121   : > { %1030 = vst [vmem:[%s2564_s18 + $0x158] sm:$0xff] %v904_v12  ;;  %996 = vst [vmem:[%s2564_s18 + $0x48] sm:$0xff] %v768_v59 }
 0x122   : > { %1028 = vst [vmem:[%s2564_s18 + $0x148] sm:$0xff] %v896_v18 }
 0x123   : > { %v1783_v14 = vpop.f32.mrb[12].mxu0 }
 0x124   : > { %v1815_v46 = vpop.f32.mrb[12].mxu1  ;;  %v789_v34 = vadd.f32 %v1783_v14, %v2558_v21  ;;  %v780_v41 = vpop.f32.mrb[13].mxu0 }
 0x125   : > { %v917_v30 = vadd.f32 %v1815_v46, %v2558_v21  ;;  %v908_v50 = vpop.f32.mrb[13].mxu1  ;;  %v781_v51 = vadd.f32 %v2558_v21, %v780_v41  ;;  %v1784_v4 = vpop.f32.mrb[14].mxu0 }
 0x126   : > { %v909_v6 = vadd.f32 %v2558_v21, %v908_v50  ;;  %v1816_v35 = vpop.f32.mrb[14].mxu1  ;;  %1001 = vst [vmem:[%s2564_s18 + $0x70] sm:$0xff] %v789_v34  ;;  %v792_v19 = vadd.f32 %v1784_v4, %v2558_v21  ;;  %v783_v61 = vpop.f32.mrb[15].mxu0 }
 0x127   : > { %1033 = vst [vmem:[%s2564_s18 + $0x170] sm:$0xff] %v917_v30  ;;  %v920_v31 = vadd.f32 %v1816_v35, %v2558_v21  ;;  %v911_v47 = vpop.f32.mrb[15].mxu1  ;;  %999 = vst [vmem:[%s2564_s18 + $0x60] sm:$0xff] %v781_v51  ;;  %v784_v24 = vadd.f32 %v2558_v21, %v783_v61 }
 0x128   : > { %1031 = vst [vmem:[%s2564_s18 + $0x160] sm:$0xff] %v909_v6  ;;  %v912_v13 = vadd.f32 %v2558_v21, %v911_v47  ;;  %1002 = vst [vmem:[%s2564_s18 + $0x78] sm:$0xff] %v792_v19 }
 0x129   : > { %1034 = vst [vmem:[%s2564_s18 + $0x178] sm:$0xff] %v920_v31  ;;  %1000 = vst [vmem:[%s2564_s18 + $0x68] sm:$0xff] %v784_v24 }
 0x12a   : > { %1032 = vst [vmem:[%s2564_s18 + $0x168] sm:$0xff] %v912_v13 }
 0x12e   : > { %v1787_v0 = vpop.f32.mrb[16].mxu0  ;;  %v1819_v32 = vpop.f32.mrb[16].mxu1 }
 0x12f   : > { %v805_v3 = vadd.f32 %v1787_v0, %v2558_v21  ;;  %v933_v22 = vadd.f32 %v1819_v32, %v2558_v21  ;;  %v796_v5 = vpop.f32.mrb[17].mxu0  ;;  %v924_v37 = vpop.f32.mrb[17].mxu1 }
 0x130   : > { %v797_v36 = vadd.f32 %v2558_v21, %v796_v5  ;;  %v925_v20 = vadd.f32 %v2558_v21, %v924_v37  ;;  %v1788_v62 = vpop.f32.mrb[18].mxu0  ;;  %v1820_v28 = vpop.f32.mrb[18].mxu1 }
 0x131   : > { %1005 = vst [vmem:[%s2564_s18 + $0x90] sm:$0xff] %v805_v3  ;;  %1037 = vst [vmem:[%s2564_s18 + $0x190] sm:$0xff] %v933_v22  ;;  %v808_v1 = vadd.f32 %v1788_v62, %v2558_v21  ;;  %v936_v27 = vadd.f32 %v1820_v28, %v2558_v21  ;;  %v799_v60 = vpop.f32.mrb[19].mxu0  ;;  %v927_v57 = vpop.f32.mrb[19].mxu1 }
 0x132   : > { %1003 = vst [vmem:[%s2564_s18 + $0x80] sm:$0xff] %v797_v36  ;;  %1035 = vst [vmem:[%s2564_s18 + $0x180] sm:$0xff] %v925_v20  ;;  %v800_v52 = vadd.f32 %v2558_v21, %v799_v60  ;;  %v928_v25 = vadd.f32 %v2558_v21, %v927_v57 }
 0x133   : > { %1006 = vst [vmem:[%s2564_s18 + $0x98] sm:$0xff] %v808_v1  ;;  %1038 = vst [vmem:[%s2564_s18 + $0x198] sm:$0xff] %v936_v27 }
 0x134   : > { %1004 = vst [vmem:[%s2564_s18 + $0x88] sm:$0xff] %v800_v52  ;;  %1036 = vst [vmem:[%s2564_s18 + $0x188] sm:$0xff] %v928_v25 }
 0x139   : > { %v1791_v11 = vpop.f32.mrb[20].mxu0  ;;  %v1823_v38 = vpop.f32.mrb[20].mxu1 }
 0x13a   : > { %v821_v2 = vadd.f32 %v1791_v11, %v2558_v21  ;;  %v949_v10 = vadd.f32 %v1823_v38, %v2558_v21  ;;  %v812_v8 = vpop.f32.mrb[21].mxu0  ;;  %v940_v23 = vpop.f32.mrb[21].mxu1 }
 0x13b   : > { %v813_v7 = vadd.f32 %v2558_v21, %v812_v8  ;;  %v941_v40 = vadd.f32 %v2558_v21, %v940_v23  ;;  %v1792_v63 = vpop.f32.mrb[22].mxu0  ;;  %v1824_v17 = vpop.f32.mrb[22].mxu1 }
 0x13c   : > { %1009 = vst [vmem:[%s2564_s18 + $0xb0] sm:$0xff] %v821_v2  ;;  %1041 = vst [vmem:[%s2564_s18 + $0x1b0] sm:$0xff] %v949_v10  ;;  %v824_v54 = vadd.f32 %v1792_v63, %v2558_v21  ;;  %v952_v15 = vadd.f32 %v1824_v17, %v2558_v21  ;;  %v815_v53 = vpop.f32.mrb[23].mxu0  ;;  %v943_v26 = vpop.f32.mrb[23].mxu1 }
 0x13d   : > { %1007 = vst [vmem:[%s2564_s18 + $0xa0] sm:$0xff] %v813_v7  ;;  %1039 = vst [vmem:[%s2564_s18 + $0x1a0] sm:$0xff] %v941_v40  ;;  %v816_v39 = vadd.f32 %v2558_v21, %v815_v53  ;;  %v944_v42 = vadd.f32 %v2558_v21, %v943_v26 }
 0x13e   : > { %1010 = vst [vmem:[%s2564_s18 + $0xb8] sm:$0xff] %v824_v54  ;;  %1042 = vst [vmem:[%s2564_s18 + $0x1b8] sm:$0xff] %v952_v15 }
 0x13f   : > { %1008 = vst [vmem:[%s2564_s18 + $0xa8] sm:$0xff] %v816_v39  ;;  %1040 = vst [vmem:[%s2564_s18 + $0x1a8] sm:$0xff] %v944_v42 }
 0x141   : > { %v1795_v43 = vpop.f32.mrb[24].mxu0  ;;  %v1827_v44 = vpop.f32.mrb[24].mxu1 }
 0x142   : > { %v837_v33 = vadd.f32 %v1795_v43, %v2558_v21  ;;  %v965_v58 = vadd.f32 %v1827_v44, %v2558_v21  ;;  %v828_v56 = vpop.f32.mrb[25].mxu0  ;;  %v956_v9 = vpop.f32.mrb[25].mxu1 }
 0x143   : > { %v829_v45 = vadd.f32 %v2558_v21, %v828_v56  ;;  %v957_v16 = vadd.f32 %v2558_v21, %v956_v9  ;;  %v1796_v29 = vpop.f32.mrb[26].mxu0  ;;  %v1828_v55 = vpop.f32.mrb[26].mxu1 }
 0x144   : > { %1013 = vst [vmem:[%s2564_s18 + $0xd0] sm:$0xff] %v837_v33  ;;  %1045 = vst [vmem:[%s2564_s18 + $0x1d0] sm:$0xff] %v965_v58  ;;  %v840_v12 = vadd.f32 %v1796_v29, %v2558_v21  ;;  %v968_v48 = vadd.f32 %v1828_v55, %v2558_v21  ;;  %v831_v49 = vpop.f32.mrb[27].mxu0  ;;  %v959_v59 = vpop.f32.mrb[27].mxu1 }
 0x145   : > { %1011 = vst [vmem:[%s2564_s18 + $0xc0] sm:$0xff] %v829_v45  ;;  %1043 = vst [vmem:[%s2564_s18 + $0x1c0] sm:$0xff] %v957_v16  ;;  %v832_v18 = vadd.f32 %v2558_v21, %v831_v49  ;;  %v960_v14 = vadd.f32 %v2558_v21, %v959_v59 }
 0x146   : > { %1014 = vst [vmem:[%s2564_s18 + $0xd8] sm:$0xff] %v840_v12  ;;  %1046 = vst [vmem:[%s2564_s18 + $0x1d8] sm:$0xff] %v968_v48 }
 0x147   : > { %1012 = vst [vmem:[%s2564_s18 + $0xc8] sm:$0xff] %v832_v18  ;;  %1044 = vst [vmem:[%s2564_s18 + $0x1c8] sm:$0xff] %v960_v14 }
 0x149   : > { %v1799_v46 = vpop.f32.mrb[28].mxu0  ;;  %v1831_v34 = vpop.f32.mrb[28].mxu1  ;;  %1057 = sbr.rel (!%p2090_p4) target bundleno = 408 (0x198), region = 44 }
 0x14a   : > { %v853_v30 = vadd.f32 %v1799_v46, %v2558_v21  ;;  %v981_v41 = vadd.f32 %v1831_v34, %v2558_v21  ;;  %v844_v50 = vpop.f32.mrb[29].mxu0  ;;  %v972_v51 = vpop.f32.mrb[29].mxu1 }
 0x14b   : > { %v845_v6 = vadd.f32 %v2558_v21, %v844_v50  ;;  %v973_v4 = vadd.f32 %v2558_v21, %v972_v51  ;;  %v1800_v35 = vpop.f32.mrb[30].mxu0  ;;  %v1832_v19 = vpop.f32.mrb[30].mxu1 }
 0x14c   : > { %1017 = vst [vmem:[%s2564_s18 + $0xf0] sm:$0xff] %v853_v30  ;;  %1049 = vst [vmem:[%s2564_s18 + $0x1f0] sm:$0xff] %v981_v41  ;;  %v856_v31 = vadd.f32 %v1800_v35, %v2558_v21  ;;  %v984_v61 = vadd.f32 %v1832_v19, %v2558_v21  ;;  %v847_v47 = vpop.f32.mrb[31].mxu0  ;;  %v975_v24 = vpop.f32.mrb[31].mxu1 }
 0x14d   : > { %1015 = vst [vmem:[%s2564_s18 + $0xe0] sm:$0xff] %v845_v6  ;;  %1047 = vst [vmem:[%s2564_s18 + $0x1e0] sm:$0xff] %v973_v4  ;;  %v848_v13 = vadd.f32 %v2558_v21, %v847_v47  ;;  %v976_v0 = vadd.f32 %v2558_v21, %v975_v24 }
 0x14e   : > { %1018 = vst [vmem:[%s2564_s18 + $0xf8] sm:$0xff] %v856_v31  ;;  %1050 = vst [vmem:[%s2564_s18 + $0x1f8] sm:$0xff] %v984_v61 }
 0x14f   : > { %1016 = vst [vmem:[%s2564_s18 + $0xe8] sm:$0xff] %v848_v13  ;;  %1048 = vst [vmem:[%s2564_s18 + $0x1e8] sm:$0xff] %v976_v0 }
 0x150   : > { %s2948_s14 = smov (!%p1060_p8, %s1059_s14), 64 }
 0x151   : > { %s1536_s23 = sshll.u32 %s2948_s14, 7 }
 0x152   : > { %p1539_p9 = scmp.eq.s32.totalorder %s1536_s23, 0 }
 0x153   : > { %s2703_s24 = sshrl.u32 (!%p1539_p9), %s2948_s14, 6 }
 0x154   : > { %1068 = sbr.rel (%p1539_p9) target bundleno = 408 (0x198), region = 48  ;;  %p1540_p10 = scmp.le.s32.totalorder (!%p1539_p9), %s2703_s24, 0 }
 0x15b   : > { %1474 = sbr.rel (%p1540_p10) target bundleno = 387 (0x183), region = 124  ;;  %s2939_s21 = smov (!%p1540_p10), %s2697_s20 }
 0x15c   : > { %s2940_s26 = smov (!%p1540_p10), %s2564_s18  ;;  %s2712_s6 = smov (!%p1540_p10), 0  }
 0x15d   : > { %s2714_s27 = smov (!%p1540_p10), 0  }
 0x162 LB: >> { %v1256_v21 = vld [vmem:[%s2009_s26] sm:$0xff]  ;;  %v1258_v32 = vld [vmem:[%s2009_s26 + $0x8] sm:$0xff]  ;;  %v1260_v3 = vld [vmem:[%s2009_s26 + $0x10] sm:$0xff]  ;;  %s1384_s28 = sadd.s32 1, %s2013_s6  ;;  %s1250_s27 = sadd.s32 1, %s2017_s27   ;;  %s2017_s27 = sphi %s2714_s27, %s1250_s27   ;;  %s2013_s6 = sphi %s2712_s6, %s2943_s6   ;;  %s2009_s26 = sphi %s2940_s26, %s2942_s26   ;;  %s2005_s21 = sphi %s2939_s21, %s2941_s21  }
 0x163   : >> { %1257 = vst [vmem:[%s2005_s21] sm:$0xff] %v1256_v21  ;;  %1259 = vst [vmem:[%s2005_s21 + $0x8] sm:$0xff] %v1258_v32  ;;  %v1262_v22 = vld [vmem:[%s2009_s26 + $0x18] sm:$0xff]  ;;  %v1264_v5 = vld [vmem:[%s2009_s26 + $0x20] sm:$0xff]  ;;  %p1385_p11 = scmp.ge.s32.totalorder %s1384_s28, %s2703_s24  ;;  %p1249_p12 = scmp.ge.s32.totalorder %s1250_s27, %s2703_s24 }
 0x164   : >> { %1261 = vst [vmem:[%s2005_s21 + $0x10] sm:$0xff] %v1260_v3  ;;  %v1266_v37 = vld [vmem:[%s2009_s26 + $0x28] sm:$0xff]  ;;  %1263 = vst [vmem:[%s2005_s21 + $0x18] sm:$0xff] %v1262_v22  ;;  %v1268_v36 = vld [vmem:[%s2009_s26 + $0x30] sm:$0xff] }
 0x165   : >> { %1265 = vst [vmem:[%s2005_s21 + $0x20] sm:$0xff] %v1264_v5  ;;  %1267 = vst [vmem:[%s2005_s21 + $0x28] sm:$0xff] %v1266_v37  ;;  %v1270_v20 = vld [vmem:[%s2009_s26 + $0x38] sm:$0xff]  ;;  %v1272_v62 = vld [vmem:[%s2009_s26 + $0x40] sm:$0xff]  ;;  %s2950_s28 = smov (%p1385_p11, %s1384_s28), 0 }
 0x166   : >> { %1269 = vst [vmem:[%s2005_s21 + $0x30] sm:$0xff] %v1268_v36  ;;  %1271 = vst [vmem:[%s2005_s21 + $0x38] sm:$0xff] %v1270_v20  ;;  %v1274_v28 = vld [vmem:[%s2009_s26 + $0x48] sm:$0xff]  ;;  %v1276_v1 = vld [vmem:[%s2009_s26 + $0x50] sm:$0xff]  ;;  %s1541_s29 = sshll.u32 %s2950_s28, 9  ;;  %s2943_s6 = smov %s2950_s28 }
 0x167   : >> { %1273 = vst [vmem:[%s2005_s21 + $0x40] sm:$0xff] %v1272_v62  ;;  %v1278_v27 = vld [vmem:[%s2009_s26 + $0x58] sm:$0xff]  ;;  %1275 = vst [vmem:[%s2005_s21 + $0x48] sm:$0xff] %v1274_v28  ;;  %v1280_v60 = vld [vmem:[%s2009_s26 + $0x60] sm:$0xff]  ;;  %s2770_s30 = scalar_lea.vmem %s2564_s18, %s1541_s29 [#allocation2]   ;;  %s2773_s7 = scalar_lea.vmem %s2697_s20, %s1541_s29  }
 0x168   : >> { %1277 = vst [vmem:[%s2005_s21 + $0x50] sm:$0xff] %v1276_v1  ;;  %1279 = vst [vmem:[%s2005_s21 + $0x58] sm:$0xff] %v1278_v27  ;;  %v1282_v57 = vld [vmem:[%s2009_s26 + $0x68] sm:$0xff]  ;;  %v1284_v52 = vld [vmem:[%s2009_s26 + $0x70] sm:$0xff] }
 0x169   : >> { %1281 = vst [vmem:[%s2005_s21 + $0x60] sm:$0xff] %v1280_v60  ;;  %1283 = vst [vmem:[%s2005_s21 + $0x68] sm:$0xff] %v1282_v57  ;;  %v1286_v25 = vld [vmem:[%s2009_s26 + $0x78] sm:$0xff]  ;;  %v1288_v11 = vld [vmem:[%s2009_s26 + $0x80] sm:$0xff] }
 0x16a   : >> { %1285 = vst [vmem:[%s2005_s21 + $0x70] sm:$0xff] %v1284_v52  ;;  %v1290_v38 = vld [vmem:[%s2009_s26 + $0x88] sm:$0xff]  ;;  %1287 = vst [vmem:[%s2005_s21 + $0x78] sm:$0xff] %v1286_v25  ;;  %v1292_v2 = vld [vmem:[%s2009_s26 + $0x90] sm:$0xff] }
 0x16b   : >> { %1289 = vst [vmem:[%s2005_s21 + $0x80] sm:$0xff] %v1288_v11  ;;  %1291 = vst [vmem:[%s2005_s21 + $0x88] sm:$0xff] %v1290_v38  ;;  %v1294_v10 = vld [vmem:[%s2009_s26 + $0x98] sm:$0xff]  ;;  %v1296_v8 = vld [vmem:[%s2009_s26 + $0xa0] sm:$0xff] }
 0x16c   : >> { %1293 = vst [vmem:[%s2005_s21 + $0x90] sm:$0xff] %v1292_v2  ;;  %1295 = vst [vmem:[%s2005_s21 + $0x98] sm:$0xff] %v1294_v10  ;;  %v1298_v23 = vld [vmem:[%s2009_s26 + $0xa8] sm:$0xff]  ;;  %v1300_v7 = vld [vmem:[%s2009_s26 + $0xb0] sm:$0xff] }
 0x16d   : >> { %1297 = vst [vmem:[%s2005_s21 + $0xa0] sm:$0xff] %v1296_v8  ;;  %v1302_v40 = vld [vmem:[%s2009_s26 + $0xb8] sm:$0xff]  ;;  %1299 = vst [vmem:[%s2005_s21 + $0xa8] sm:$0xff] %v1298_v23  ;;  %v1304_v63 = vld [vmem:[%s2009_s26 + $0xc0] sm:$0xff] }
 0x16e   : >> { %1301 = vst [vmem:[%s2005_s21 + $0xb0] sm:$0xff] %v1300_v7  ;;  %1303 = vst [vmem:[%s2005_s21 + $0xb8] sm:$0xff] %v1302_v40  ;;  %v1306_v17 = vld [vmem:[%s2009_s26 + $0xc8] sm:$0xff]  ;;  %v1308_v54 = vld [vmem:[%s2009_s26 + $0xd0] sm:$0xff] }
 0x16f   : >> { %1305 = vst [vmem:[%s2005_s21 + $0xc0] sm:$0xff] %v1304_v63  ;;  %1307 = vst [vmem:[%s2005_s21 + $0xc8] sm:$0xff] %v1306_v17  ;;  %v1310_v15 = vld [vmem:[%s2009_s26 + $0xd8] sm:$0xff]  ;;  %v1312_v53 = vld [vmem:[%s2009_s26 + $0xe0] sm:$0xff] }
 0x170   : >> { %1309 = vst [vmem:[%s2005_s21 + $0xd0] sm:$0xff] %v1308_v54  ;;  %v1314_v26 = vld [vmem:[%s2009_s26 + $0xe8] sm:$0xff]  ;;  %1311 = vst [vmem:[%s2005_s21 + $0xd8] sm:$0xff] %v1310_v15  ;;  %v1316_v39 = vld [vmem:[%s2009_s26 + $0xf0] sm:$0xff] }
 0x171   : >> { %1313 = vst [vmem:[%s2005_s21 + $0xe0] sm:$0xff] %v1312_v53  ;;  %1315 = vst [vmem:[%s2005_s21 + $0xe8] sm:$0xff] %v1314_v26  ;;  %v1318_v42 = vld [vmem:[%s2009_s26 + $0xf8] sm:$0xff]  ;;  %v1320_v43 = vld [vmem:[%s2009_s26 + $0x100] sm:$0xff] }
 0x172   : >> { %1317 = vst [vmem:[%s2005_s21 + $0xf0] sm:$0xff] %v1316_v39  ;;  %1319 = vst [vmem:[%s2005_s21 + $0xf8] sm:$0xff] %v1318_v42  ;;  %v1322_v44 = vld [vmem:[%s2009_s26 + $0x108] sm:$0xff]  ;;  %v1324_v33 = vld [vmem:[%s2009_s26 + $0x110] sm:$0xff] }
 0x173   : >> { %1321 = vst [vmem:[%s2005_s21 + $0x100] sm:$0xff] %v1320_v43  ;;  %v1326_v58 = vld [vmem:[%s2009_s26 + $0x118] sm:$0xff]  ;;  %1323 = vst [vmem:[%s2005_s21 + $0x108] sm:$0xff] %v1322_v44  ;;  %v1328_v56 = vld [vmem:[%s2009_s26 + $0x120] sm:$0xff] }
 0x174   : >> { %1325 = vst [vmem:[%s2005_s21 + $0x110] sm:$0xff] %v1324_v33  ;;  %1327 = vst [vmem:[%s2005_s21 + $0x118] sm:$0xff] %v1326_v58  ;;  %v1330_v9 = vld [vmem:[%s2009_s26 + $0x128] sm:$0xff]  ;;  %v1332_v45 = vld [vmem:[%s2009_s26 + $0x130] sm:$0xff] }
 0x175   : >> { %1329 = vst [vmem:[%s2005_s21 + $0x120] sm:$0xff] %v1328_v56  ;;  %1331 = vst [vmem:[%s2005_s21 + $0x128] sm:$0xff] %v1330_v9  ;;  %v1334_v16 = vld [vmem:[%s2009_s26 + $0x138] sm:$0xff]  ;;  %v1336_v29 = vld [vmem:[%s2009_s26 + $0x140] sm:$0xff] }
 0x176   : >> { %1333 = vst [vmem:[%s2005_s21 + $0x130] sm:$0xff] %v1332_v45  ;;  %v1338_v55 = vld [vmem:[%s2009_s26 + $0x148] sm:$0xff]  ;;  %1335 = vst [vmem:[%s2005_s21 + $0x138] sm:$0xff] %v1334_v16  ;;  %v1340_v12 = vld [vmem:[%s2009_s26 + $0x150] sm:$0xff] }
 0x177   : >> { %1337 = vst [vmem:[%s2005_s21 + $0x140] sm:$0xff] %v1336_v29  ;;  %1339 = vst [vmem:[%s2005_s21 + $0x148] sm:$0xff] %v1338_v55  ;;  %v1342_v48 = vld [vmem:[%s2009_s26 + $0x158] sm:$0xff]  ;;  %v1344_v49 = vld [vmem:[%s2009_s26 + $0x160] sm:$0xff] }
 0x178   : >> { %1341 = vst [vmem:[%s2005_s21 + $0x150] sm:$0xff] %v1340_v12  ;;  %1343 = vst [vmem:[%s2005_s21 + $0x158] sm:$0xff] %v1342_v48  ;;  %v1346_v59 = vld [vmem:[%s2009_s26 + $0x168] sm:$0xff]  ;;  %v1348_v18 = vld [vmem:[%s2009_s26 + $0x170] sm:$0xff] }
 0x179   : >> { %1345 = vst [vmem:[%s2005_s21 + $0x160] sm:$0xff] %v1344_v49  ;;  %v1350_v14 = vld [vmem:[%s2009_s26 + $0x178] sm:$0xff]  ;;  %1347 = vst [vmem:[%s2005_s21 + $0x168] sm:$0xff] %v1346_v59  ;;  %v1352_v46 = vld [vmem:[%s2009_s26 + $0x180] sm:$0xff] }
 0x17a   : >> { %1349 = vst [vmem:[%s2005_s21 + $0x170] sm:$0xff] %v1348_v18  ;;  %1351 = vst [vmem:[%s2005_s21 + $0x178] sm:$0xff] %v1350_v14  ;;  %v1354_v34 = vld [vmem:[%s2009_s26 + $0x188] sm:$0xff]  ;;  %v1356_v30 = vld [vmem:[%s2009_s26 + $0x190] sm:$0xff] }
 0x17b   : >> { %1353 = vst [vmem:[%s2005_s21 + $0x180] sm:$0xff] %v1352_v46  ;;  %1355 = vst [vmem:[%s2005_s21 + $0x188] sm:$0xff] %v1354_v34  ;;  %v1358_v41 = vld [vmem:[%s2009_s26 + $0x198] sm:$0xff]  ;;  %v1360_v50 = vld [vmem:[%s2009_s26 + $0x1a0] sm:$0xff] }
 0x17c   : >> { %1357 = vst [vmem:[%s2005_s21 + $0x190] sm:$0xff] %v1356_v30  ;;  %v1362_v51 = vld [vmem:[%s2009_s26 + $0x1a8] sm:$0xff]  ;;  %1359 = vst [vmem:[%s2005_s21 + $0x198] sm:$0xff] %v1358_v41  ;;  %v1364_v6 = vld [vmem:[%s2009_s26 + $0x1b0] sm:$0xff]  ;;  %1252 = sbr.rel (!%p1249_p12) target bundleno = 354 (0x162), region = 130 }
 0x17d   : >> { %1361 = vst [vmem:[%s2005_s21 + $0x1a0] sm:$0xff] %v1360_v50  ;;  %1363 = vst [vmem:[%s2005_s21 + $0x1a8] sm:$0xff] %v1362_v51  ;;  %v1366_v4 = vld [vmem:[%s2009_s26 + $0x1b8] sm:$0xff]  ;;  %v1368_v35 = vld [vmem:[%s2009_s26 + $0x1c0] sm:$0xff] }
 0x17e   : >> { %1365 = vst [vmem:[%s2005_s21 + $0x1b0] sm:$0xff] %v1364_v6  ;;  %1367 = vst [vmem:[%s2005_s21 + $0x1b8] sm:$0xff] %v1366_v4  ;;  %v1370_v19 = vld [vmem:[%s2009_s26 + $0x1c8] sm:$0xff]  ;;  %v1372_v31 = vld [vmem:[%s2009_s26 + $0x1d0] sm:$0xff] }
 0x17f   : >> { %1369 = vst [vmem:[%s2005_s21 + $0x1c0] sm:$0xff] %v1368_v35  ;;  %v1374_v61 = vld [vmem:[%s2009_s26 + $0x1d8] sm:$0xff]  ;;  %1371 = vst [vmem:[%s2005_s21 + $0x1c8] sm:$0xff] %v1370_v19  ;;  %v1376_v47 = vld [vmem:[%s2009_s26 + $0x1e0] sm:$0xff] }
 0x180   : >> { %1373 = vst [vmem:[%s2005_s21 + $0x1d0] sm:$0xff] %v1372_v31  ;;  %1375 = vst [vmem:[%s2005_s21 + $0x1d8] sm:$0xff] %v1374_v61  ;;  %v1378_v24 = vld [vmem:[%s2009_s26 + $0x1e8] sm:$0xff]  ;;  %v1380_v13 = vld [vmem:[%s2009_s26 + $0x1f0] sm:$0xff] }
 0x181   : >> { %1377 = vst [vmem:[%s2005_s21 + $0x1e0] sm:$0xff] %v1376_v47  ;;  %1379 = vst [vmem:[%s2005_s21 + $0x1e8] sm:$0xff] %v1378_v24  ;;  %v1382_v0 = vld [vmem:[%s2009_s26 + $0x1f8] sm:$0xff]  ;;  %s2942_s26 = smov %s2770_s30 }
 0x182   : >> { %1381 = vst [vmem:[%s2005_s21 + $0x1f0] sm:$0xff] %v1380_v13  ;;  %1383 = vst [vmem:[%s2005_s21 + $0x1f8] sm:$0xff] %v1382_v0  ;;  %s2941_s21 = smov %s2773_s7 }
 0x183 PF: > { %s2878_s8 = sand.u32 63, %s2948_s14   ;;  %s1552_s9 = sshll.u32 %s2703_s24, 9 }
 0x184   : > { %s1395_s10 = scalar_lea.vmem %s2564_s18, %s1552_s9 [#allocation2]   ;;  %s1397_s11 = scalar_lea.vmem %s2697_s20, %s1552_s9  }
 0x185   : > { %p1546_p13 = scmp.le.s32.totalorder %s2878_s8, 0 }
 0x186   : > { %s2019_s12 = smov (!%p1546_p13), %s1397_s11   ;;  %s2023_s13 = smov (!%p1546_p13), %s1395_s10  }
 0x187   : > { %1488 = sbr.rel (%p1546_p13) target bundleno = 408 (0x198), region = 135  ;;  %s2027_s15 = smov (!%p1546_p13), 0  }
 0x188   : > { %s2031_s16 = smov (!%p1546_p13), 0  }
 0x18e LB: >> { %v1407_v21 = vld [vmem:[%s2025_s13] sm:$0xff]  ;;  %s1409_s14 = sadd.s32 1, %s2029_s15  ;;  %s1401_s16 = sadd.s32 1, %s2033_s16   ;;  %s2033_s16 = sphi %s2031_s16, %s1401_s16   ;;  %s2029_s15 = sphi %s2027_s15, %s2028_s15   ;;  %s2025_s13 = sphi %s2023_s13, %s1414_s13   ;;  %s2021_s12 = sphi %s2019_s12, %s1415_s12  }
 0x18f   : >> { %1408 = vst [vmem:[%s2021_s12] sm:$0xff] %v1407_v21  ;;  %p1410_p0 = scmp.ge.s32.totalorder %s1409_s14, %s2878_s8  ;;  %p1400_p1 = scmp.ge.s32.totalorder %s1401_s16, %s2878_s8 }
 0x191   : >> { %s2952_s14 = smov (%p1410_p0, %s1409_s14), 0  ;;  %1403 = sbr.rel (!%p1400_p1) target bundleno = 398 (0x18e), region = 141 }
 0x192   : >> { %s1547_s18 = sshll.u32 %s2952_s14, 3  ;;  %s2028_s15 = smov %s2952_s14  }
 0x193   : >> { %s1414_s13 = scalar_lea.vmem %s1395_s10, %s1547_s18 [#allocation2]   ;;  %s1415_s12 = scalar_lea.vmem %s1397_s11, %s1547_s18  }
 0x198 PF: > { %p12_p2 = scmp.ge.s32.totalorder %s2080_s22, 5   ;;  %s2944_s18 = smov %s1997_s19 }
 0x199   : > { %s2945_s19 = smov %s2088_s25  ;;  %s2946_s20 = smov %s2080_s22 }
 0x19a   :  { %14 = sbr.rel (!%p12_p2) target bundleno = 2 (0x2), region = 152 }

// kernel: pc_embedding.4
= control target key start
LH: loop header
LB: loop body
LE: loop exit
PB: predicated region body
PF: predicated region fallthrough
CT: control target
= control target key end

     0   :  { %s3432_s21 = smov 0   ;;  %s3434_s22 = smov 0   ;;  %s4134_s0 = inlined_call_operand.vmem [shape: f32[1280,16], index: 0, kind: input, shape index: {}]   ;;  %s4135_s1 = inlined_call_operand.vmem [shape: bf16[16,128], index: 1, kind: input, shape index: {}]   ;;  %s4136_s2 = inlined_call_operand.vmem [shape: f32[2,128], index: 2, kind: input, shape index: {}]   ;;  %s4137_s3 = inlined_call_operand.vmem [shape: f32[2,128], index: 3, kind: input, shape index: {}]   ;;  %s4138_s4 = inlined_call_operand.vmem [shape: bf16[128,128], index: 4, kind: input, shape index: {}]   ;;  %s4139_s5 = inlined_call_operand.vmem [shape: bf16[1280,128], index: 5, kind: output, shape index: {0}]   ;;  %s4140_s6 = inlined_call_operand.vmem [shape: f32[2,128], index: 6, kind: output, shape index: {1}]  }
   0x1   :  { %s3436_s23 = smov 0  }
   0x2 LB: > { %s3443_s24 = sadd.s32 4294967295, %s3362_s23   ;;  %s3445_s25 = sadd.s32 1, %s3362_s23   ;;  %s3362_s23 = sphi %s3436_s23, %s4147_s23   ;;  %s3358_s22 = sphi %s3434_s22, %s4146_s22   ;;  %s3354_s21 = sphi %s3432_s21, %s4145_s21  }
   0x3   : > { %s131_s26 = ssub.s32 %s3362_s23, %s3445_s25  ;;  %s134_s27 = sadd.s32 1, %s3358_s22 }
   0x4   : > { %p132_p0 = scmp.eq.s32.totalorder %s131_s26, 0  ;;  %p144_p1 = scmp.ne.s32.totalorder %s3358_s22, %s3354_s21 }
   0x5   : > { %p145_p2 = scmp.eq.s32.totalorder %s3443_s24, 2  ;;  %p2585_p3 = scmp.ge.s32.totalorder %s3362_s23, 1 }
   0x6   : > { %s3452_s28 = scalar_select %p132_p0, %s3358_s22, %s134_s27  }
   0x7   : > { %p3454_p4 = por %p145_p2, %p144_p1  ;;  %p219_p5 = scmp.lt.s32.totalorder %s3362_s23, 4 }
   0x9   : > { %p220_p6 = pnand %p2585_p3, %p219_p5 }
   0xa   : > { %s247_s30 = sand.u32 (!%p220_p6), 1, %s3354_s21   ;;  %s3459_s7 = sshll.u32 (!%p220_p6), %s3443_s24, 6 }
   0xb   : > { %223 = sbr.rel (%p220_p6) target bundleno = 737 (0x2e1), region = 40  ;;  %s2586_s8 = sshll.u32 (!%p220_p6), %s247_s30, 8 }
   0xc   : > { %p257_p7 = scmp.lt.s32.totalorder (!%p220_p6), %s3459_s7, 159  ;;  %s3468_s14 = scalar_lea.vmem (!%p220_p6), [#allocation3], %s2586_s8  }
   0xd   : > { %p2589_p8 = scmp.ne.s32.totalorder (!%p220_p6), %s3443_s24, 0 }
  0x12   : > { %s258_s9 = scalar_select %p257_p7, %s3459_s7, 159 }
  0x13   : > { %275 = sbr.rel (%p2589_p8) target bundleno = 57 (0x39), region = 44  ;;  %v276_v0 = vld [vmem:[%s4136_s2] sm:$0x3] (!%p2589_p8)  ;;  %v3396_v2 = vmov (!%p2589_p8), 0.0   ;;  %v296_v8 = vlaneseq (!%p2589_p8) }
  0x14   : > { %s2588_s10 = sshll.u32 %s258_s9, 3  ;;  %v278_v1 = vmul.f32 (!%p2589_p8), 0.00078125, %v276_v0  ;;  %309 = vst [vmem:[%s4140_s6] sm:$0x3] (!%p2589_p8), %v3396_v2  ;;  %v277_v10 = vld [vmem:[%s4137_s3] sm:$0x3] (!%p2589_p8) }
  0x15   : > { %s3466_s13 = scalar_lea.vmem %s4134_s0, %s2588_s10  ;;  %v297_v12 = vshrl.u32 (!%p2589_p8), %v296_v8, 7 }
  0x16   : > { %v279_v3 = vmul.f32 (!%p2589_p8), %v278_v1, %v278_v1 }
  0x17   : > { %v301_v15 = vsub.s32 (!%p2589_p8), 0, %v297_v12  ;;  %v305_v17 = vsub.s32 (!%p2589_p8), 1, %v297_v12  ;;  %vm298_vm0 = vcmp.eq.s32.totalorder (!%p2589_p8), %v297_v12, 0 }
  0x18   : > { %v281_v4 = vrot.slane (!%p2589_p8), %v279_v3, 7 }
  0x1a   : > { %v283_v5 = vsub.f32 %v278_v1, %v281_v4 }
  0x1c   : > { %v284_v6 = vmax.f32 %v283_v5, 0.0 }
  0x1e   : > { %v285_v7 = vadd.f32 1e-05, %v284_v6 }
  0x20   : > { %3297 = vrsqrt.f32 %v285_v7 }
  0x2a   : > { %v3298_v9 = vpop.eup %3297 }
  0x2b   : > { %v288_v11 = vrot.slane %v3298_v9, 1 }
  0x2d   : > { %v290_v13 = vmul.f32 %v288_v11, %v277_v10 }
  0x2f   : > { %v291_v14 = vmul.f32 %v290_v13, %v278_v1  ;;  %v302_v19 = vrot.slane %v290_v13, %v301_v15 }
  0x31   : > { %v293_v16 = vrot.slane %v291_v14, 7 }
  0x33   : > { %v295_v18 = vsub.f32 %v277_v10, %v293_v16 }
  0x35   : > { %v306_v20 = vrot.slane %v295_v18, %v305_v17 }
  0x37   : > { %v307_v21 = vsel %vm298_vm0, %v302_v19, %v306_v20 }
  0x38   : > { %308 = vst [vmem:[#allocation2] sm:$0x3] %v307_v21 }
  0x39 PF: > { %v3299_v22 = vld [vmem:[%s4135_s1] sm:$0xff]   ;;  %v311_v24 = vld [vmem:[%s3466_s13 + $0x8] sm:$0xff]  ;;  %vm414_vm1 = vcmask 130048   ;;  %v312_v25 = vld [vmem:[%s3466_s13 + $0x10] sm:$0xff]  ;;  %s2118_s10 = ssub.s32 (%p3454_p4), 160, %s3459_s7  ;;  %s2779_s11 = sshll.u32 (%p3454_p4), %s3443_s24, 8 }
  0x3a   : > { %v310_v23 = vld [vmem:[%s3466_s13] sm:$0xff]  ;;  %3046 = vmatprep.subr.bf16.mxu0 %v3299_v22  ;;  %v313_v27 = vld [vmem:[%s3466_s13 + $0x18] sm:$0xff]  ;;  %v315_v29 = vld [vmem:[%s3466_s13 + $0x28] sm:$0xff]  ;;  %p2119_p9 = scmp.lt.s32.totalorder (%p3454_p4), %s2118_s10, 64  ;;  %s3942_s16 = scalar_lea.vmem (%p3454_p4), %s4139_s5, %s2779_s11  }
  0x3b   : > { %v374_v26 = vpack.c.bf16 %v311_v24, %v310_v23  ;;  %v314_v28 = vld [vmem:[%s3466_s13 + $0x20] sm:$0xff]  ;;  %3047 = vmatpush3.bf16.msra.mxu0 %v3299_v22  ;;  %v375_v30 = vpack.c.bf16 %v313_v27, %v312_v25  ;;  %v316_v32 = vld [vmem:[%s3466_s13 + $0x30] sm:$0xff]  ;;  %v317_v33 = vld [vmem:[%s3466_s13 + $0x38] sm:$0xff] }
  0x3c   : > { %v376_v31 = vpack.c.bf16 %v315_v29, %v314_v28  ;;  %v318_v34 = vld [vmem:[%s3466_s13 + $0x40] sm:$0xff]  ;;  %v319_v35 = vld [vmem:[%s3466_s13 + $0x48] sm:$0xff]  ;;  %v377_v36 = vpack.c.bf16 %v317_v33, %v316_v32  ;;  %v320_v38 = vld [vmem:[%s3466_s13 + $0x50] sm:$0xff] }
  0x3d   : > { %3048 = vmatprep.mubr.msk.bf16.mxu0 %vm414_vm1, %v374_v26  ;;  %v378_v37 = vpack.c.bf16 %v319_v35, %v318_v34  ;;  %v321_v39 = vld [vmem:[%s3466_s13 + $0x58] sm:$0xff]  ;;  %v322_v40 = vld [vmem:[%s3466_s13 + $0x60] sm:$0xff]  ;;  %v323_v41 = vld [vmem:[%s3466_s13 + $0x68] sm:$0xff] }
  0x3e   : > { %3049 = vmatmul.mubr.msk.bf16.vlgmr.msra.gmra.mrb[0].mxu0 %vm414_vm1, %v375_v30  ;;  %v379_v42 = vpack.c.bf16 %v321_v39, %v320_v38  ;;  %v3300_v43 = vld [vmem:[%s4138_s4] sm:$0xff]   ;;  %v380_v44 = vpack.c.bf16 %v323_v41, %v322_v40  ;;  %v3301_v45 = vld [vmem:[%s4138_s4 + $0x8] sm:$0xff]   ;;  %v324_v46 = vld [vmem:[%s3466_s13 + $0x70] sm:$0xff] }
  0x3f   : > { %3052 = vmatprep.mubr.msk.bf16.mxu0 %vm414_vm1, %v376_v31  ;;  %3112 = vmatprep.subr.bf16.mxu0 %v3300_v43  ;;  %v325_v47 = vld [vmem:[%s3466_s13 + $0x78] sm:$0xff]  ;;  %v326_v48 = vld [vmem:[%s3466_s13 + $0x80] sm:$0xff]  ;;  %v327_v49 = vld [vmem:[%s3466_s13 + $0x88] sm:$0xff] }
  0x40   : > { %3192 = vmatprep.subr.bf16.mxu1 %v3300_v43  ;;  %3113 = vmatpush3.bf16.msra.mxu0 %v3300_v43  ;;  %v3302_v50 = vld [vmem:[%s4138_s4 + $0x10] sm:$0xff]   ;;  %v381_v51 = vpack.c.bf16 %v325_v47, %v324_v46  ;;  %v3303_v52 = vld [vmem:[%s4138_s4 + $0x18] sm:$0xff]   ;;  %v382_v53 = vpack.c.bf16 %v327_v49, %v326_v48  ;;  %v3304_v54 = vld [vmem:[%s4138_s4 + $0x20] sm:$0xff]  }
  0x41   : > { %3200 = vmatpush3.bf16.msra.mxu1 %v3300_v43  ;;  %3114 = vmatprep.subr.bf16.mxu0 %v3301_v45  ;;  %v328_v55 = vld [vmem:[%s3466_s13 + $0x90] sm:$0xff]  ;;  %v329_v56 = vld [vmem:[%s3466_s13 + $0x98] sm:$0xff]  ;;  %v330_v57 = vld [vmem:[%s3466_s13 + $0xa0] sm:$0xff] }
  0x42   : > { %3193 = vmatprep.subr.bf16.mxu1 %v3301_v45  ;;  %v331_v58 = vld [vmem:[%s3466_s13 + $0xa8] sm:$0xff]  ;;  %v383_v59 = vpack.c.bf16 %v329_v56, %v328_v55  ;;  %v3306_v62 = vld [vmem:[%s4138_s4 + $0x30] sm:$0xff]   ;;  %v333_v0 = vld [vmem:[%s3466_s13 + $0xb8] sm:$0xff] }
  0x43   : > { %v3305_v60 = vld [vmem:[%s4138_s4 + $0x28] sm:$0xff]   ;;  %v384_v61 = vpack.c.bf16 %v331_v58, %v330_v57  ;;  %v332_v63 = vld [vmem:[%s3466_s13 + $0xb0] sm:$0xff]  ;;  %v334_v1 = vld [vmem:[%s3466_s13 + $0xc0] sm:$0xff] }
  0x44   : > { %3115 = vmatpush3.bf16.msra.mxu0 %v3301_v45  ;;  %v335_v2 = vld [vmem:[%s3466_s13 + $0xc8] sm:$0xff]  ;;  %v385_v3 = vpack.c.bf16 %v333_v0, %v332_v63  ;;  %v3307_v4 = vld [vmem:[%s4138_s4 + $0x38] sm:$0xff]   ;;  %v336_v6 = vld [vmem:[%s3466_s13 + $0xd0] sm:$0xff] }
  0x45   : > { %3201 = vmatpush3.bf16.msra.mxu1 %v3301_v45  ;;  %3116 = vmatprep.subr.bf16.mxu0 %v3302_v50  ;;  %v386_v5 = vpack.c.bf16 %v335_v2, %v334_v1  ;;  %v337_v7 = vld [vmem:[%s3466_s13 + $0xd8] sm:$0xff]  ;;  %v338_v8 = vld [vmem:[%s3466_s13 + $0xe0] sm:$0xff]  ;;  %v339_v9 = vld [vmem:[%s3466_s13 + $0xe8] sm:$0xff] }
  0x46   : > { %3053 = vmatmul.mubr.msk.bf16.gmra.mrb[4].mxu0 %vm414_vm1, %v377_v36  ;;  %3194 = vmatprep.subr.bf16.mxu1 %v3302_v50  ;;  %v387_v10 = vpack.c.bf16 %v337_v7, %v336_v6  ;;  %v388_v11 = vpack.c.bf16 %v339_v9, %v338_v8  ;;  %v340_v12 = vld [vmem:[%s3466_s13 + $0xf0] sm:$0xff]  ;;  %v341_v13 = vld [vmem:[%s3466_s13 + $0xf8] sm:$0xff]  ;;  %v342_v14 = vld [vmem:[%s3466_s13 + $0x100] sm:$0xff] }
  0x47   : > { %3056 = vmatprep.mubr.msk.bf16.mxu0 %vm414_vm1, %v378_v37  ;;  %v343_v15 = vld [vmem:[%s3466_s13 + $0x108] sm:$0xff]  ;;  %v389_v16 = vpack.c.bf16 %v341_v13, %v340_v12  ;;  %v344_v18 = vld [vmem:[%s3466_s13 + $0x110] sm:$0xff]  ;;  %v345_v19 = vld [vmem:[%s3466_s13 + $0x118] sm:$0xff] }
  0x48   : > { %3117 = vmatpush3.bf16.msra.mxu0 %v3302_v50  ;;  %v390_v17 = vpack.c.bf16 %v343_v15, %v342_v14  ;;  %v346_v20 = vld [vmem:[%s3466_s13 + $0x120] sm:$0xff]  ;;  %v347_v21 = vld [vmem:[%s3466_s13 + $0x128] sm:$0xff]  ;;  %v391_v22 = vpack.c.bf16 %v345_v19, %v344_v18  ;;  %v348_v24 = vld [vmem:[%s3466_s13 + $0x130] sm:$0xff] }
  0x49   : > { %3202 = vmatpush3.bf16.msra.mxu1 %v3302_v50  ;;  %3118 = vmatprep.subr.bf16.mxu0 %v3303_v52  ;;  %v392_v23 = vpack.c.bf16 %v347_v21, %v346_v20  ;;  %v349_v25 = vld [vmem:[%s3466_s13 + $0x138] sm:$0xff]  ;;  %v350_v26 = vld [vmem:[%s3466_s13 + $0x140] sm:$0xff]  ;;  %v351_v27 = vld [vmem:[%s3466_s13 + $0x148] sm:$0xff] }
  0x4a   : > { %3195 = vmatprep.subr.bf16.mxu1 %v3303_v52  ;;  %v393_v28 = vpack.c.bf16 %v349_v25, %v348_v24  ;;  %v394_v29 = vpack.c.bf16 %v351_v27, %v350_v26  ;;  %v352_v30 = vld [vmem:[%s3466_s13 + $0x150] sm:$0xff]  ;;  %v353_v31 = vld [vmem:[%s3466_s13 + $0x158] sm:$0xff]  ;;  %v354_v32 = vld [vmem:[%s3466_s13 + $0x160] sm:$0xff] }
  0x4b   : > { %v355_v33 = vld [vmem:[%s3466_s13 + $0x168] sm:$0xff]  ;;  %v395_v34 = vpack.c.bf16 %v353_v31, %v352_v30  ;;  %v356_v36 = vld [vmem:[%s3466_s13 + $0x170] sm:$0xff]  ;;  %v357_v37 = vld [vmem:[%s3466_s13 + $0x178] sm:$0xff] }
  0x4c   : > { %3119 = vmatpush3.bf16.msra.mxu0 %v3303_v52  ;;  %v396_v35 = vpack.c.bf16 %v355_v33, %v354_v32  ;;  %v358_v38 = vld [vmem:[%s3466_s13 + $0x180] sm:$0xff]  ;;  %v359_v39 = vld [vmem:[%s3466_s13 + $0x188] sm:$0xff]  ;;  %v397_v40 = vpack.c.bf16 %v357_v37, %v356_v36  ;;  %v361_v43 = vld [vmem:[%s3466_s13 + $0x198] sm:$0xff] }
  0x4d   : > { %3203 = vmatpush3.bf16.msra.mxu1 %v3303_v52  ;;  %3120 = vmatprep.subr.bf16.mxu0 %v3304_v54  ;;  %v398_v41 = vpack.c.bf16 %v359_v39, %v358_v38  ;;  %v363_v45 = vld [vmem:[%s3466_s13 + $0x1a8] sm:$0xff]  ;;  %v364_v48 = vld [vmem:[%s3466_s13 + $0x1b0] sm:$0xff]  ;;  %v365_v49 = vld [vmem:[%s3466_s13 + $0x1b8] sm:$0xff] }
  0x4e   : > { %3057 = vmatmul.mubr.msk.bf16.gmra.mrb[8].mxu0 %vm414_vm1, %v379_v42  ;;  %3196 = vmatprep.subr.bf16.mxu1 %v3304_v54  ;;  %v360_v42 = vld [vmem:[%s3466_s13 + $0x190] sm:$0xff]  ;;  %v366_v50 = vld [vmem:[%s3466_s13 + $0x1c0] sm:$0xff]  ;;  %v401_v52 = vpack.c.bf16 %v365_v49, %v364_v48  ;;  %v369_v55 = vld [vmem:[%s3466_s13 + $0x1d8] sm:$0xff] }
  0x4f   : > { %3060 = vmatprep.mubr.msk.bf16.mxu0 %vm414_vm1, %v380_v44  ;;  %v362_v44 = vld [vmem:[%s3466_s13 + $0x1a0] sm:$0xff]  ;;  %v399_v46 = vpack.c.bf16 %v361_v43, %v360_v42  ;;  %v371_v57 = vld [vmem:[%s3466_s13 + $0x1e8] sm:$0xff] }
  0x50   : > { %3121 = vmatpush3.bf16.msra.mxu0 %v3304_v54  ;;  %v400_v47 = vpack.c.bf16 %v363_v45, %v362_v44  ;;  %v370_v56 = vld [vmem:[%s3466_s13 + $0x1e0] sm:$0xff] }
  0x51   : > { %3204 = vmatpush3.bf16.msra.mxu1 %v3304_v54  ;;  %3122 = vmatprep.subr.bf16.mxu0 %v3305_v60  ;;  %v368_v54 = vld [vmem:[%s3466_s13 + $0x1d0] sm:$0xff]  ;;  %v3603_v63 = vld [vmem:[#allocation2] ss:$0 sm:$0xff]  ;;  %v3605_v1 = vld [vmem:[#allocation2 + $0x1] ss:$0 sm:$0xff] }
  0x52   : > { %3197 = vmatprep.subr.bf16.mxu1 %v3305_v60  ;;  %v403_v58 = vpack.c.bf16 %v369_v55, %v368_v54 }
  0x54   : > { %3123 = vmatpush3.bf16.msra.mxu0 %v3305_v60 }
  0x55   : > { %3205 = vmatpush3.bf16.msra.mxu1 %v3305_v60  ;;  %3124 = vmatprep.subr.bf16.mxu0 %v3306_v62  ;;  %v372_v60 = vld [vmem:[%s3466_s13 + $0x1f0] sm:$0xff] }
  0x56   : > { %3061 = vmatmul.mubr.msk.bf16.gmra.mrb[12].mxu0 %vm414_vm1, %v381_v51  ;;  %3198 = vmatprep.subr.bf16.mxu1 %v3306_v62  ;;  %v367_v51 = vld [vmem:[%s3466_s13 + $0x1c8] sm:$0xff] }
  0x57   : > { %3064 = vmatprep.mubr.msk.bf16.mxu0 %vm414_vm1, %v382_v53  ;;  %v402_v53 = vpack.c.bf16 %v367_v51, %v366_v50 }
  0x58   : > { %3125 = vmatpush3.bf16.msra.mxu0 %v3306_v62 }
  0x59   : > { %3206 = vmatpush3.bf16.msra.mxu1 %v3306_v62  ;;  %3126 = vmatprep.subr.bf16.mxu0 %v3307_v4 }
  0x5a   : > { %3199 = vmatprep.subr.bf16.mxu1 %v3307_v4 }
  0x5c   : > { %3127 = vmatpush3.bf16.msra.mxu0 %v3307_v4 }
  0x5d   : > { %3207 = vmatpush3.bf16.msra.mxu1 %v3307_v4 }
  0x5e   : > { %3065 = vmatmul.mubr.msk.bf16.gmra.mrb[16].mxu0 %vm414_vm1, %v383_v59  ;;  %v404_v59 = vpack.c.bf16 %v371_v57, %v370_v56 }
  0x5f   : > { %3068 = vmatprep.mubr.msk.bf16.mxu0 %vm414_vm1, %v384_v61  ;;  %v373_v61 = vld [vmem:[%s3466_s13 + $0x1f8] sm:$0xff]  ;;  %s2697_s13 = sshll.u32 %s3443_s24, 9 }
  0x60   : > { %v405_v62 = vpack.c.bf16 %v373_v61, %v372_v60  ;;  %s1774_s26 = ssub.s32 1280, %s2697_s13 }
  0x66   : > { %3069 = vmatmul.mubr.msk.bf16.gmra.mrb[20].mxu0 %vm414_vm1, %v385_v3 }
  0x67   : > { %3072 = vmatprep.mubr.msk.bf16.mxu0 %vm414_vm1, %v386_v5 }
  0x6e   : > { %3073 = vmatmul.mubr.msk.bf16.gmra.mrb[24].mxu0 %vm414_vm1, %v387_v10 }
  0x6f   : > { %3076 = vmatprep.mubr.msk.bf16.mxu0 %vm414_vm1, %v388_v11 }
  0x76   : > { %3077 = vmatmul.mubr.msk.bf16.gmra.mrb[28].mxu0 %vm414_vm1, %v389_v16 }
  0x77   : > { %3080 = vmatprep.mubr.msk.bf16.mxu0 %vm414_vm1, %v390_v17 }
  0x7e   : > { %3081 = vmatmul.mubr.msk.bf16.gmra.mrb[32].mxu0 %vm414_vm1, %v391_v22 }
  0x7f   : > { %3084 = vmatprep.mubr.msk.bf16.mxu0 %vm414_vm1, %v392_v23 }
  0x86   : > { %3085 = vmatmul.mubr.msk.bf16.gmra.mrb[36].mxu0 %vm414_vm1, %v393_v28 }
  0x87   : > { %3088 = vmatprep.mubr.msk.bf16.mxu0 %vm414_vm1, %v394_v29 }
  0x8e   : > { %3089 = vmatmul.mubr.msk.bf16.gmra.mrb[40].mxu0 %vm414_vm1, %v395_v34 }
  0x8f   : > { %3092 = vmatprep.mubr.msk.bf16.mxu0 %vm414_vm1, %v396_v35 }
  0x96   : > { %3093 = vmatmul.mubr.msk.bf16.gmra.mrb[44].mxu0 %vm414_vm1, %v397_v40 }
  0x97   : > { %3096 = vmatprep.mubr.msk.bf16.mxu0 %vm414_vm1, %v398_v41 }
  0x9e   : > { %3097 = vmatmul.mubr.msk.bf16.gmra.mrb[48].mxu0 %vm414_vm1, %v399_v46 }
  0x9f   : > { %3100 = vmatprep.mubr.msk.bf16.mxu0 %vm414_vm1, %v400_v47 }
  0xa6   : > { %3101 = vmatmul.mubr.msk.bf16.gmra.mrb[52].mxu0 %vm414_vm1, %v401_v52 }
  0xa7   : > { %3104 = vmatprep.mubr.msk.bf16.mxu0 %vm414_vm1, %v402_v53 }
  0xae   : > { %3105 = vmatmul.mubr.msk.bf16.gmra.mrb[56].mxu0 %vm414_vm1, %v403_v58 }
  0xaf   : > { %3108 = vmatprep.mubr.msk.bf16.mxu0 %vm414_vm1, %v404_v59 }
  0xb6   : > { %3109 = vmatmul.mubr.msk.bf16.gmra.mrb[60].mxu0 %vm414_vm1, %v405_v62 }
 0x111   : > { %v3050_v0 = vpop.f32.mrb[0].mxu0 }
 0x112   : > { %v807_v2 = vmul.f32 %v3050_v0, %v3603_v63  ;;  %v545_v3 = vpop.f32.mrb[1].mxu0 }
 0x113   : > { %v805_v4 = vmul.f32 %v3603_v63, %v545_v3  ;;  %v3051_v5 = vpop.f32.mrb[2].mxu0 }
 0x114   : > { %v876_v6 = vadd.f32 %v3605_v1, %v807_v2  ;;  %v808_v7 = vmul.f32 %v3051_v5, %v3603_v63  ;;  %v548_v8 = vpop.f32.mrb[3].mxu0 }
 0x115   : > { %v874_v9 = vadd.f32 %v3605_v1, %v805_v4  ;;  %v806_v10 = vmul.f32 %v3603_v63, %v548_v8 }
 0x116   : > { %v877_v11 = vadd.f32 %v3605_v1, %v808_v7  ;;  %v940_v13 = vmax.f32 %v876_v6, 0.0 }
 0x117   : > { %v875_v12 = vadd.f32 %v3605_v1, %v806_v10  ;;  %v938_v15 = vmax.f32 %v874_v9, 0.0 }
 0x118   : > { %v941_v14 = vmax.f32 %v877_v11, 0.0 }
 0x119   : > { %v939_v16 = vmax.f32 %v875_v12, 0.0  ;;  %v3054_v17 = vpop.f32.mrb[4].mxu0 }
 0x11a   : > { %v1003_v18 = vpack.c.bf16 %v941_v14, %v940_v13  ;;  %v811_v19 = vmul.f32 %v3054_v17, %v3603_v63  ;;  %v561_v20 = vpop.f32.mrb[5].mxu0 }
 0x11b   : > { %v809_v21 = vmul.f32 %v3603_v63, %v561_v20  ;;  %v3055_v22 = vpop.f32.mrb[6].mxu0  ;;  %v1002_v23 = vpack.c.bf16 %v939_v16, %v938_v15 }
 0x11c   : > { %v880_v24 = vadd.f32 %v3605_v1, %v811_v19  ;;  %v812_v25 = vmul.f32 %v3055_v22, %v3603_v63  ;;  %v564_v26 = vpop.f32.mrb[7].mxu0 }
 0x11d   : > { %v810_v27 = vmul.f32 %v3603_v63, %v564_v26  ;;  %3128 = vmatprep.mubr.bf16.mxu0 %v1002_v23  ;;  %v878_v28 = vadd.f32 %v3605_v1, %v809_v21 }
 0x11e   : > { %v881_v29 = vadd.f32 %v3605_v1, %v812_v25  ;;  %3129 = vmatmul.mubr.bf16.vlgmr.msra.gmra.mrb[64].mxu0 %v1003_v18  ;;  %v944_v31 = vmax.f32 %v880_v24, 0.0 }
 0x11f   : > { %v879_v30 = vadd.f32 %v3605_v1, %v810_v27  ;;  %v942_v34 = vmax.f32 %v878_v28, 0.0 }
 0x120   : > { %v945_v32 = vmax.f32 %v881_v29, 0.0 }
 0x121   : > { %v3058_v33 = vpop.f32.mrb[8].mxu0  ;;  %v943_v35 = vmax.f32 %v879_v30, 0.0 }
 0x122   : > { %v815_v36 = vmul.f32 %v3058_v33, %v3603_v63  ;;  %v577_v37 = vpop.f32.mrb[9].mxu0  ;;  %v1005_v38 = vpack.c.bf16 %v945_v32, %v944_v31 }
 0x123   : > { %v813_v39 = vmul.f32 %v3603_v63, %v577_v37  ;;  %v3059_v40 = vpop.f32.mrb[10].mxu0  ;;  %v1004_v41 = vpack.c.bf16 %v943_v35, %v942_v34 }
 0x124   : > { %v884_v42 = vadd.f32 %v3605_v1, %v815_v36  ;;  %v816_v43 = vmul.f32 %v3059_v40, %v3603_v63  ;;  %v580_v44 = vpop.f32.mrb[11].mxu0 }
 0x125   : > { %v882_v45 = vadd.f32 %v3605_v1, %v813_v39  ;;  %v814_v46 = vmul.f32 %v3603_v63, %v580_v44  ;;  %3132 = vmatprep.mubr.bf16.mxu1 %v1004_v41 }
 0x126   : > { %v885_v47 = vadd.f32 %v3605_v1, %v816_v43  ;;  %3133 = vmatmul.mubr.bf16.vlgmr.msra.gmra.mrb[0].mxu1 %v1005_v38  ;;  %v948_v49 = vmax.f32 %v884_v42, 0.0 }
 0x127   : > { %v883_v48 = vadd.f32 %v3605_v1, %v814_v46  ;;  %v946_v51 = vmax.f32 %v882_v45, 0.0 }
 0x128   : > { %v949_v50 = vmax.f32 %v885_v47, 0.0 }
 0x129   : > { %v947_v52 = vmax.f32 %v883_v48, 0.0  ;;  %v3062_v53 = vpop.f32.mrb[12].mxu0 }
 0x12a   : > { %v819_v54 = vmul.f32 %v3062_v53, %v3603_v63  ;;  %v593_v55 = vpop.f32.mrb[13].mxu0  ;;  %v1007_v56 = vpack.c.bf16 %v949_v50, %v948_v49 }
 0x12b   : > { %v817_v57 = vmul.f32 %v3603_v63, %v593_v55  ;;  %v3063_v58 = vpop.f32.mrb[14].mxu0  ;;  %v1006_v59 = vpack.c.bf16 %v947_v52, %v946_v51 }
 0x12c   : > { %v888_v60 = vadd.f32 %v3605_v1, %v819_v54  ;;  %v820_v61 = vmul.f32 %v3063_v58, %v3603_v63  ;;  %v596_v62 = vpop.f32.mrb[15].mxu0 }
 0x12d   : > { %v886_v0 = vadd.f32 %v3605_v1, %v817_v57  ;;  %v818_v2 = vmul.f32 %v3603_v63, %v596_v62  ;;  %3136 = vmatprep.mubr.bf16.mxu1 %v1006_v59 }
 0x12e   : > { %v889_v3 = vadd.f32 %v3605_v1, %v820_v61  ;;  %3137 = vmatmul.mubr.bf16.gmra.mrb[4].mxu1 %v1007_v56  ;;  %v952_v5 = vmax.f32 %v888_v60, 0.0 }
 0x12f   : > { %v887_v4 = vadd.f32 %v3605_v1, %v818_v2  ;;  %v950_v7 = vmax.f32 %v886_v0, 0.0 }
 0x130   : > { %v953_v6 = vmax.f32 %v889_v3, 0.0 }
 0x131   : > { %v951_v8 = vmax.f32 %v887_v4, 0.0  ;;  %v3066_v9 = vpop.f32.mrb[16].mxu0 }
 0x132   : > { %v823_v10 = vmul.f32 %v3066_v9, %v3603_v63  ;;  %v609_v11 = vpop.f32.mrb[17].mxu0  ;;  %v1009_v12 = vpack.c.bf16 %v953_v6, %v952_v5 }
 0x133   : > { %v821_v13 = vmul.f32 %v3603_v63, %v609_v11  ;;  %v3067_v14 = vpop.f32.mrb[18].mxu0  ;;  %v1008_v15 = vpack.c.bf16 %v951_v8, %v950_v7 }
 0x134   : > { %v892_v16 = vadd.f32 %v3605_v1, %v823_v10  ;;  %v824_v17 = vmul.f32 %v3067_v14, %v3603_v63  ;;  %v612_v18 = vpop.f32.mrb[19].mxu0 }
 0x135   : > { %v890_v19 = vadd.f32 %v3605_v1, %v821_v13  ;;  %v822_v20 = vmul.f32 %v3603_v63, %v612_v18  ;;  %3140 = vmatprep.mubr.bf16.mxu1 %v1008_v15 }
 0x136   : > { %v893_v21 = vadd.f32 %v3605_v1, %v824_v17  ;;  %3141 = vmatmul.mubr.bf16.gmra.mrb[8].mxu1 %v1009_v12  ;;  %v956_v23 = vmax.f32 %v892_v16, 0.0 }
 0x137   : > { %v891_v22 = vadd.f32 %v3605_v1, %v822_v20  ;;  %v954_v25 = vmax.f32 %v890_v19, 0.0 }
 0x138   : > { %v957_v24 = vmax.f32 %v893_v21, 0.0 }
 0x139   : > { %v955_v26 = vmax.f32 %v891_v22, 0.0  ;;  %v3070_v27 = vpop.f32.mrb[20].mxu0 }
 0x13a   : > { %v827_v28 = vmul.f32 %v3070_v27, %v3603_v63  ;;  %v625_v29 = vpop.f32.mrb[21].mxu0  ;;  %v1011_v30 = vpack.c.bf16 %v957_v24, %v956_v23 }
 0x13b   : > { %v825_v31 = vmul.f32 %v3603_v63, %v625_v29  ;;  %v3071_v32 = vpop.f32.mrb[22].mxu0  ;;  %v1010_v33 = vpack.c.bf16 %v955_v26, %v954_v25 }
 0x13c   : > { %v896_v34 = vadd.f32 %v3605_v1, %v827_v28  ;;  %v828_v35 = vmul.f32 %v3071_v32, %v3603_v63  ;;  %v628_v36 = vpop.f32.mrb[23].mxu0 }
 0x13d   : > { %v894_v37 = vadd.f32 %v3605_v1, %v825_v31  ;;  %v826_v38 = vmul.f32 %v3603_v63, %v628_v36  ;;  %3144 = vmatprep.mubr.bf16.mxu1 %v1010_v33 }
 0x13e   : > { %v897_v39 = vadd.f32 %v3605_v1, %v828_v35  ;;  %3145 = vmatmul.mubr.bf16.gmra.mrb[12].mxu1 %v1011_v30  ;;  %v960_v41 = vmax.f32 %v896_v34, 0.0 }
 0x13f   : > { %v895_v40 = vadd.f32 %v3605_v1, %v826_v38  ;;  %v958_v43 = vmax.f32 %v894_v37, 0.0 }
 0x140   : > { %v961_v42 = vmax.f32 %v897_v39, 0.0 }
 0x141   : > { %v959_v44 = vmax.f32 %v895_v40, 0.0  ;;  %v3074_v45 = vpop.f32.mrb[24].mxu0 }
 0x142   : > { %v831_v46 = vmul.f32 %v3074_v45, %v3603_v63  ;;  %v641_v47 = vpop.f32.mrb[25].mxu0  ;;  %v1013_v48 = vpack.c.bf16 %v961_v42, %v960_v41 }
 0x143   : > { %v829_v49 = vmul.f32 %v3603_v63, %v641_v47  ;;  %v3075_v50 = vpop.f32.mrb[26].mxu0  ;;  %v1012_v51 = vpack.c.bf16 %v959_v44, %v958_v43 }
 0x144   : > { %v900_v52 = vadd.f32 %v3605_v1, %v831_v46  ;;  %v832_v53 = vmul.f32 %v3075_v50, %v3603_v63  ;;  %v644_v54 = vpop.f32.mrb[27].mxu0 }
 0x145   : > { %v898_v55 = vadd.f32 %v3605_v1, %v829_v49  ;;  %v830_v56 = vmul.f32 %v3603_v63, %v644_v54  ;;  %3148 = vmatprep.mubr.bf16.mxu1 %v1012_v51 }
 0x146   : > { %v901_v57 = vadd.f32 %v3605_v1, %v832_v53  ;;  %3149 = vmatmul.mubr.bf16.gmra.mrb[16].mxu1 %v1013_v48  ;;  %v964_v59 = vmax.f32 %v900_v52, 0.0 }
 0x147   : > { %v899_v58 = vadd.f32 %v3605_v1, %v830_v56  ;;  %v962_v61 = vmax.f32 %v898_v55, 0.0 }
 0x148   : > { %v965_v60 = vmax.f32 %v901_v57, 0.0 }
 0x149   : > { %v963_v62 = vmax.f32 %v899_v58, 0.0  ;;  %v3078_v0 = vpop.f32.mrb[28].mxu0 }
 0x14a   : > { %v835_v2 = vmul.f32 %v3078_v0, %v3603_v63  ;;  %v657_v3 = vpop.f32.mrb[29].mxu0  ;;  %v1015_v4 = vpack.c.bf16 %v965_v60, %v964_v59 }
 0x14b   : > { %v833_v5 = vmul.f32 %v3603_v63, %v657_v3  ;;  %v3079_v6 = vpop.f32.mrb[30].mxu0  ;;  %v1014_v7 = vpack.c.bf16 %v963_v62, %v962_v61 }
 0x14c   : > { %v904_v8 = vadd.f32 %v3605_v1, %v835_v2  ;;  %v836_v9 = vmul.f32 %v3079_v6, %v3603_v63  ;;  %v660_v10 = vpop.f32.mrb[31].mxu0 }
 0x14d   : > { %v902_v11 = vadd.f32 %v3605_v1, %v833_v5  ;;  %v834_v12 = vmul.f32 %v3603_v63, %v660_v10  ;;  %3152 = vmatprep.mubr.bf16.mxu1 %v1014_v7 }
 0x14e   : > { %v905_v13 = vadd.f32 %v3605_v1, %v836_v9  ;;  %3153 = vmatmul.mubr.bf16.gmra.mrb[20].mxu1 %v1015_v4  ;;  %v968_v15 = vmax.f32 %v904_v8, 0.0 }
 0x14f   : > { %v903_v14 = vadd.f32 %v3605_v1, %v834_v12  ;;  %v966_v17 = vmax.f32 %v902_v11, 0.0 }
 0x150   : > { %v969_v16 = vmax.f32 %v905_v13, 0.0 }
 0x151   : > { %v967_v18 = vmax.f32 %v903_v14, 0.0  ;;  %v3082_v19 = vpop.f32.mrb[32].mxu0 }
 0x152   : > { %v839_v20 = vmul.f32 %v3082_v19, %v3603_v63  ;;  %v673_v21 = vpop.f32.mrb[33].mxu0  ;;  %v1017_v22 = vpack.c.bf16 %v969_v16, %v968_v15 }
 0x153   : > { %v837_v23 = vmul.f32 %v3603_v63, %v673_v21  ;;  %v3083_v24 = vpop.f32.mrb[34].mxu0  ;;  %v1016_v25 = vpack.c.bf16 %v967_v18, %v966_v17 }
 0x154   : > { %v908_v26 = vadd.f32 %v3605_v1, %v839_v20  ;;  %v840_v27 = vmul.f32 %v3083_v24, %v3603_v63  ;;  %v676_v28 = vpop.f32.mrb[35].mxu0 }
 0x155   : > { %v906_v29 = vadd.f32 %v3605_v1, %v837_v23  ;;  %v838_v30 = vmul.f32 %v3603_v63, %v676_v28  ;;  %3156 = vmatprep.mubr.bf16.mxu1 %v1016_v25 }
 0x156   : > { %v909_v31 = vadd.f32 %v3605_v1, %v840_v27  ;;  %3157 = vmatmul.mubr.bf16.gmra.mrb[24].mxu1 %v1017_v22  ;;  %v972_v33 = vmax.f32 %v908_v26, 0.0 }
 0x157   : > { %v907_v32 = vadd.f32 %v3605_v1, %v838_v30  ;;  %v970_v35 = vmax.f32 %v906_v29, 0.0 }
 0x158   : > { %v973_v34 = vmax.f32 %v909_v31, 0.0 }
 0x159   : > { %v971_v36 = vmax.f32 %v907_v32, 0.0  ;;  %v3086_v37 = vpop.f32.mrb[36].mxu0 }
 0x15a   : > { %v843_v38 = vmul.f32 %v3086_v37, %v3603_v63  ;;  %v689_v39 = vpop.f32.mrb[37].mxu0  ;;  %v1019_v40 = vpack.c.bf16 %v973_v34, %v972_v33 }
 0x15b   : > { %v841_v41 = vmul.f32 %v3603_v63, %v689_v39  ;;  %v3087_v42 = vpop.f32.mrb[38].mxu0  ;;  %v1018_v43 = vpack.c.bf16 %v971_v36, %v970_v35 }
 0x15c   : > { %v912_v44 = vadd.f32 %v3605_v1, %v843_v38  ;;  %v844_v45 = vmul.f32 %v3087_v42, %v3603_v63  ;;  %v692_v46 = vpop.f32.mrb[39].mxu0 }
 0x15d   : > { %v910_v47 = vadd.f32 %v3605_v1, %v841_v41  ;;  %v842_v48 = vmul.f32 %v3603_v63, %v692_v46  ;;  %3160 = vmatprep.mubr.bf16.mxu1 %v1018_v43 }
 0x15e   : > { %v913_v49 = vadd.f32 %v3605_v1, %v844_v45  ;;  %3161 = vmatmul.mubr.bf16.gmra.mrb[28].mxu1 %v1019_v40  ;;  %v976_v51 = vmax.f32 %v912_v44, 0.0 }
 0x15f   : > { %v911_v50 = vadd.f32 %v3605_v1, %v842_v48  ;;  %v974_v53 = vmax.f32 %v910_v47, 0.0 }
 0x160   : > { %v977_v52 = vmax.f32 %v913_v49, 0.0 }
 0x161   : > { %v975_v54 = vmax.f32 %v911_v50, 0.0  ;;  %v3090_v55 = vpop.f32.mrb[40].mxu0 }
 0x162   : > { %v847_v56 = vmul.f32 %v3090_v55, %v3603_v63  ;;  %v705_v57 = vpop.f32.mrb[41].mxu0  ;;  %v1021_v58 = vpack.c.bf16 %v977_v52, %v976_v51 }
 0x163   : > { %v845_v59 = vmul.f32 %v3603_v63, %v705_v57  ;;  %v3091_v60 = vpop.f32.mrb[42].mxu0  ;;  %v1020_v61 = vpack.c.bf16 %v975_v54, %v974_v53 }
 0x164   : > { %v916_v62 = vadd.f32 %v3605_v1, %v847_v56  ;;  %v848_v0 = vmul.f32 %v3091_v60, %v3603_v63  ;;  %v708_v2 = vpop.f32.mrb[43].mxu0 }
 0x165   : > { %v914_v3 = vadd.f32 %v3605_v1, %v845_v59  ;;  %v846_v4 = vmul.f32 %v3603_v63, %v708_v2  ;;  %3164 = vmatprep.mubr.bf16.mxu1 %v1020_v61 }
 0x166   : > { %v917_v5 = vadd.f32 %v3605_v1, %v848_v0  ;;  %3165 = vmatmul.mubr.bf16.gmra.mrb[32].mxu1 %v1021_v58  ;;  %v980_v7 = vmax.f32 %v916_v62, 0.0 }
 0x167   : > { %v915_v6 = vadd.f32 %v3605_v1, %v846_v4  ;;  %v978_v9 = vmax.f32 %v914_v3, 0.0 }
 0x168   : > { %v981_v8 = vmax.f32 %v917_v5, 0.0 }
 0x169   : > { %v979_v10 = vmax.f32 %v915_v6, 0.0  ;;  %v3094_v11 = vpop.f32.mrb[44].mxu0 }
 0x16a   : > { %v851_v12 = vmul.f32 %v3094_v11, %v3603_v63  ;;  %v721_v13 = vpop.f32.mrb[45].mxu0  ;;  %v1023_v14 = vpack.c.bf16 %v981_v8, %v980_v7 }
 0x16b   : > { %v849_v15 = vmul.f32 %v3603_v63, %v721_v13  ;;  %v3095_v16 = vpop.f32.mrb[46].mxu0  ;;  %v1022_v17 = vpack.c.bf16 %v979_v10, %v978_v9 }
 0x16c   : > { %v920_v18 = vadd.f32 %v3605_v1, %v851_v12  ;;  %v852_v19 = vmul.f32 %v3095_v16, %v3603_v63  ;;  %v724_v20 = vpop.f32.mrb[47].mxu0 }
 0x16d   : > { %v918_v21 = vadd.f32 %v3605_v1, %v849_v15  ;;  %v850_v22 = vmul.f32 %v3603_v63, %v724_v20  ;;  %3168 = vmatprep.mubr.bf16.mxu1 %v1022_v17 }
 0x16e   : > { %v921_v23 = vadd.f32 %v3605_v1, %v852_v19  ;;  %3169 = vmatmul.mubr.bf16.gmra.mrb[36].mxu1 %v1023_v14  ;;  %v984_v25 = vmax.f32 %v920_v18, 0.0 }
 0x16f   : > { %v919_v24 = vadd.f32 %v3605_v1, %v850_v22  ;;  %v982_v27 = vmax.f32 %v918_v21, 0.0 }
 0x170   : > { %v985_v26 = vmax.f32 %v921_v23, 0.0 }
 0x171   : > { %v983_v28 = vmax.f32 %v919_v24, 0.0  ;;  %v3098_v29 = vpop.f32.mrb[48].mxu0 }
 0x172   : > { %v855_v30 = vmul.f32 %v3098_v29, %v3603_v63  ;;  %v737_v31 = vpop.f32.mrb[49].mxu0  ;;  %v1025_v32 = vpack.c.bf16 %v985_v26, %v984_v25 }
 0x173   : > { %v853_v33 = vmul.f32 %v3603_v63, %v737_v31  ;;  %v3099_v34 = vpop.f32.mrb[50].mxu0  ;;  %v1024_v35 = vpack.c.bf16 %v983_v28, %v982_v27 }
 0x174   : > { %v924_v36 = vadd.f32 %v3605_v1, %v855_v30  ;;  %v856_v37 = vmul.f32 %v3099_v34, %v3603_v63  ;;  %v740_v38 = vpop.f32.mrb[51].mxu0 }
 0x175   : > { %v922_v39 = vadd.f32 %v3605_v1, %v853_v33  ;;  %v854_v40 = vmul.f32 %v3603_v63, %v740_v38  ;;  %3172 = vmatprep.mubr.bf16.mxu1 %v1024_v35 }
 0x176   : > { %v925_v41 = vadd.f32 %v3605_v1, %v856_v37  ;;  %3173 = vmatmul.mubr.bf16.gmra.mrb[40].mxu1 %v1025_v32  ;;  %v988_v43 = vmax.f32 %v924_v36, 0.0 }
 0x177   : > { %v923_v42 = vadd.f32 %v3605_v1, %v854_v40  ;;  %v986_v45 = vmax.f32 %v922_v39, 0.0 }
 0x178   : > { %v989_v44 = vmax.f32 %v925_v41, 0.0  ;;  %v1708_v41 = vlaneseq }
 0x179   : > { %v987_v46 = vmax.f32 %v923_v42, 0.0  ;;  %v3102_v47 = vpop.f32.mrb[52].mxu0 }
 0x17a   : > { %v859_v48 = vmul.f32 %v3102_v47, %v3603_v63  ;;  %v753_v49 = vpop.f32.mrb[53].mxu0  ;;  %v1027_v50 = vpack.c.bf16 %v989_v44, %v988_v43  ;;  %v3736_v42 = vshrl.u32 %v1708_v41, 7 }
 0x17b   : > { %v857_v51 = vmul.f32 %v3603_v63, %v753_v49  ;;  %v3103_v52 = vpop.f32.mrb[54].mxu0  ;;  %v1026_v53 = vpack.c.bf16 %v987_v46, %v986_v45 }
 0x17c   : > { %v928_v54 = vadd.f32 %v3605_v1, %v859_v48  ;;  %v860_v55 = vmul.f32 %v3103_v52, %v3603_v63  ;;  %v756_v56 = vpop.f32.mrb[55].mxu0  ;;  %v1711_v43 = vadd.s32 16, %v3736_v42  ;;  %v1710_v44 = vadd.s32 8, %v3736_v42 }
 0x17d   : > { %v926_v57 = vadd.f32 %v3605_v1, %v857_v51  ;;  %v858_v58 = vmul.f32 %v3603_v63, %v756_v56  ;;  %3176 = vmatprep.mubr.bf16.mxu1 %v1026_v53  ;;  %v1713_v51 = vadd.s32 32, %v3736_v42 }
 0x17e   : > { %v929_v59 = vadd.f32 %v3605_v1, %v860_v55  ;;  %3177 = vmatmul.mubr.bf16.gmra.mrb[44].mxu1 %v1027_v50  ;;  %v992_v61 = vmax.f32 %v928_v54, 0.0  ;;  %v1715_v55 = vadd.s32 48, %v3736_v42 }
 0x17f   : > { %v927_v60 = vadd.f32 %v3605_v1, %v858_v58  ;;  %v990_v0 = vmax.f32 %v926_v57, 0.0 }
 0x180   : > { %v993_v62 = vmax.f32 %v929_v59, 0.0  ;;  %v1714_v59 = vadd.s32 40, %v3736_v42 }
 0x181   : > { %v991_v2 = vmax.f32 %v927_v60, 0.0  ;;  %v3106_v3 = vpop.f32.mrb[56].mxu0 }
 0x182   : > { %v863_v4 = vmul.f32 %v3106_v3, %v3603_v63  ;;  %v769_v5 = vpop.f32.mrb[57].mxu0  ;;  %v1029_v6 = vpack.c.bf16 %v993_v62, %v992_v61  ;;  %v1716_v61 = vadd.s32 56, %v3736_v42 }
 0x183   : > { %v861_v7 = vmul.f32 %v3603_v63, %v769_v5  ;;  %v3107_v8 = vpop.f32.mrb[58].mxu0  ;;  %v1028_v9 = vpack.c.bf16 %v991_v2, %v990_v0 }
 0x184   : > { %v932_v10 = vadd.f32 %v3605_v1, %v863_v4  ;;  %v864_v11 = vmul.f32 %v3107_v8, %v3603_v63  ;;  %v772_v12 = vpop.f32.mrb[59].mxu0 }
 0x185   : > { %v930_v13 = vadd.f32 %v3605_v1, %v861_v7  ;;  %v862_v14 = vmul.f32 %v3603_v63, %v772_v12  ;;  %3180 = vmatprep.mubr.bf16.mxu1 %v1028_v9 }
 0x186   : > { %v933_v15 = vadd.f32 %v3605_v1, %v864_v11  ;;  %3181 = vmatmul.mubr.bf16.gmra.mrb[48].mxu1 %v1029_v6  ;;  %v996_v17 = vmax.f32 %v932_v10, 0.0  ;;  %v1717_v10 = vadd.s32 64, %v3736_v42 }
 0x187   : > { %v931_v16 = vadd.f32 %v3605_v1, %v862_v14  ;;  %v994_v19 = vmax.f32 %v930_v13, 0.0 }
 0x188   : > { %v997_v18 = vmax.f32 %v933_v15, 0.0 }
 0x189   : > { %v995_v20 = vmax.f32 %v931_v16, 0.0  ;;  %v3110_v21 = vpop.f32.mrb[60].mxu0 }
 0x18a   : > { %v867_v22 = vmul.f32 %v3110_v21, %v3603_v63  ;;  %v785_v23 = vpop.f32.mrb[61].mxu0  ;;  %v1031_v24 = vpack.c.bf16 %v997_v18, %v996_v17 }
 0x18b   : > { %v865_v25 = vmul.f32 %v3603_v63, %v785_v23  ;;  %v3111_v26 = vpop.f32.mrb[62].mxu0  ;;  %v1030_v27 = vpack.c.bf16 %v995_v20, %v994_v19  ;;  %v1719_v19 = vadd.s32 80, %v3736_v42  ;;  %v1718_v23 = vadd.s32 72, %v3736_v42 }
 0x18c   : > { %v936_v28 = vadd.f32 %v3605_v1, %v867_v22  ;;  %v868_v29 = vmul.f32 %v3111_v26, %v3603_v63  ;;  %v788_v30 = vpop.f32.mrb[63].mxu0 }
 0x18d   : > { %v934_v31 = vadd.f32 %v3605_v1, %v865_v25  ;;  %v866_v32 = vmul.f32 %v3603_v63, %v788_v30  ;;  %3184 = vmatprep.mubr.bf16.mxu1 %v1030_v27  ;;  %v3738_v63 = vstv %s1774_s26  ;;  %v1720_v25 = vadd.s32 88, %v3736_v42 }
 0x18e   : > { %v937_v33 = vadd.f32 %v3605_v1, %v868_v29  ;;  %3185 = vmatmul.mubr.bf16.gmra.mrb[52].mxu1 %v1031_v24  ;;  %v1000_v35 = vmax.f32 %v936_v28, 0.0  ;;  %vm1776_vm2 = vcmp.lt.s32.totalorder %v3736_v42, %v3738_v63  ;;  %vm1778_vm3 = vcmp.lt.s32.totalorder %v1711_v43, %v3738_v63 }
 0x18f   : > { %v935_v34 = vadd.f32 %v3605_v1, %v866_v32  ;;  %v998_v37 = vmax.f32 %v934_v31, 0.0  ;;  %v1712_v1 = vadd.s32 24, %v3736_v42  ;;  %vm1777_vm4 = vcmp.lt.s32.totalorder %v1710_v44, %v3738_v63 }
 0x190   : > { %v1001_v36 = vmax.f32 %v937_v33, 0.0  ;;  %vm1780_vm6 = vcmp.lt.s32.totalorder %v1713_v51, %v3738_v63  ;;  %vm1782_vm7 = vcmp.lt.s32.totalorder %v1715_v55, %v3738_v63  ;;  %vm1781_vm8 = vcmp.lt.s32.totalorder %v1714_v59, %v3738_v63 }
 0x191   : > { %v999_v38 = vmax.f32 %v935_v34, 0.0  ;;  %vm1779_vm5 = vcmp.lt.s32.totalorder %v1712_v1, %v3738_v63  ;;  %vm1783_vm9 = vcmp.lt.s32.totalorder %v1716_v61, %v3738_v63  ;;  %vm1784_vm10 = vcmp.lt.s32.totalorder %v1717_v10, %v3738_v63 }
 0x192   : > { %v1033_v39 = vpack.c.bf16 %v1001_v36, %v1000_v35  ;;  %vm1786_vm11 = vcmp.lt.s32.totalorder %v1719_v19, %v3738_v63  ;;  %vm1785_vm12 = vcmp.lt.s32.totalorder %v1718_v23, %v3738_v63  ;;  %vm1787_vm13 = vcmp.lt.s32.totalorder %v1720_v25, %v3738_v63 }
 0x193   : > { %v1032_v40 = vpack.c.bf16 %v999_v38, %v998_v37  ;;  %v1721_v36 = vadd.s32 96, %v3736_v42  ;;  %v1724_v51 = vadd.s32 120, %v3736_v42 }
 0x195   : > { %3188 = vmatprep.mubr.bf16.mxu1 %v1032_v40  ;;  %vm1788_vm14 = vcmp.lt.s32.totalorder %v1721_v36, %v3738_v63  ;;  %vm1791_vm1 = vcmp.lt.s32.totalorder %v1724_v51, %v3738_v63 }
 0x196   : > { %3189 = vmatmul.mubr.bf16.gmra.mrb[56].mxu1 %v1033_v39 }
 0x1f1   : > { %v3130_v45 = vpop.f32.mrb[64].mxu0 }
 0x1f2   : > { %v1132_v46 = vpop.f32.mrb[65].mxu0  ;;  %v1842_v52 = vsel %vm1778_vm3, %v3130_v45, 0.0 }
 0x1f3   : > { %v1840_v47 = vsel %vm1776_vm2, %v1132_v46, 0.0  ;;  %v3131_v48 = vpop.f32.mrb[66].mxu0  ;;  %v1975_v62 = vmul.f32 %v1842_v52, %v1842_v52 }
 0x1f4   : > { %v2790_v49 = vpack.c.bf16 %v3131_v48, %v3130_v45  ;;  %v1135_v50 = vpop.f32.mrb[67].mxu0  ;;  %v1973_v56 = vmul.f32 %v1840_v47, %v1840_v47  ;;  %v1843_v60 = vsel %vm1779_vm5, %v3131_v48, 0.0  ;;  %v1723_v45 = vadd.s32 112, %v3736_v42 }
 0x1f5   : > { %v2785_v53 = vpack.c.bf16 %v1135_v50, %v1132_v46  ;;  %v1841_v54 = vsel %vm1777_vm4, %v1135_v50, 0.0  ;;  %v1976_v4 = vmul.f32 %v1843_v60, %v1843_v60 }
 0x1f6   : > { %2942 = vst [vmem:[%s3468_s14 + $0x8] sm:$0xff] %v2790_v49   ;;  %v1904_v57 = vadd.f32 %v1841_v54, %v1840_v47  ;;  %v1974_v58 = vmul.f32 %v1841_v54, %v1841_v54  ;;  %v1722_v49 = vadd.s32 104, %v3736_v42  ;;  %vm1790_vm15 = vcmp.lt.s32.totalorder %v1723_v45, %v3738_v63 }
 0x1f7   : > { %2786 = vst [vmem:[%s3468_s14] sm:$0xff] %v2785_v53  }
 0x1f8   : > { %v1905_v0 = vadd.f32 %v1904_v57, %v1842_v52  ;;  %v2037_v2 = vadd.f32 %v1974_v58, %v1973_v56  ;;  %vm1789_vm0 = vcmp.lt.s32.totalorder %v1722_v49, %v3738_v63 }
 0x1f9   : > { %v3134_v3 = vpop.f32.mrb[0].mxu1 }
 0x1fa   : > { %v2038_v5 = vadd.f32 %v2037_v2, %v1975_v62  ;;  %v1148_v6 = vpop.f32.mrb[1].mxu1  ;;  %v1906_v7 = vadd.f32 %v1905_v0, %v1843_v60  ;;  %v1846_v16 = vsel %vm1782_vm7, %v3134_v3, 0.0  ;;  %v1725_v62 = vadd.s32 128, %v3736_v42 }
 0x1fb   : > { %v1844_v8 = vsel %vm1780_vm6, %v1148_v6, 0.0  ;;  %v3135_v9 = vpop.f32.mrb[2].mxu1  ;;  %v1979_v26 = vmul.f32 %v1846_v16, %v1846_v16 }
 0x1fc   : > { %v1907_v11 = vadd.f32 %v1906_v7, %v1844_v8  ;;  %v1977_v12 = vmul.f32 %v1844_v8, %v1844_v8  ;;  %v2039_v13 = vadd.f32 %v2038_v5, %v1976_v4  ;;  %v2800_v14 = vpack.c.bf16 %v3135_v9, %v3134_v3  ;;  %v1151_v15 = vpop.f32.mrb[3].mxu1 }
 0x1fd   : > { %v2795_v17 = vpack.c.bf16 %v1151_v15, %v1148_v6  ;;  %v1845_v18 = vsel %vm1781_vm8, %v1151_v15, 0.0  ;;  %v1847_v24 = vsel %vm1783_vm9, %v3135_v9, 0.0  ;;  %v1727_v9 = vadd.s32 144, %v3736_v42 }
 0x1fe   : > { %v2040_v20 = vadd.f32 %v2039_v13, %v1977_v12  ;;  %2944 = vst [vmem:[%s3468_s14 + $0x18] sm:$0xff] %v2800_v14   ;;  %v1908_v21 = vadd.f32 %v1907_v11, %v1845_v18  ;;  %v1978_v22 = vmul.f32 %v1845_v18, %v1845_v18  ;;  %v1980_v30 = vmul.f32 %v1847_v24, %v1847_v24 }
 0x1ff   : > { %2943 = vst [vmem:[%s3468_s14 + $0x10] sm:$0xff] %v2795_v17   ;;  %v1726_v13 = vadd.s32 136, %v3736_v42  ;;  %v1728_v15 = vadd.s32 152, %v3736_v42  ;;  %vm1792_vm2 = vcmp.lt.s32.totalorder %v1725_v62, %v3738_v63  ;;  %vm1794_vm3 = vcmp.lt.s32.totalorder %v1727_v9, %v3738_v63 }
 0x200   : > { %v1909_v27 = vadd.f32 %v1908_v21, %v1846_v16  ;;  %v2041_v28 = vadd.f32 %v2040_v20, %v1978_v22 }
 0x201   : > { %v3138_v29 = vpop.f32.mrb[4].mxu1  ;;  %vm1793_vm4 = vcmp.lt.s32.totalorder %v1726_v13, %v3738_v63  ;;  %vm1795_vm5 = vcmp.lt.s32.totalorder %v1728_v15, %v3738_v63 }
 0x202   : > { %v2042_v31 = vadd.f32 %v2041_v28, %v1979_v26  ;;  %v1164_v32 = vpop.f32.mrb[5].mxu1  ;;  %v1910_v33 = vadd.f32 %v1909_v27, %v1847_v24  ;;  %v1850_v43 = vsel %vm1786_vm11, %v3138_v29, 0.0  ;;  %v1729_v26 = vadd.s32 160, %v3736_v42 }
 0x203   : > { %v1848_v34 = vsel %vm1784_vm10, %v1164_v32, 0.0  ;;  %v3139_v35 = vpop.f32.mrb[6].mxu1  ;;  %v1983_v52 = vmul.f32 %v1850_v43, %v1850_v43 }
 0x204   : > { %v1911_v37 = vadd.f32 %v1910_v33, %v1848_v34  ;;  %v1981_v38 = vmul.f32 %v1848_v34, %v1848_v34  ;;  %v2043_v39 = vadd.f32 %v2042_v31, %v1980_v30  ;;  %v2810_v40 = vpack.c.bf16 %v3139_v35, %v3138_v29  ;;  %v1167_v41 = vpop.f32.mrb[7].mxu1 }
 0x205   : > { %v2805_v44 = vpack.c.bf16 %v1167_v41, %v1164_v32  ;;  %v1849_v1 = vsel %vm1785_vm12, %v1167_v41, 0.0  ;;  %v1851_v50 = vsel %vm1787_vm13, %v3139_v35, 0.0  ;;  %v1731_v35 = vadd.s32 176, %v3736_v42 }
 0x206   : > { %v2044_v46 = vadd.f32 %v2043_v39, %v1981_v38  ;;  %2946 = vst [vmem:[%s3468_s14 + $0x28] sm:$0xff] %v2810_v40   ;;  %v1912_v47 = vadd.f32 %v1911_v37, %v1849_v1  ;;  %v1982_v48 = vmul.f32 %v1849_v1, %v1849_v1  ;;  %v1984_v56 = vmul.f32 %v1851_v50, %v1851_v50 }
 0x207   : > { %2945 = vst [vmem:[%s3468_s14 + $0x20] sm:$0xff] %v2805_v44   ;;  %v1730_v39 = vadd.s32 168, %v3736_v42  ;;  %v1732_v41 = vadd.s32 184, %v3736_v42  ;;  %vm1796_vm6 = vcmp.lt.s32.totalorder %v1729_v26, %v3738_v63  ;;  %vm1798_vm7 = vcmp.lt.s32.totalorder %v1731_v35, %v3738_v63 }
 0x208   : > { %v1913_v53 = vadd.f32 %v1912_v47, %v1850_v43  ;;  %v2045_v54 = vadd.f32 %v2044_v46, %v1982_v48 }
 0x209   : > { %v3142_v55 = vpop.f32.mrb[8].mxu1  ;;  %vm1797_vm8 = vcmp.lt.s32.totalorder %v1730_v39, %v3738_v63  ;;  %vm1799_vm9 = vcmp.lt.s32.totalorder %v1732_v41, %v3738_v63 }
 0x20a   : > { %v2046_v57 = vadd.f32 %v2045_v54, %v1983_v52  ;;  %v1180_v58 = vpop.f32.mrb[9].mxu1  ;;  %v1914_v59 = vadd.f32 %v1913_v53, %v1851_v50  ;;  %v1854_v6 = vsel %vm1790_vm15, %v3142_v55, 0.0  ;;  %v1733_v52 = vadd.s32 192, %v3736_v42 }
 0x20b   : > { %v1852_v60 = vsel %vm1788_vm14, %v1180_v58, 0.0  ;;  %v3143_v61 = vpop.f32.mrb[10].mxu1  ;;  %v1987_v16 = vmul.f32 %v1854_v6, %v1854_v6 }
 0x20c   : > { %v1915_v0 = vadd.f32 %v1914_v59, %v1852_v60  ;;  %v1985_v2 = vmul.f32 %v1852_v60, %v1852_v60  ;;  %v2047_v3 = vadd.f32 %v2046_v57, %v1984_v56  ;;  %v2820_v4 = vpack.c.bf16 %v3143_v61, %v3142_v55  ;;  %v1183_v5 = vpop.f32.mrb[11].mxu1 }
 0x20d   : > { %v2815_v7 = vpack.c.bf16 %v1183_v5, %v1180_v58  ;;  %v1853_v8 = vsel %vm1789_vm0, %v1183_v5, 0.0  ;;  %v1855_v14 = vsel %vm1791_vm1, %v3143_v61, 0.0  ;;  %v1735_v61 = vadd.s32 208, %v3736_v42 }
 0x20e   : > { %v2048_v10 = vadd.f32 %v2047_v3, %v1985_v2  ;;  %2948 = vst [vmem:[%s3468_s14 + $0x38] sm:$0xff] %v2820_v4   ;;  %v1916_v11 = vadd.f32 %v1915_v0, %v1853_v8  ;;  %v1986_v12 = vmul.f32 %v1853_v8, %v1853_v8  ;;  %v1988_v20 = vmul.f32 %v1855_v14, %v1855_v14 }
 0x20f   : > { %2947 = vst [vmem:[%s3468_s14 + $0x30] sm:$0xff] %v2815_v7   ;;  %v1734_v3 = vadd.s32 200, %v3736_v42  ;;  %v1736_v5 = vadd.s32 216, %v3736_v42  ;;  %vm1800_vm10 = vcmp.lt.s32.totalorder %v1733_v52, %v3738_v63  ;;  %vm1802_vm11 = vcmp.lt.s32.totalorder %v1735_v61, %v3738_v63 }
 0x210   : > { %v1917_v17 = vadd.f32 %v1916_v11, %v1854_v6  ;;  %v2049_v18 = vadd.f32 %v2048_v10, %v1986_v12 }
 0x211   : > { %v3146_v19 = vpop.f32.mrb[12].mxu1  ;;  %vm1801_vm12 = vcmp.lt.s32.totalorder %v1734_v3, %v3738_v63  ;;  %vm1803_vm13 = vcmp.lt.s32.totalorder %v1736_v5, %v3738_v63 }
 0x212   : > { %v2050_v21 = vadd.f32 %v2049_v18, %v1987_v16  ;;  %v1196_v22 = vpop.f32.mrb[13].mxu1  ;;  %v1918_v23 = vadd.f32 %v1917_v17, %v1855_v14  ;;  %v1858_v32 = vsel %vm1794_vm3, %v3146_v19, 0.0  ;;  %v1737_v16 = vadd.s32 224, %v3736_v42 }
 0x213   : > { %v1856_v24 = vsel %vm1792_vm2, %v1196_v22, 0.0  ;;  %v3147_v25 = vpop.f32.mrb[14].mxu1  ;;  %v1991_v43 = vmul.f32 %v1858_v32, %v1858_v32 }
 0x214   : > { %v1919_v27 = vadd.f32 %v1918_v23, %v1856_v24  ;;  %v1989_v28 = vmul.f32 %v1856_v24, %v1856_v24  ;;  %v2051_v29 = vadd.f32 %v2050_v21, %v1988_v20  ;;  %v2830_v30 = vpack.c.bf16 %v3147_v25, %v3146_v19  ;;  %v1199_v31 = vpop.f32.mrb[15].mxu1 }
 0x215   : > { %v2825_v33 = vpack.c.bf16 %v1199_v31, %v1196_v22  ;;  %v1857_v34 = vsel %vm1793_vm4, %v1199_v31, 0.0  ;;  %v1859_v40 = vsel %vm1795_vm5, %v3147_v25, 0.0  ;;  %v1739_v25 = vadd.s32 240, %v3736_v42 }
 0x216   : > { %v2052_v36 = vadd.f32 %v2051_v29, %v1989_v28  ;;  %2950 = vst [vmem:[%s3468_s14 + $0x48] sm:$0xff] %v2830_v30   ;;  %v1920_v37 = vadd.f32 %v1919_v27, %v1857_v34  ;;  %v1990_v38 = vmul.f32 %v1857_v34, %v1857_v34  ;;  %v1992_v46 = vmul.f32 %v1859_v40, %v1859_v40 }
 0x217   : > { %2949 = vst [vmem:[%s3468_s14 + $0x40] sm:$0xff] %v2825_v33   ;;  %v1738_v29 = vadd.s32 232, %v3736_v42  ;;  %v1740_v31 = vadd.s32 248, %v3736_v42  ;;  %vm1804_vm14 = vcmp.lt.s32.totalorder %v1737_v16, %v3738_v63  ;;  %vm1806_vm15 = vcmp.lt.s32.totalorder %v1739_v25, %v3738_v63 }
 0x218   : > { %v1921_v44 = vadd.f32 %v1920_v37, %v1858_v32  ;;  %v2053_v1 = vadd.f32 %v2052_v36, %v1990_v38 }
 0x219   : > { %v3150_v45 = vpop.f32.mrb[16].mxu1  ;;  %vm1805_vm0 = vcmp.lt.s32.totalorder %v1738_v29, %v3738_v63  ;;  %vm1807_vm1 = vcmp.lt.s32.totalorder %v1740_v31, %v3738_v63 }
 0x21a   : > { %v2054_v47 = vadd.f32 %v2053_v1, %v1991_v43  ;;  %v1212_v48 = vpop.f32.mrb[17].mxu1  ;;  %v1922_v49 = vadd.f32 %v1921_v44, %v1859_v40  ;;  %v1862_v58 = vsel %vm1798_vm7, %v3150_v45, 0.0  ;;  %v1741_v43 = vadd.s32 256, %v3736_v42 }
 0x21b   : > { %v1860_v50 = vsel %vm1796_vm6, %v1212_v48, 0.0  ;;  %v3151_v51 = vpop.f32.mrb[18].mxu1  ;;  %v1995_v6 = vmul.f32 %v1862_v58, %v1862_v58 }
 0x21c   : > { %v1923_v53 = vadd.f32 %v1922_v49, %v1860_v50  ;;  %v1993_v54 = vmul.f32 %v1860_v50, %v1860_v50  ;;  %v2055_v55 = vadd.f32 %v2054_v47, %v1992_v46  ;;  %v2840_v56 = vpack.c.bf16 %v3151_v51, %v3150_v45  ;;  %v1215_v57 = vpop.f32.mrb[19].mxu1 }
 0x21d   : > { %v2835_v59 = vpack.c.bf16 %v1215_v57, %v1212_v48  ;;  %v1861_v60 = vsel %vm1797_vm8, %v1215_v57, 0.0  ;;  %v1863_v4 = vsel %vm1799_vm9, %v3151_v51, 0.0  ;;  %v1743_v51 = vadd.s32 272, %v3736_v42 }
 0x21e   : > { %v2056_v62 = vadd.f32 %v2055_v55, %v1993_v54  ;;  %2952 = vst [vmem:[%s3468_s14 + $0x58] sm:$0xff] %v2840_v56   ;;  %v1924_v0 = vadd.f32 %v1923_v53, %v1861_v60  ;;  %v1994_v2 = vmul.f32 %v1861_v60, %v1861_v60  ;;  %v1996_v10 = vmul.f32 %v1863_v4, %v1863_v4 }
 0x21f   : > { %2951 = vst [vmem:[%s3468_s14 + $0x50] sm:$0xff] %v2835_v59   ;;  %v1742_v55 = vadd.s32 264, %v3736_v42  ;;  %v1744_v57 = vadd.s32 280, %v3736_v42  ;;  %vm1808_vm2 = vcmp.lt.s32.totalorder %v1741_v43, %v3738_v63  ;;  %vm1810_vm3 = vcmp.lt.s32.totalorder %v1743_v51, %v3738_v63 }
 0x220   : > { %v1925_v7 = vadd.f32 %v1924_v0, %v1862_v58  ;;  %v2057_v8 = vadd.f32 %v2056_v62, %v1994_v2 }
 0x221   : > { %v3154_v9 = vpop.f32.mrb[20].mxu1  ;;  %vm1809_vm4 = vcmp.lt.s32.totalorder %v1742_v55, %v3738_v63  ;;  %vm1811_vm5 = vcmp.lt.s32.totalorder %v1744_v57, %v3738_v63 }
 0x222   : > { %v2058_v11 = vadd.f32 %v2057_v8, %v1995_v6  ;;  %v1228_v12 = vpop.f32.mrb[21].mxu1  ;;  %v1926_v13 = vadd.f32 %v1925_v7, %v1863_v4  ;;  %v1866_v22 = vsel %vm1802_vm11, %v3154_v9, 0.0  ;;  %v1745_v6 = vadd.s32 288, %v3736_v42 }
 0x223   : > { %v1864_v14 = vsel %vm1800_vm10, %v1228_v12, 0.0  ;;  %v3155_v15 = vpop.f32.mrb[22].mxu1  ;;  %v1999_v32 = vmul.f32 %v1866_v22, %v1866_v22 }
 0x224   : > { %v1927_v17 = vadd.f32 %v1926_v13, %v1864_v14  ;;  %v1997_v18 = vmul.f32 %v1864_v14, %v1864_v14  ;;  %v2059_v19 = vadd.f32 %v2058_v11, %v1996_v10  ;;  %v2850_v20 = vpack.c.bf16 %v3155_v15, %v3154_v9  ;;  %v1231_v21 = vpop.f32.mrb[23].mxu1 }
 0x225   : > { %v2845_v23 = vpack.c.bf16 %v1231_v21, %v1228_v12  ;;  %v1865_v24 = vsel %vm1801_vm12, %v1231_v21, 0.0  ;;  %v1867_v30 = vsel %vm1803_vm13, %v3155_v15, 0.0  ;;  %v1747_v15 = vadd.s32 304, %v3736_v42 }
 0x226   : > { %v2060_v26 = vadd.f32 %v2059_v19, %v1997_v18  ;;  %2954 = vst [vmem:[%s3468_s14 + $0x68] sm:$0xff] %v2850_v20   ;;  %v1928_v27 = vadd.f32 %v1927_v17, %v1865_v24  ;;  %v1998_v28 = vmul.f32 %v1865_v24, %v1865_v24  ;;  %v2000_v36 = vmul.f32 %v1867_v30, %v1867_v30 }
 0x227   : > { %2953 = vst [vmem:[%s3468_s14 + $0x60] sm:$0xff] %v2845_v23   ;;  %v1746_v19 = vadd.s32 296, %v3736_v42  ;;  %v1748_v21 = vadd.s32 312, %v3736_v42  ;;  %vm1812_vm6 = vcmp.lt.s32.totalorder %v1745_v6, %v3738_v63  ;;  %vm1814_vm7 = vcmp.lt.s32.totalorder %v1747_v15, %v3738_v63 }
 0x228   : > { %v1929_v33 = vadd.f32 %v1928_v27, %v1866_v22  ;;  %v2061_v34 = vadd.f32 %v2060_v26, %v1998_v28 }
 0x229   : > { %v3158_v35 = vpop.f32.mrb[24].mxu1  ;;  %vm1813_vm8 = vcmp.lt.s32.totalorder %v1746_v19, %v3738_v63  ;;  %vm1815_vm9 = vcmp.lt.s32.totalorder %v1748_v21, %v3738_v63 }
 0x22a   : > { %v2062_v37 = vadd.f32 %v2061_v34, %v1999_v32  ;;  %v1244_v38 = vpop.f32.mrb[25].mxu1  ;;  %v1930_v39 = vadd.f32 %v1929_v33, %v1867_v30  ;;  %v1870_v48 = vsel %vm1806_vm15, %v3158_v35, 0.0  ;;  %v1749_v32 = vadd.s32 320, %v3736_v42 }
 0x22b   : > { %v1868_v40 = vsel %vm1804_vm14, %v1244_v38, 0.0  ;;  %v3159_v41 = vpop.f32.mrb[26].mxu1  ;;  %v2003_v58 = vmul.f32 %v1870_v48, %v1870_v48 }
 0x22c   : > { %v1931_v44 = vadd.f32 %v1930_v39, %v1868_v40  ;;  %v2001_v1 = vmul.f32 %v1868_v40, %v1868_v40  ;;  %v2063_v45 = vadd.f32 %v2062_v37, %v2000_v36  ;;  %v2860_v46 = vpack.c.bf16 %v3159_v41, %v3158_v35  ;;  %v1247_v47 = vpop.f32.mrb[27].mxu1 }
 0x22d   : > { %v2855_v49 = vpack.c.bf16 %v1247_v47, %v1244_v38  ;;  %v1869_v50 = vsel %vm1805_vm0, %v1247_v47, 0.0  ;;  %v1871_v56 = vsel %vm1807_vm1, %v3159_v41, 0.0  ;;  %v1751_v41 = vadd.s32 336, %v3736_v42 }
 0x22e   : > { %v2064_v52 = vadd.f32 %v2063_v45, %v2001_v1  ;;  %2956 = vst [vmem:[%s3468_s14 + $0x78] sm:$0xff] %v2860_v46   ;;  %v1932_v53 = vadd.f32 %v1931_v44, %v1869_v50  ;;  %v2002_v54 = vmul.f32 %v1869_v50, %v1869_v50  ;;  %v2004_v62 = vmul.f32 %v1871_v56, %v1871_v56 }
 0x22f   : > { %2955 = vst [vmem:[%s3468_s14 + $0x70] sm:$0xff] %v2855_v49   ;;  %v1750_v45 = vadd.s32 328, %v3736_v42  ;;  %v1752_v47 = vadd.s32 344, %v3736_v42  ;;  %vm1816_vm10 = vcmp.lt.s32.totalorder %v1749_v32, %v3738_v63  ;;  %vm1818_vm11 = vcmp.lt.s32.totalorder %v1751_v41, %v3738_v63 }
 0x230   : > { %v1933_v59 = vadd.f32 %v1932_v53, %v1870_v48  ;;  %v2065_v60 = vadd.f32 %v2064_v52, %v2002_v54 }
 0x231   : > { %v3162_v61 = vpop.f32.mrb[28].mxu1  ;;  %vm1817_vm12 = vcmp.lt.s32.totalorder %v1750_v45, %v3738_v63  ;;  %vm1819_vm13 = vcmp.lt.s32.totalorder %v1752_v47, %v3738_v63 }
 0x232   : > { %v2066_v0 = vadd.f32 %v2065_v60, %v2003_v58  ;;  %v1260_v2 = vpop.f32.mrb[29].mxu1  ;;  %v1934_v3 = vadd.f32 %v1933_v59, %v1871_v56  ;;  %v1874_v12 = vsel %vm1810_vm3, %v3162_v61, 0.0  ;;  %v1753_v58 = vadd.s32 352, %v3736_v42 }
 0x233   : > { %v1872_v4 = vsel %vm1808_vm2, %v1260_v2, 0.0  ;;  %v3163_v5 = vpop.f32.mrb[30].mxu1  ;;  %v2007_v22 = vmul.f32 %v1874_v12, %v1874_v12 }
 0x234   : > { %v1935_v7 = vadd.f32 %v1934_v3, %v1872_v4  ;;  %v2005_v8 = vmul.f32 %v1872_v4, %v1872_v4  ;;  %v2067_v9 = vadd.f32 %v2066_v0, %v2004_v62  ;;  %v2870_v10 = vpack.c.bf16 %v3163_v5, %v3162_v61  ;;  %v1263_v11 = vpop.f32.mrb[31].mxu1 }
 0x235   : > { %v2865_v13 = vpack.c.bf16 %v1263_v11, %v1260_v2  ;;  %v1873_v14 = vsel %vm1809_vm4, %v1263_v11, 0.0  ;;  %v1875_v20 = vsel %vm1811_vm5, %v3163_v5, 0.0  ;;  %v1755_v5 = vadd.s32 368, %v3736_v42 }
 0x236   : > { %v2068_v16 = vadd.f32 %v2067_v9, %v2005_v8  ;;  %2958 = vst [vmem:[%s3468_s14 + $0x88] sm:$0xff] %v2870_v10   ;;  %v1936_v17 = vadd.f32 %v1935_v7, %v1873_v14  ;;  %v2006_v18 = vmul.f32 %v1873_v14, %v1873_v14  ;;  %v2008_v26 = vmul.f32 %v1875_v20, %v1875_v20 }
 0x237   : > { %2957 = vst [vmem:[%s3468_s14 + $0x80] sm:$0xff] %v2865_v13   ;;  %v1754_v9 = vadd.s32 360, %v3736_v42  ;;  %v1756_v11 = vadd.s32 376, %v3736_v42  ;;  %vm1820_vm14 = vcmp.lt.s32.totalorder %v1753_v58, %v3738_v63  ;;  %vm1822_vm15 = vcmp.lt.s32.totalorder %v1755_v5, %v3738_v63 }
 0x238   : > { %v1937_v23 = vadd.f32 %v1936_v17, %v1874_v12  ;;  %v2069_v24 = vadd.f32 %v2068_v16, %v2006_v18 }
 0x239   : > { %v3166_v25 = vpop.f32.mrb[32].mxu1  ;;  %vm1821_vm0 = vcmp.lt.s32.totalorder %v1754_v9, %v3738_v63  ;;  %vm1823_vm1 = vcmp.lt.s32.totalorder %v1756_v11, %v3738_v63 }
 0x23a   : > { %v2070_v27 = vadd.f32 %v2069_v24, %v2007_v22  ;;  %v1276_v28 = vpop.f32.mrb[33].mxu1  ;;  %v1938_v29 = vadd.f32 %v1937_v23, %v1875_v20  ;;  %v1878_v38 = vsel %vm1814_vm7, %v3166_v25, 0.0  ;;  %v1757_v22 = vadd.s32 384, %v3736_v42 }
 0x23b   : > { %v1876_v30 = vsel %vm1812_vm6, %v1276_v28, 0.0  ;;  %v3167_v31 = vpop.f32.mrb[34].mxu1  ;;  %v2011_v48 = vmul.f32 %v1878_v38, %v1878_v38 }
 0x23c   : > { %v1939_v33 = vadd.f32 %v1938_v29, %v1876_v30  ;;  %v2009_v34 = vmul.f32 %v1876_v30, %v1876_v30  ;;  %v2071_v35 = vadd.f32 %v2070_v27, %v2008_v26  ;;  %v2880_v36 = vpack.c.bf16 %v3167_v31, %v3166_v25  ;;  %v1279_v37 = vpop.f32.mrb[35].mxu1 }
 0x23d   : > { %v2875_v39 = vpack.c.bf16 %v1279_v37, %v1276_v28  ;;  %v1877_v40 = vsel %vm1813_vm8, %v1279_v37, 0.0  ;;  %v1879_v46 = vsel %vm1815_vm9, %v3167_v31, 0.0  ;;  %v1759_v31 = vadd.s32 400, %v3736_v42 }
 0x23e   : > { %v2072_v43 = vadd.f32 %v2071_v35, %v2009_v34  ;;  %2960 = vst [vmem:[%s3468_s14 + $0x98] sm:$0xff] %v2880_v36   ;;  %v1940_v44 = vadd.f32 %v1939_v33, %v1877_v40  ;;  %v2010_v1 = vmul.f32 %v1877_v40, %v1877_v40  ;;  %v2012_v52 = vmul.f32 %v1879_v46, %v1879_v46 }
 0x23f   : > { %2959 = vst [vmem:[%s3468_s14 + $0x90] sm:$0xff] %v2875_v39   ;;  %v1758_v35 = vadd.s32 392, %v3736_v42  ;;  %v1760_v37 = vadd.s32 408, %v3736_v42  ;;  %vm1824_vm2 = vcmp.lt.s32.totalorder %v1757_v22, %v3738_v63  ;;  %vm1826_vm3 = vcmp.lt.s32.totalorder %v1759_v31, %v3738_v63 }
 0x240   : > { %v1941_v49 = vadd.f32 %v1940_v44, %v1878_v38  ;;  %v2073_v50 = vadd.f32 %v2072_v43, %v2010_v1 }
 0x241   : > { %v3170_v51 = vpop.f32.mrb[36].mxu1  ;;  %vm1825_vm4 = vcmp.lt.s32.totalorder %v1758_v35, %v3738_v63  ;;  %vm1827_vm5 = vcmp.lt.s32.totalorder %v1760_v37, %v3738_v63 }
 0x242   : > { %v2074_v53 = vadd.f32 %v2073_v50, %v2011_v48  ;;  %v1292_v54 = vpop.f32.mrb[37].mxu1  ;;  %v1942_v55 = vadd.f32 %v1941_v49, %v1879_v46  ;;  %v1882_v2 = vsel %vm1818_vm11, %v3170_v51, 0.0  ;;  %v1761_v48 = vadd.s32 416, %v3736_v42 }
 0x243   : > { %v1880_v56 = vsel %vm1816_vm10, %v1292_v54, 0.0  ;;  %v3171_v57 = vpop.f32.mrb[38].mxu1  ;;  %v2015_v12 = vmul.f32 %v1882_v2, %v1882_v2 }
 0x244   : > { %v1943_v59 = vadd.f32 %v1942_v55, %v1880_v56  ;;  %v2013_v60 = vmul.f32 %v1880_v56, %v1880_v56  ;;  %v2075_v61 = vadd.f32 %v2074_v53, %v2012_v52  ;;  %v2890_v62 = vpack.c.bf16 %v3171_v57, %v3170_v51  ;;  %v1295_v0 = vpop.f32.mrb[39].mxu1 }
 0x245   : > { %v2885_v3 = vpack.c.bf16 %v1295_v0, %v1292_v54  ;;  %v1881_v4 = vsel %vm1817_vm12, %v1295_v0, 0.0  ;;  %v1883_v10 = vsel %vm1819_vm13, %v3171_v57, 0.0  ;;  %v1763_v57 = vadd.s32 432, %v3736_v42 }
 0x246   : > { %v2076_v6 = vadd.f32 %v2075_v61, %v2013_v60  ;;  %2962 = vst [vmem:[%s3468_s14 + $0xa8] sm:$0xff] %v2890_v62   ;;  %v1944_v7 = vadd.f32 %v1943_v59, %v1881_v4  ;;  %v2014_v8 = vmul.f32 %v1881_v4, %v1881_v4  ;;  %v2016_v16 = vmul.f32 %v1883_v10, %v1883_v10 }
 0x247   : > { %2961 = vst [vmem:[%s3468_s14 + $0xa0] sm:$0xff] %v2885_v3   ;;  %v1762_v61 = vadd.s32 424, %v3736_v42  ;;  %v1764_v0 = vadd.s32 440, %v3736_v42  ;;  %vm1828_vm6 = vcmp.lt.s32.totalorder %v1761_v48, %v3738_v63  ;;  %vm1830_vm7 = vcmp.lt.s32.totalorder %v1763_v57, %v3738_v63 }
 0x248   : > { %v1945_v13 = vadd.f32 %v1944_v7, %v1882_v2  ;;  %v2077_v14 = vadd.f32 %v2076_v6, %v2014_v8 }
 0x249   : > { %v3174_v15 = vpop.f32.mrb[40].mxu1  ;;  %vm1829_vm8 = vcmp.lt.s32.totalorder %v1762_v61, %v3738_v63  ;;  %vm1831_vm9 = vcmp.lt.s32.totalorder %v1764_v0, %v3738_v63 }
 0x24a   : > { %v2078_v17 = vadd.f32 %v2077_v14, %v2015_v12  ;;  %v1308_v18 = vpop.f32.mrb[41].mxu1  ;;  %v1946_v19 = vadd.f32 %v1945_v13, %v1883_v10  ;;  %v1886_v28 = vsel %vm1822_vm15, %v3174_v15, 0.0  ;;  %v1765_v12 = vadd.s32 448, %v3736_v42 }
 0x24b   : > { %v1884_v20 = vsel %vm1820_vm14, %v1308_v18, 0.0  ;;  %v3175_v21 = vpop.f32.mrb[42].mxu1  ;;  %v2019_v38 = vmul.f32 %v1886_v28, %v1886_v28 }
 0x24c   : > { %v1947_v23 = vadd.f32 %v1946_v19, %v1884_v20  ;;  %v2017_v24 = vmul.f32 %v1884_v20, %v1884_v20  ;;  %v2079_v25 = vadd.f32 %v2078_v17, %v2016_v16  ;;  %v2900_v26 = vpack.c.bf16 %v3175_v21, %v3174_v15  ;;  %v1311_v27 = vpop.f32.mrb[43].mxu1 }
 0x24d   : > { %v2895_v29 = vpack.c.bf16 %v1311_v27, %v1308_v18  ;;  %v1885_v30 = vsel %vm1821_vm0, %v1311_v27, 0.0  ;;  %v1887_v36 = vsel %vm1823_vm1, %v3175_v21, 0.0  ;;  %v1767_v21 = vadd.s32 464, %v3736_v42 }
 0x24e   : > { %v2080_v32 = vadd.f32 %v2079_v25, %v2017_v24  ;;  %2964 = vst [vmem:[%s3468_s14 + $0xb8] sm:$0xff] %v2900_v26   ;;  %v1948_v33 = vadd.f32 %v1947_v23, %v1885_v30  ;;  %v2018_v34 = vmul.f32 %v1885_v30, %v1885_v30  ;;  %v2020_v43 = vmul.f32 %v1887_v36, %v1887_v36 }
 0x24f   : > { %2963 = vst [vmem:[%s3468_s14 + $0xb0] sm:$0xff] %v2895_v29   ;;  %v1766_v25 = vadd.s32 456, %v3736_v42  ;;  %v1768_v27 = vadd.s32 472, %v3736_v42  ;;  %vm1832_vm10 = vcmp.lt.s32.totalorder %v1765_v12, %v3738_v63  ;;  %vm1834_vm11 = vcmp.lt.s32.totalorder %v1767_v21, %v3738_v63 }
 0x250   : > { %v1949_v39 = vadd.f32 %v1948_v33, %v1886_v28  ;;  %v2081_v40 = vadd.f32 %v2080_v32, %v2018_v34 }
 0x251   : > { %v3178_v41 = vpop.f32.mrb[44].mxu1  ;;  %vm1833_vm12 = vcmp.lt.s32.totalorder %v1766_v25, %v3738_v63  ;;  %vm1835_vm13 = vcmp.lt.s32.totalorder %v1768_v27, %v3738_v63 }
 0x252   : > { %v2082_v44 = vadd.f32 %v2081_v40, %v2019_v38  ;;  %v1324_v1 = vpop.f32.mrb[45].mxu1  ;;  %v1950_v45 = vadd.f32 %v1949_v39, %v1887_v36  ;;  %v1890_v54 = vsel %vm1826_vm3, %v3178_v41, 0.0  ;;  %v1769_v38 = vadd.s32 480, %v3736_v42 }
 0x253   : > { %v1888_v46 = vsel %vm1824_vm2, %v1324_v1, 0.0  ;;  %v3179_v47 = vpop.f32.mrb[46].mxu1  ;;  %v2023_v2 = vmul.f32 %v1890_v54, %v1890_v54  ;;  %vm2106_vm2 = vcmp.eq.s32.totalorder %v3736_v42, 0 }
 0x254   : > { %v1951_v49 = vadd.f32 %v1950_v45, %v1888_v46  ;;  %v2021_v50 = vmul.f32 %v1888_v46, %v1888_v46  ;;  %v2083_v51 = vadd.f32 %v2082_v44, %v2020_v43  ;;  %v2910_v52 = vpack.c.bf16 %v3179_v47, %v3178_v41  ;;  %v1327_v53 = vpop.f32.mrb[47].mxu1 }
 0x255   : > { %v2905_v55 = vpack.c.bf16 %v1327_v53, %v1324_v1  ;;  %v1889_v56 = vsel %vm1825_vm4, %v1327_v53, 0.0  ;;  %v1891_v62 = vsel %vm1827_vm5, %v3179_v47, 0.0  ;;  %v1771_v47 = vadd.s32 496, %v3736_v42 }
 0x256   : > { %v2084_v58 = vadd.f32 %v2083_v51, %v2021_v50  ;;  %2966 = vst [vmem:[%s3468_s14 + $0xc8] sm:$0xff] %v2910_v52   ;;  %v1952_v59 = vadd.f32 %v1951_v49, %v1889_v56  ;;  %v2022_v60 = vmul.f32 %v1889_v56, %v1889_v56  ;;  %v2024_v6 = vmul.f32 %v1891_v62, %v1891_v62 }
 0x257   : > { %2965 = vst [vmem:[%s3468_s14 + $0xc0] sm:$0xff] %v2905_v55   ;;  %v1770_v51 = vadd.s32 488, %v3736_v42  ;;  %v1772_v53 = vadd.s32 504, %v3736_v42  ;;  %vm1836_vm14 = vcmp.lt.s32.totalorder %v1769_v38, %v3738_v63  ;;  %vm1838_vm15 = vcmp.lt.s32.totalorder %v1771_v47, %v3738_v63 }
 0x258   : > { %v1953_v3 = vadd.f32 %v1952_v59, %v1890_v54  ;;  %v2085_v4 = vadd.f32 %v2084_v58, %v2022_v60 }
 0x259   : > { %v3182_v5 = vpop.f32.mrb[48].mxu1  ;;  %vm1837_vm0 = vcmp.lt.s32.totalorder %v1770_v51, %v3738_v63  ;;  %vm1839_vm1 = vcmp.lt.s32.totalorder %v1772_v53, %v3738_v63 }
 0x25a   : > { %v2086_v7 = vadd.f32 %v2085_v4, %v2023_v2  ;;  %v1340_v8 = vpop.f32.mrb[49].mxu1  ;;  %v1954_v9 = vadd.f32 %v1953_v3, %v1891_v62  ;;  %v1894_v18 = vsel %vm1830_vm7, %v3182_v5, 0.0 }
 0x25b   : > { %v1892_v10 = vsel %vm1828_vm6, %v1340_v8, 0.0  ;;  %v3183_v11 = vpop.f32.mrb[50].mxu1  ;;  %v2027_v28 = vmul.f32 %v1894_v18, %v1894_v18 }
 0x25c   : > { %v1955_v13 = vadd.f32 %v1954_v9, %v1892_v10  ;;  %v2025_v14 = vmul.f32 %v1892_v10, %v1892_v10  ;;  %v2087_v15 = vadd.f32 %v2086_v7, %v2024_v6  ;;  %v2920_v16 = vpack.c.bf16 %v3183_v11, %v3182_v5  ;;  %v1343_v17 = vpop.f32.mrb[51].mxu1 }
 0x25d   : > { %v2915_v19 = vpack.c.bf16 %v1343_v17, %v1340_v8  ;;  %v1893_v20 = vsel %vm1829_vm8, %v1343_v17, 0.0  ;;  %v1895_v26 = vsel %vm1831_vm9, %v3183_v11, 0.0 }
 0x25e   : > { %v2088_v22 = vadd.f32 %v2087_v15, %v2025_v14  ;;  %2968 = vst [vmem:[%s3468_s14 + $0xd8] sm:$0xff] %v2920_v16   ;;  %v1956_v23 = vadd.f32 %v1955_v13, %v1893_v20  ;;  %v2026_v24 = vmul.f32 %v1893_v20, %v1893_v20  ;;  %v2028_v32 = vmul.f32 %v1895_v26, %v1895_v26 }
 0x25f   : > { %2967 = vst [vmem:[%s3468_s14 + $0xd0] sm:$0xff] %v2915_v19  }
 0x260   : > { %v1957_v29 = vadd.f32 %v1956_v23, %v1894_v18  ;;  %v2089_v30 = vadd.f32 %v2088_v22, %v2026_v24 }
 0x261   : > { %v3186_v31 = vpop.f32.mrb[52].mxu1 }
 0x262   : > { %v2090_v33 = vadd.f32 %v2089_v30, %v2027_v28  ;;  %v1356_v34 = vpop.f32.mrb[53].mxu1  ;;  %v1958_v35 = vadd.f32 %v1957_v29, %v1895_v26  ;;  %v1898_v1 = vsel %vm1834_vm11, %v3186_v31, 0.0  ;;  %v1707_v30 = vld [vmem:[%s4140_s6] sm:$0x3] }
 0x263   : > { %v1896_v36 = vsel %vm1832_vm10, %v1356_v34, 0.0  ;;  %v3187_v37 = vpop.f32.mrb[54].mxu1  ;;  %v2031_v54 = vmul.f32 %v1898_v1, %v1898_v1 }
 0x264   : > { %v1959_v39 = vadd.f32 %v1958_v35, %v1896_v36  ;;  %v2029_v40 = vmul.f32 %v1896_v36, %v1896_v36  ;;  %v2091_v41 = vadd.f32 %v2090_v33, %v2028_v32  ;;  %v2930_v43 = vpack.c.bf16 %v3187_v37, %v3186_v31  ;;  %v1359_v44 = vpop.f32.mrb[55].mxu1 }
 0x265   : > { %v2925_v45 = vpack.c.bf16 %v1359_v44, %v1356_v34  ;;  %v1897_v46 = vsel %vm1833_vm12, %v1359_v44, 0.0  ;;  %v1899_v52 = vsel %vm1835_vm13, %v3187_v37, 0.0 }
 0x266   : > { %v2092_v48 = vadd.f32 %v2091_v41, %v2029_v40  ;;  %2970 = vst [vmem:[%s3468_s14 + $0xe8] sm:$0xff] %v2930_v43   ;;  %v1960_v49 = vadd.f32 %v1959_v39, %v1897_v46  ;;  %v2030_v50 = vmul.f32 %v1897_v46, %v1897_v46  ;;  %v2032_v58 = vmul.f32 %v1899_v52, %v1899_v52 }
 0x267   : > { %2969 = vst [vmem:[%s3468_s14 + $0xe0] sm:$0xff] %v2925_v45  }
 0x268   : > { %v1961_v55 = vadd.f32 %v1960_v49, %v1898_v1  ;;  %v2093_v56 = vadd.f32 %v2092_v48, %v2030_v50 }
 0x269   : > { %v3190_v57 = vpop.f32.mrb[56].mxu1 }
 0x26a   : > { %v2094_v59 = vadd.f32 %v2093_v56, %v2031_v54  ;;  %v1372_v60 = vpop.f32.mrb[57].mxu1  ;;  %v1962_v61 = vadd.f32 %v1961_v55, %v1899_v52  ;;  %v1902_v7 = vsel %vm1838_vm15, %v3190_v57, 0.0 }
 0x26b   : > { %v1900_v62 = vsel %vm1836_vm14, %v1372_v60, 0.0  ;;  %v3191_v0 = vpop.f32.mrb[58].mxu1  ;;  %v2035_v14 = vmul.f32 %v1902_v7, %v1902_v7 }
 0x26c   : > { %v1963_v2 = vadd.f32 %v1962_v61, %v1900_v62  ;;  %v2033_v3 = vmul.f32 %v1900_v62, %v1900_v62  ;;  %v2095_v4 = vadd.f32 %v2094_v59, %v2032_v58  ;;  %v2940_v5 = vpack.c.bf16 %v3191_v0, %v3190_v57  ;;  %v1375_v6 = vpop.f32.mrb[59].mxu1 }
 0x26d   : > { %v2935_v8 = vpack.c.bf16 %v1375_v6, %v1372_v60  ;;  %v1901_v9 = vsel %vm1837_vm0, %v1375_v6, 0.0  ;;  %v1903_v13 = vsel %vm1839_vm1, %v3191_v0, 0.0 }
 0x26e   : > { %v2096_v10 = vadd.f32 %v2095_v4, %v2033_v3  ;;  %2972 = vst [vmem:[%s3468_s14 + $0xf8] sm:$0xff] %v2940_v5   ;;  %v1964_v11 = vadd.f32 %v1963_v2, %v1901_v9  ;;  %v2034_v12 = vmul.f32 %v1901_v9, %v1901_v9  ;;  %v2036_v17 = vmul.f32 %v1903_v13, %v1903_v13 }
 0x26f   : > { %2971 = vst [vmem:[%s3468_s14 + $0xf0] sm:$0xff] %v2935_v8  }
 0x270   : > { %v1965_v15 = vadd.f32 %v1964_v11, %v1902_v7  ;;  %v2097_v16 = vadd.f32 %v2096_v10, %v2034_v12 }
 0x272   : > { %v1966_v18 = vadd.f32 %v1965_v15, %v1903_v13  ;;  %v2098_v63 = vadd.f32 %v2097_v16, %v2035_v14 }
 0x274   : > { %v1967_v19 = vrot.slane %v1966_v18, 4  ;;  %v2099_v20 = vadd.f32 %v2098_v63, %v2036_v17 }
 0x276   : > { %v1968_v21 = vadd.f32 %v1967_v19, %v1966_v18  ;;  %v2100_v22 = vrot.slane %v2099_v20, 4 }
 0x278   : > { %v1969_v23 = vrot.slane %v1968_v21, 2  ;;  %v2101_v24 = vadd.f32 %v2100_v22, %v2099_v20 }
 0x27a   : > { %v1970_v25 = vadd.f32 %v1969_v23, %v1968_v21  ;;  %v2102_v26 = vrot.slane %v2101_v24, 2 }
 0x27c   : > { %v1971_v27 = vrot.slane %v1970_v25, 1  ;;  %v2103_v28 = vadd.f32 %v2102_v26, %v2101_v24 }
 0x27e   : > { %v2104_v29 = vrot.slane %v2103_v28, 1  ;;  %v1972_v31 = vadd.f32 %v1971_v27, %v1970_v25 }
 0x27f   : > { %2116 = sbr.rel (!%p3454_p4) target bundleno = 737 (0x2e1), region = 48 }
 0x280   : > { %v2105_v32 = vadd.f32 %v2104_v29, %v2103_v28 }
 0x282   : > { %v2107_v33 = vsel %vm2106_vm2, %v1972_v31, %v2105_v32 }
 0x283   : > { %v2108_v34 = vadd.f32 %v2107_v33, %v1707_v30 }
 0x285   : > { %2109 = vst [vmem:[%s4140_s6] sm:$0x3] %v2108_v34 }
 0x286   : > { %s4149_s10 = smov (!%p2119_p9, %s2118_s10), 64 }
 0x287   : > { %s2700_s17 = sshll.u32 %s4149_s10, 6 }
 0x288   : > { %p2703_p10 = scmp.eq.s32.totalorder %s2700_s17, 0 }
 0x289   : > { %s3948_s18 = sshrl.u32 (!%p2703_p10), %s4149_s10, 6 }
 0x28a   : > { %2127 = sbr.rel (%p2703_p10) target bundleno = 737 (0x2e1), region = 52  ;;  %p2704_p11 = scmp.le.s32.totalorder (!%p2703_p10), %s3948_s18, 0 }
 0x291   : > { %2538 = sbr.rel (%p2704_p11) target bundleno = 716 (0x2cc), region = 132  ;;  %s4142_s24 = smov (!%p2704_p11), %s3942_s16 }
 0x292   : > { %s4143_s29 = smov (!%p2704_p11), %s3468_s14  ;;  %s3957_s7 = smov (!%p2704_p11), 0  }
 0x293   : > { %s3959_s19 = smov (!%p2704_p11), 0  }
 0x298 LB: >> { %v2143_v42 = vld [vmem:[%s3370_s29] sm:$0xf]  ;;  %v2145_v35 = vld [vmem:[%s3370_s29 + $0x4] sm:$0xf]  ;;  %v2147_v36 = vld [vmem:[%s3370_s29 + $0x8] sm:$0xf]  ;;  %s3378_s19 = sphi %s3959_s19, %s2137_s19   ;;  %s3374_s7 = sphi %s3957_s7, %s4144_s7   ;;  %s3370_s29 = sphi %s4143_s29, %s2276_s29   ;;  %s3366_s24 = sphi %s4142_s24, %s2277_s24  }
 0x299   : >> { %2144 = vst [vmem:[%s3366_s24] sm:$0xf] %v2143_v42  ;;  %2146 = vst [vmem:[%s3366_s24 + $0x4] sm:$0xf] %v2145_v35  ;;  %v2149_v37 = vld [vmem:[%s3370_s29 + $0xc] sm:$0xf]  ;;  %s2271_s20 = sadd.s32 1, %s3374_s7 }
 0x29a   : >> { %2148 = vst [vmem:[%s3366_s24 + $0x8] sm:$0xf] %v2147_v36  ;;  %v2151_v38 = vld [vmem:[%s3370_s29 + $0x10] sm:$0xf]  ;;  %v2153_v39 = vld [vmem:[%s3370_s29 + $0x14] sm:$0xf]  ;;  %p2272_p12 = scmp.ge.s32.totalorder %s2271_s20, %s3948_s18 }
 0x29b   : >> { %2150 = vst [vmem:[%s3366_s24 + $0xc] sm:$0xf] %v2149_v37  ;;  %2152 = vst [vmem:[%s3366_s24 + $0x10] sm:$0xf] %v2151_v38  ;;  %v2155_v40 = vld [vmem:[%s3370_s29 + $0x18] sm:$0xf] }
 0x29c   : >> { %2154 = vst [vmem:[%s3366_s24 + $0x14] sm:$0xf] %v2153_v39  ;;  %v2157_v41 = vld [vmem:[%s3370_s29 + $0x1c] sm:$0xf]  ;;  %v2159_v43 = vld [vmem:[%s3370_s29 + $0x20] sm:$0xf] }
 0x29d   : >> { %2156 = vst [vmem:[%s3366_s24 + $0x18] sm:$0xf] %v2155_v40  ;;  %2158 = vst [vmem:[%s3366_s24 + $0x1c] sm:$0xf] %v2157_v41  ;;  %v2161_v44 = vld [vmem:[%s3370_s29 + $0x24] sm:$0xf] }
 0x29e   : >> { %2160 = vst [vmem:[%s3366_s24 + $0x20] sm:$0xf] %v2159_v43  ;;  %v2163_v1 = vld [vmem:[%s3370_s29 + $0x28] sm:$0xf]  ;;  %v2165_v45 = vld [vmem:[%s3370_s29 + $0x2c] sm:$0xf] }
 0x29f   : >> { %2162 = vst [vmem:[%s3366_s24 + $0x24] sm:$0xf] %v2161_v44  ;;  %2164 = vst [vmem:[%s3366_s24 + $0x28] sm:$0xf] %v2163_v1  ;;  %v2167_v46 = vld [vmem:[%s3370_s29 + $0x30] sm:$0xf] }
 0x2a0   : >> { %2166 = vst [vmem:[%s3366_s24 + $0x2c] sm:$0xf] %v2165_v45  ;;  %v2169_v47 = vld [vmem:[%s3370_s29 + $0x34] sm:$0xf]  ;;  %v2171_v48 = vld [vmem:[%s3370_s29 + $0x38] sm:$0xf] }
 0x2a1   : >> { %2168 = vst [vmem:[%s3366_s24 + $0x30] sm:$0xf] %v2167_v46  ;;  %2170 = vst [vmem:[%s3366_s24 + $0x34] sm:$0xf] %v2169_v47  ;;  %v2173_v49 = vld [vmem:[%s3370_s29 + $0x3c] sm:$0xf] }
 0x2a2   : >> { %2172 = vst [vmem:[%s3366_s24 + $0x38] sm:$0xf] %v2171_v48  ;;  %v2175_v50 = vld [vmem:[%s3370_s29 + $0x40] sm:$0xf]  ;;  %v2177_v51 = vld [vmem:[%s3370_s29 + $0x44] sm:$0xf] }
 0x2a3   : >> { %2174 = vst [vmem:[%s3366_s24 + $0x3c] sm:$0xf] %v2173_v49  ;;  %2176 = vst [vmem:[%s3366_s24 + $0x40] sm:$0xf] %v2175_v50  ;;  %v2179_v52 = vld [vmem:[%s3370_s29 + $0x48] sm:$0xf] }
 0x2a4   : >> { %2178 = vst [vmem:[%s3366_s24 + $0x44] sm:$0xf] %v2177_v51  ;;  %v2181_v53 = vld [vmem:[%s3370_s29 + $0x4c] sm:$0xf]  ;;  %v2183_v54 = vld [vmem:[%s3370_s29 + $0x50] sm:$0xf] }
 0x2a5   : >> { %2180 = vst [vmem:[%s3366_s24 + $0x48] sm:$0xf] %v2179_v52  ;;  %2182 = vst [vmem:[%s3366_s24 + $0x4c] sm:$0xf] %v2181_v53  ;;  %v2185_v55 = vld [vmem:[%s3370_s29 + $0x54] sm:$0xf] }
 0x2a6   : >> { %2184 = vst [vmem:[%s3366_s24 + $0x50] sm:$0xf] %v2183_v54  ;;  %v2187_v56 = vld [vmem:[%s3370_s29 + $0x58] sm:$0xf]  ;;  %v2189_v57 = vld [vmem:[%s3370_s29 + $0x5c] sm:$0xf] }
 0x2a7   : >> { %2186 = vst [vmem:[%s3366_s24 + $0x54] sm:$0xf] %v2185_v55  ;;  %2188 = vst [vmem:[%s3366_s24 + $0x58] sm:$0xf] %v2187_v56  ;;  %v2191_v58 = vld [vmem:[%s3370_s29 + $0x60] sm:$0xf] }
 0x2a8   : >> { %2190 = vst [vmem:[%s3366_s24 + $0x5c] sm:$0xf] %v2189_v57  ;;  %v2193_v59 = vld [vmem:[%s3370_s29 + $0x64] sm:$0xf]  ;;  %v2195_v60 = vld [vmem:[%s3370_s29 + $0x68] sm:$0xf] }
 0x2a9   : >> { %2192 = vst [vmem:[%s3366_s24 + $0x60] sm:$0xf] %v2191_v58  ;;  %2194 = vst [vmem:[%s3366_s24 + $0x64] sm:$0xf] %v2193_v59  ;;  %v2197_v61 = vld [vmem:[%s3370_s29 + $0x6c] sm:$0xf] }
 0x2aa   : >> { %2196 = vst [vmem:[%s3366_s24 + $0x68] sm:$0xf] %v2195_v60  ;;  %v2199_v62 = vld [vmem:[%s3370_s29 + $0x70] sm:$0xf]  ;;  %v2201_v0 = vld [vmem:[%s3370_s29 + $0x74] sm:$0xf] }
 0x2ab   : >> { %2198 = vst [vmem:[%s3366_s24 + $0x6c] sm:$0xf] %v2197_v61  ;;  %2200 = vst [vmem:[%s3366_s24 + $0x70] sm:$0xf] %v2199_v62  ;;  %v2203_v2 = vld [vmem:[%s3370_s29 + $0x78] sm:$0xf] }
 0x2ac   : >> { %2202 = vst [vmem:[%s3366_s24 + $0x74] sm:$0xf] %v2201_v0  ;;  %v2205_v3 = vld [vmem:[%s3370_s29 + $0x7c] sm:$0xf]  ;;  %v2207_v4 = vld [vmem:[%s3370_s29 + $0x80] sm:$0xf] }
 0x2ad   : >> { %2204 = vst [vmem:[%s3366_s24 + $0x78] sm:$0xf] %v2203_v2  ;;  %2206 = vst [vmem:[%s3366_s24 + $0x7c] sm:$0xf] %v2205_v3  ;;  %v2209_v5 = vld [vmem:[%s3370_s29 + $0x84] sm:$0xf] }
 0x2ae   : >> { %2208 = vst [vmem:[%s3366_s24 + $0x80] sm:$0xf] %v2207_v4  ;;  %v2211_v6 = vld [vmem:[%s3370_s29 + $0x88] sm:$0xf]  ;;  %v2213_v7 = vld [vmem:[%s3370_s29 + $0x8c] sm:$0xf] }
 0x2af   : >> { %2210 = vst [vmem:[%s3366_s24 + $0x84] sm:$0xf] %v2209_v5  ;;  %2212 = vst [vmem:[%s3366_s24 + $0x88] sm:$0xf] %v2211_v6  ;;  %v2215_v8 = vld [vmem:[%s3370_s29 + $0x90] sm:$0xf] }
 0x2b0   : >> { %2214 = vst [vmem:[%s3366_s24 + $0x8c] sm:$0xf] %v2213_v7  ;;  %v2217_v9 = vld [vmem:[%s3370_s29 + $0x94] sm:$0xf]  ;;  %v2219_v10 = vld [vmem:[%s3370_s29 + $0x98] sm:$0xf] }
 0x2b1   : >> { %2216 = vst [vmem:[%s3366_s24 + $0x90] sm:$0xf] %v2215_v8  ;;  %2218 = vst [vmem:[%s3366_s24 + $0x94] sm:$0xf] %v2217_v9  ;;  %v2221_v11 = vld [vmem:[%s3370_s29 + $0x9c] sm:$0xf] }
 0x2b2   : >> { %2220 = vst [vmem:[%s3366_s24 + $0x98] sm:$0xf] %v2219_v10  ;;  %v2223_v12 = vld [vmem:[%s3370_s29 + $0xa0] sm:$0xf]  ;;  %v2225_v13 = vld [vmem:[%s3370_s29 + $0xa4] sm:$0xf] }
 0x2b3   : >> { %2222 = vst [vmem:[%s3366_s24 + $0x9c] sm:$0xf] %v2221_v11  ;;  %2224 = vst [vmem:[%s3366_s24 + $0xa0] sm:$0xf] %v2223_v12  ;;  %v2227_v14 = vld [vmem:[%s3370_s29 + $0xa8] sm:$0xf] }
 0x2b4   : >> { %2226 = vst [vmem:[%s3366_s24 + $0xa4] sm:$0xf] %v2225_v13  ;;  %v2229_v15 = vld [vmem:[%s3370_s29 + $0xac] sm:$0xf]  ;;  %v2231_v16 = vld [vmem:[%s3370_s29 + $0xb0] sm:$0xf] }
 0x2b5   : >> { %2228 = vst [vmem:[%s3366_s24 + $0xa8] sm:$0xf] %v2227_v14  ;;  %2230 = vst [vmem:[%s3366_s24 + $0xac] sm:$0xf] %v2229_v15  ;;  %v2233_v17 = vld [vmem:[%s3370_s29 + $0xb4] sm:$0xf] }
 0x2b6   : >> { %2232 = vst [vmem:[%s3366_s24 + $0xb0] sm:$0xf] %v2231_v16  ;;  %v2235_v18 = vld [vmem:[%s3370_s29 + $0xb8] sm:$0xf]  ;;  %v2237_v63 = vld [vmem:[%s3370_s29 + $0xbc] sm:$0xf] }
 0x2b7   : >> { %2234 = vst [vmem:[%s3366_s24 + $0xb4] sm:$0xf] %v2233_v17  ;;  %2236 = vst [vmem:[%s3366_s24 + $0xb8] sm:$0xf] %v2235_v18  ;;  %v2239_v19 = vld [vmem:[%s3370_s29 + $0xc0] sm:$0xf] }
 0x2b8   : >> { %2238 = vst [vmem:[%s3366_s24 + $0xbc] sm:$0xf] %v2237_v63  ;;  %v2241_v20 = vld [vmem:[%s3370_s29 + $0xc4] sm:$0xf]  ;;  %v2243_v21 = vld [vmem:[%s3370_s29 + $0xc8] sm:$0xf] }
 0x2b9   : >> { %2240 = vst [vmem:[%s3366_s24 + $0xc0] sm:$0xf] %v2239_v19  ;;  %2242 = vst [vmem:[%s3366_s24 + $0xc4] sm:$0xf] %v2241_v20  ;;  %v2245_v22 = vld [vmem:[%s3370_s29 + $0xcc] sm:$0xf] }
 0x2ba   : >> { %2244 = vst [vmem:[%s3366_s24 + $0xc8] sm:$0xf] %v2243_v21  ;;  %v2247_v23 = vld [vmem:[%s3370_s29 + $0xd0] sm:$0xf]  ;;  %v2249_v24 = vld [vmem:[%s3370_s29 + $0xd4] sm:$0xf] }
 0x2bb   : >> { %2246 = vst [vmem:[%s3366_s24 + $0xcc] sm:$0xf] %v2245_v22  ;;  %2248 = vst [vmem:[%s3366_s24 + $0xd0] sm:$0xf] %v2247_v23  ;;  %v2251_v25 = vld [vmem:[%s3370_s29 + $0xd8] sm:$0xf] }
 0x2bc   : >> { %2250 = vst [vmem:[%s3366_s24 + $0xd4] sm:$0xf] %v2249_v24  ;;  %v2253_v26 = vld [vmem:[%s3370_s29 + $0xdc] sm:$0xf]  ;;  %v2255_v27 = vld [vmem:[%s3370_s29 + $0xe0] sm:$0xf] }
 0x2bd   : >> { %2252 = vst [vmem:[%s3366_s24 + $0xd8] sm:$0xf] %v2251_v25  ;;  %2254 = vst [vmem:[%s3366_s24 + $0xdc] sm:$0xf] %v2253_v26  ;;  %v2257_v28 = vld [vmem:[%s3370_s29 + $0xe4] sm:$0xf] }
 0x2be   : >> { %2256 = vst [vmem:[%s3366_s24 + $0xe0] sm:$0xf] %v2255_v27  ;;  %v2259_v29 = vld [vmem:[%s3370_s29 + $0xe8] sm:$0xf]  ;;  %v2261_v30 = vld [vmem:[%s3370_s29 + $0xec] sm:$0xf] }
 0x2bf   : >> { %2258 = vst [vmem:[%s3366_s24 + $0xe4] sm:$0xf] %v2257_v28  ;;  %2260 = vst [vmem:[%s3366_s24 + $0xe8] sm:$0xf] %v2259_v29  ;;  %v2263_v31 = vld [vmem:[%s3370_s29 + $0xf0] sm:$0xf] }
 0x2c0   : >> { %2262 = vst [vmem:[%s3366_s24 + $0xec] sm:$0xf] %v2261_v30  ;;  %v2265_v32 = vld [vmem:[%s3370_s29 + $0xf4] sm:$0xf]  ;;  %v2267_v33 = vld [vmem:[%s3370_s29 + $0xf8] sm:$0xf] }
 0x2c1   : >> { %2264 = vst [vmem:[%s3366_s24 + $0xf0] sm:$0xf] %v2263_v31  ;;  %2266 = vst [vmem:[%s3366_s24 + $0xf4] sm:$0xf] %v2265_v32  ;;  %v2269_v34 = vld [vmem:[%s3370_s29 + $0xfc] sm:$0xf] }
 0x2c2   : >> { %2268 = vst [vmem:[%s3366_s24 + $0xf8] sm:$0xf] %v2267_v33  ;;  %2270 = vst [vmem:[%s3366_s24 + $0xfc] sm:$0xf] %v2269_v34  ;;  %s4151_s20 = smov (%p2272_p12, %s2271_s20), 0  ;;  %s2137_s19 = sadd.s32 1, %s3378_s19  }
 0x2c3   : >> { %s2705_s21 = sshll.u32 %s4151_s20, 8  ;;  %p2136_p13 = scmp.ge.s32.totalorder %s2137_s19, %s3948_s18 }
 0x2c4   : >> { %s2276_s29 = scalar_lea.vmem %s3468_s14, %s2705_s21 [#allocation3]   ;;  %s2277_s24 = scalar_lea.vmem %s3942_s16, %s2705_s21  }
 0x2c5   : >> { %s4144_s7 = smov %s4151_s20  ;;  %2139 = sbr.rel (!%p2136_p13) target bundleno = 664 (0x298), region = 138 }
 0x2cc PF: > { %s4116_s23 = sand.u32 63, %s4149_s10   ;;  %s2780_s13 = sshll.u32 %s3948_s18, 8 }
 0x2cd   : > { %s2282_s26 = scalar_lea.vmem %s3468_s14, %s2780_s13 [#allocation3]   ;;  %s2284_s27 = scalar_lea.vmem %s3942_s16, %s2780_s13  }
 0x2ce   : > { %p2710_p0 = scmp.le.s32.totalorder %s4116_s23, 0 }
 0x2cf   : > { %s3380_s30 = smov (!%p2710_p0), %s2284_s27   ;;  %s3384_s8 = smov (!%p2710_p0), %s2282_s26  }
 0x2d0   : > { %2552 = sbr.rel (%p2710_p0) target bundleno = 737 (0x2e1), region = 143  ;;  %s3388_s9 = smov (!%p2710_p0), 0  }
 0x2d1   : > { %s3392_s11 = smov (!%p2710_p0), 0  }
 0x2d7 LB: >> { %v2294_v42 = vld [vmem:[%s3386_s8] sm:$0xf]  ;;  %s2296_s10 = sadd.s32 1, %s3390_s9  ;;  %s2288_s11 = sadd.s32 1, %s3394_s11   ;;  %s3394_s11 = sphi %s3392_s11, %s2288_s11   ;;  %s3390_s9 = sphi %s3388_s9, %s3389_s9   ;;  %s3386_s8 = sphi %s3384_s8, %s2301_s8   ;;  %s3382_s30 = sphi %s3380_s30, %s2302_s30  }
 0x2d8   : >> { %2295 = vst [vmem:[%s3382_s30] sm:$0xf] %v2294_v42  ;;  %p2297_p1 = scmp.ge.s32.totalorder %s2296_s10, %s4116_s23  ;;  %p2287_p2 = scmp.ge.s32.totalorder %s2288_s11, %s4116_s23 }
 0x2da   : >> { %s4153_s10 = smov (%p2297_p1, %s2296_s10), 0  ;;  %2290 = sbr.rel (!%p2287_p2) target bundleno = 727 (0x2d7), region = 149 }
 0x2db   : >> { %s2711_s14 = sshll.u32 %s4153_s10, 2  ;;  %s3389_s9 = smov %s4153_s10  }
 0x2dc   : >> { %s2301_s8 = scalar_lea.vmem %s2282_s26, %s2711_s14 [#allocation3]   ;;  %s2302_s30 = scalar_lea.vmem %s2284_s27, %s2711_s14  }
 0x2e1 PF: > { %p14_p3 = scmp.ge.s32.totalorder %s3445_s25, 5   ;;  %s4145_s21 = smov %s3358_s22 }
 0x2e2   : > { %s4146_s22 = smov %s3452_s28  ;;  %s4147_s23 = smov %s3445_s25 }
 0x2e3   :  { %16 = sbr.rel (!%p14_p3) target bundleno = 2 (0x2), region = 160 }

</bundles_post_ra>
